<compile_context>
chip_gen: v7x
topology: tpu7x:2x2x1
jax: 0.10.0
libtpu: 0.0.40
codegen_flags: <defaults>
</compile_context>

<pallas_src>
import functools
import math

import jax
import jax.numpy as jnp
from jax import lax
from jax.experimental import pallas as pl
from jax.experimental.pallas import tpu as pltpu


# ----------------------------------------------------------------------------- kernels


def _stage1_kernel(nsample_q, n_mlp1, n_mlp2, *refs):
    """Per (batch, query-tile): kNN into f2, fused gather, MLP1/encode1/MLP2, online softmax."""
    wx_ref, wp_ref, f2xt_ref, tgt_ref = refs[:4]
    wrefs = refs[4:-1]
    out_ref = refs[-1]

    i = 0
    W1a_r, W1b_r, W1c_r, W1d_r, W1e_r, W1f_r, b10_r = wrefs[i:i + 7]
    i += 7
    mlp1_rest_r = [(wrefs[i + 2 * l], wrefs[i + 2 * l + 1]) for l in range(n_mlp1 - 1)]
    i += 2 * (n_mlp1 - 1)
    Va_r, Vb_r, Vc_r, Vd_r, be1_r = wrefs[i:i + 5]
    i += 5
    W20a_r, W20b_r, b20_r = wrefs[i:i + 3]
    i += 3
    mlp2_rest_r = [(wrefs[i + 2 * l], wrefs[i + 2 * l + 1]) for l in range(n_mlp2 - 1)]

    wx = wx_ref[0]          # (tN, 3)      query xyz tile (f32)
    wp = wp_ref[0]          # (tN, C)      query features tile (f32)
    f2xt = f2xt_ref[0]      # (3, M)       target xyz, lane-dense (f32)

    def mm(x, w):
        # matmul in the weight's (compute) dtype, accumulated in f32 on the MXU
        return jnp.dot(x.astype(w.dtype), w, preferred_element_type=jnp.float32)

    # pairwise squared distances, difference-wise (exact f32, no cancellation -> no clamp)
    d0 = wx[:, 0:1] - f2xt[0:1, :]
    d1 = wx[:, 1:2] - f2xt[1:2, :]
    d2 = wx[:, 2:3] - f2xt[2:3, :]
    sq = d0 * d0 + d1 * d1 + d2 * d2                       # (tN, M)

    tn, m = sq.shape
    f1 = out_ref.shape[-1]
    col = lax.broadcasted_iota(jnp.int32, (tn, m), 1)

    # per-query contributions that do not depend on the neighbour slot (hoisted)
    h_shared = mm(wx, W1a_r[...]) + mm(wp, W1e_r[...]) + b10_r[...]   # (tN, mlp1[0])
    e_shared = mm(wx, Va_r[...]) + be1_r[...]                         # (tN, mlp1[-1])

    def body(_, carry):
        remaining, mx, denom, acc = carry

        # iterative arg-min (ties broken toward the lowest index) -> exact one-hot selection
        row_min = jnp.min(remaining, axis=1, keepdims=True)
        first = jnp.min(jnp.where(remaining == row_min, col, m), axis=1, keepdims=True)
        sel = col == first                                 # reused for onehot + update
        remaining = jnp.where(sel, jnp.inf, remaining)

        # fused gather of [xyz | features] via one selection matmul (MXU)
        tgt = tgt_ref[0]                                   # (M, 3+C), compute dtype
        onehot = sel.astype(tgt.dtype)                     # exact in bf16
        g = jnp.dot(onehot, tgt, preferred_element_type=jnp.float32)
        gx = g[:, 0:3]                                     # (tN, 3)
        gp = g[:, 3:]                                      # (tN, C)
        diff = gx - wx
        euc = jnp.sqrt(jnp.sum(diff * diff, axis=-1, keepdims=True) + 1e-20)

        # mlp_convs1[0] over [wx, gx, diff, euc, wp, gp] as split matmuls (no in-kernel concat)
        h = jnp.maximum(h_shared + mm(gx, W1b_r[...]) + mm(diff, W1c_r[...])
                        + euc * W1d_r[...] + mm(gp, W1f_r[...]), 0.0)
        for (w_r, b_r) in mlp1_rest_r:
            h = jnp.maximum(mm(h, w_r[...]) + b_r[...], 0.0)
        # encode1 over [wx, gx, diff, euc]
        e = jnp.maximum(e_shared + mm(gx, Vb_r[...]) + mm(diff, Vc_r[...])
                        + euc * Vd_r[...], 0.0)
        # mlp_convs2 over cat([encode1, mlp1_out]) -> split first layer
        pc = jnp.maximum(mm(e, W20a_r[...]) + mm(h, W20b_r[...]) + b20_r[...], 0.0)
        for (w_r, b_r) in mlp2_rest_r:
            pc = jnp.maximum(mm(pc, w_r[...]) + b_r[...], 0.0)

        # online softmax over neighbour slots (PyTorch softmax dim=3)
        m_new = jnp.maximum(mx, pc)
        scale = jnp.exp(mx - m_new)
        p = jnp.exp(pc - m_new)
        denom = scale * denom + p
        acc = scale * acc + p * h
        return remaining, m_new, denom, acc

    init = (sq,
            jnp.full((tn, f1), -jnp.inf, jnp.float32),
            jnp.zeros((tn, f1), jnp.float32),
            jnp.zeros((tn, f1), jnp.float32))
    _, _, denom, acc = lax.fori_loop(0, nsample_q, body, init, unroll=nsample_q <= 8)

    out_ref[0] = (acc * pl.reciprocal(denom, approx=True)).astype(out_ref.dtype)


def _stage2_kernel(nsample, n_mlp3, *refs):
    """Per (batch, query-tile): self-kNN, fused gather of pi_feat1_new, encode2 + MLP3, online softmax."""
    wx_ref, wp_ref, axt_ref, tgt_ref = refs[:4]
    wrefs = refs[4:-1]
    out_ref = refs[-1]

    Ua_r, Ub_r, Uc_r, Ud_r, be2_r = wrefs[0:5]
    W30a_r, W30b_r, W30c_r, b30_r = wrefs[5:9]
    mlp3_rest_r = [(wrefs[9 + 2 * l], wrefs[9 + 2 * l + 1]) for l in range(n_mlp3 - 1)]

    wx = wx_ref[0]          # (tN, 3)
    wp = wp_ref[0]          # (tN, C)
    axt = axt_ref[0]        # (3, N)   all warped xyz, lane-dense

    def mm(x, w):
        return jnp.dot(x.astype(w.dtype), w, preferred_element_type=jnp.float32)

    d0 = wx[:, 0:1] - axt[0:1, :]
    d1 = wx[:, 1:2] - axt[1:2, :]
    d2 = wx[:, 2:3] - axt[2:3, :]
    sq = d0 * d0 + d1 * d1 + d2 * d2                       # (tN, N)

    tn, n = sq.shape
    f1 = out_ref.shape[-1]
    col = lax.broadcasted_iota(jnp.int32, (tn, n), 1)

    enc_shared = mm(wx, Ua_r[...]) + be2_r[...]            # encode2: query-xyz contribution
    h_shared = mm(wp, W30b_r[...]) + b30_r[...]            # mlp3[0]: pc_points_new contribution

    def body(_, carry):
        remaining, mx, denom, acc = carry

        row_min = jnp.min(remaining, axis=1, keepdims=True)
        first = jnp.min(jnp.where(remaining == row_min, col, n), axis=1, keepdims=True)
        sel = col == first
        remaining = jnp.where(sel, jnp.inf, remaining)

        tgt = tgt_ref[0]                                   # (N, 3+F1), compute dtype
        onehot = sel.astype(tgt.dtype)
        g = jnp.dot(onehot, tgt, preferred_element_type=jnp.float32)
        gx = g[:, 0:3]                                     # (tN, 3)
        gp = g[:, 3:]                                      # (tN, F1)
        diff = gx - wx
        euc = jnp.sqrt(jnp.sum(diff * diff, axis=-1, keepdims=True) + 1e-20)

        enc = jnp.maximum(enc_shared + mm(gx, Ub_r[...]) + mm(diff, Uc_r[...])
                          + euc * Ud_r[...], 0.0)
        h = jnp.maximum(mm(enc, W30a_r[...]) + h_shared + mm(gp, W30c_r[...]), 0.0)
        for (w_r, b_r) in mlp3_rest_r:
            h = jnp.maximum(mm(h, w_r[...]) + b_r[...], 0.0)

        m_new = jnp.maximum(mx, h)
        scale = jnp.exp(mx - m_new)
        p = jnp.exp(h - m_new)
        denom = scale * denom + p
        acc = scale * acc + p * gp
        return remaining, m_new, denom, acc

    init = (sq,
            jnp.full((tn, f1), -jnp.inf, jnp.float32),
            jnp.zeros((tn, f1), jnp.float32),
            jnp.zeros((tn, f1), jnp.float32))
    _, _, denom, acc = lax.fori_loop(0, nsample, body, init, unroll=nsample <= 8)

    out_ref[0] = (acc * pl.reciprocal(denom, approx=True)).astype(out_ref.dtype)


# ----------------------------------------------------------------------------- parameters


def _conv_bn_init(key, cin, cout):
    k = jax.random.split(key, 6)
    bound = 1.0 / math.sqrt(cin)
    w = jax.random.uniform(k[0], (cout, cin), jnp.float32, -bound, bound)
    b = jax.random.uniform(k[1], (cout,), jnp.float32, -bound, bound)
    gamma = jax.random.uniform(k[2], (cout,), jnp.float32, 0.5, 1.5)
    beta = jax.random.uniform(k[3], (cout,), jnp.float32, -0.5, 0.5)
    mean = 0.1 * jax.random.normal(k[4], (cout,), jnp.float32)
    var = jax.random.uniform(k[5], (cout,), jnp.float32, 0.5, 1.5)
    return (w, b), (gamma, beta, mean, var)


def _fold_conv_bn(conv, bn, eps=1e-5):
    """Fold eval-mode BatchNorm into a 1x1 conv; return weight pre-transposed to (cin, cout)."""
    w, b = conv
    gamma, beta, mean, var = bn
    scale = gamma / jnp.sqrt(var + eps)
    w_f = jnp.transpose(w * scale[:, None])                # (cin, cout)
    b_f = (scale * (b - mean) + beta).reshape(1, -1)       # (1, cout)
    return w_f, b_f


def make_cost_volume_params(key, in_channel, mlp1, mlp2):
    assert mlp1[-1] == mlp2[-1], "module requires mlp1[-1] == mlp2[-1] (elementwise gating)"
    keys = iter(jax.random.split(key, 32))
    params = {"mlp1": [], "mlp2": [], "mlp3": []}

    cin = 10 + 2 * in_channel
    for cout in mlp1:
        conv, bn = _conv_bn_init(next(keys), cin, cout)
        params["mlp1"].append(_fold_conv_bn(conv, bn))
        cin = cout
    conv, bn = _conv_bn_init(next(keys), 10, mlp1[-1])     # encode1 + bn1
    params["enc1"] = _fold_conv_bn(conv, bn)

    bn2_list = []
    cin = 2 * mlp1[-1]
    for cout in mlp2:
        conv, bn = _conv_bn_init(next(keys), cin, cout)
        bn2_list.append(bn)
        params["mlp2"].append(_fold_conv_bn(conv, bn))
        cin = cout
    conv, bn = _conv_bn_init(next(keys), 10, mlp2[-1])     # encode2 + self.bn2
    params["enc2"] = _fold_conv_bn(conv, bn)

    cin = mlp1[-1] + mlp2[-1] + in_channel
    for j, cout in enumerate(mlp2):                        # mlp_convs3 reuses mlp_bns2[j]
        conv, _ = _conv_bn_init(next(keys), cin, cout)
        params["mlp3"].append(_fold_conv_bn(conv, bn2_list[j]))
        cin = cout
    return params


# ----------------------------------------------------------------------------- wrapper


def _split_rows(w, sizes):
    out, o = [], 0
    for s in sizes:
        out.append(w[o:o + s])
        o += s
    assert o == w.shape[0]
    return out


def _pick_tile(n, tile_n, cap=128):
    if tile_n is not None:
        assert n % tile_n == 0 and (tile_n % 8 == 0 or tile_n == n)
        return tile_n
    if n % 8 != 0:
        return n
    t = min(n, cap)
    t -= t % 8
    while n % t != 0:
        t -= 8
    return t


def cost_volume_forward(warped_xyz, f2_xyz, warped_points, f2_points, params,
                        nsample, nsample_q, tile_n=None,
                        compute_dtype=jnp.bfloat16,
                        vmem_limit_bytes=48 * 1024 * 1024):
    B, N, _ = warped_xyz.shape
    _, M, _ = f2_xyz.shape
    C = warped_points.shape[-1]
    F1 = params["mlp1"][-1][0].shape[1]
    F2 = params["mlp2"][-1][0].shape[1]
    assert F1 == F2
    assert nsample_q <= M and nsample <= N, "nsample(_q) must not exceed the point counts"

    tN = _pick_tile(N, tile_n)
    cdt = compute_dtype
    cast = lambda w: w.astype(cdt)

    warped_xyz_t = jnp.transpose(warped_xyz, (0, 2, 1))    # (B, 3, N) lane-dense coords
    f2_xyz_t = jnp.transpose(f2_xyz, (0, 2, 1))            # (B, 3, M)
    # fused gather target for stage 1: one selection matmul per slot gathers xyz + features
    tgt1 = jnp.concatenate([f2_xyz, f2_points], axis=-1).astype(cdt)      # (B, M, 3+C)

    def tile_map(b, i):
        return (b, i, 0)

    def batch_map(b, i):
        return (b, 0, 0)

    def const_map(b, i):
        return (0, 0)

    cparams = pltpu.CompilerParams(
        dimension_semantics=("parallel", "parallel"),
        vmem_limit_bytes=vmem_limit_bytes,
    )

    # -------- stage 1: pi_feat1_new  (host-side weight splitting: no in-kernel concat/slice)
    W10, b10 = params["mlp1"][0]
    W1a, W1b, W1c, W1d, W1e, W1f = _split_rows(W10, [3, 3, 3, 1, C, C])
    We1, be1 = params["enc1"]
    Va, Vb, Vc, Vd = _split_rows(We1, [3, 3, 3, 1])
    W20, b20 = params["mlp2"][0]
    W20a, W20b = _split_rows(W20, [F1, F1])

    wflat1 = [cast(W1a), cast(W1b), cast(W1c), W1d, cast(W1e), cast(W1f), b10]
    for (w, b) in params["mlp1"][1:]:
        wflat1 += [cast(w), b]
    wflat1 += [cast(Va), cast(Vb), cast(Vc), Vd, be1, cast(W20a), cast(W20b), b20]
    for (w, b) in params["mlp2"][1:]:
        wflat1 += [cast(w), b]

    in_specs1 = [
        pl.BlockSpec((1, tN, 3), tile_map),
        pl.BlockSpec((1, tN, C), tile_map),
        pl.BlockSpec((1, 3, M), batch_map),
        pl.BlockSpec((1, M, 3 + C), batch_map),
    ] + [pl.BlockSpec(w.shape, const_map) for w in wflat1]

    k1 = functools.partial(_stage1_kernel, nsample_q, len(params["mlp1"]), len(params["mlp2"]))
    pf = pl.pallas_call(
        k1,
        out_shape=jax.ShapeDtypeStruct((B, N, F1), cdt),
        grid_spec=pltpu.PrefetchScalarGridSpec(
            num_scalar_prefetch=0,
            grid=(B, N // tN),
            in_specs=in_specs1,
            out_specs=pl.BlockSpec((1, tN, F1), tile_map),
        ),
        compiler_params=cparams,
    )(warped_xyz, warped_points, f2_xyz_t, tgt1, *wflat1)

    # -------- stage 2: pc_feat1_new
    We2, be2 = params["enc2"]
    Ua, Ub, Uc, Ud = _split_rows(We2, [3, 3, 3, 1])
    W30, b30 = params["mlp3"][0]
    W30a, W30b, W30c = _split_rows(W30, [F2, C, F1])

    wflat2 = [cast(Ua), cast(Ub), cast(Uc), Ud, be2,
              cast(W30a), cast(W30b), cast(W30c), b30]
    for (w, b) in params["mlp3"][1:]:
        wflat2 += [cast(w), b]

    # fused gather target for stage 2: [warped_xyz | pi_feat1_new]
    tgt2 = jnp.concatenate([warped_xyz.astype(cdt), pf], axis=-1)         # (B, N, 3+F1)

    in_specs2 = [
        pl.BlockSpec((1, tN, 3), tile_map),
        pl.BlockSpec((1, tN, C), tile_map),
        pl.BlockSpec((1, 3, N), batch_map),
        pl.BlockSpec((1, N, 3 + F1), batch_map),
    ] + [pl.BlockSpec(w.shape, const_map) for w in wflat2]

    k2 = functools.partial(_stage2_kernel, nsample, len(params["mlp3"]))
    out = pl.pallas_call(
        k2,
        out_shape=jax.ShapeDtypeStruct((B, N, F1), jnp.float32),
        grid_spec=pltpu.PrefetchScalarGridSpec(
            num_scalar_prefetch=0,
            grid=(B, N // tN),
            in_specs=in_specs2,
            out_specs=pl.BlockSpec((1, tN, F1), tile_map),
        ),
        compiler_params=cparams,
    )(warped_xyz, warped_points, warped_xyz_t, tgt2, *wflat2)
    return out


# ----------------------------------------------------------------------------- pure-JAX reference


def cost_volume_reference(warped_xyz, f2_xyz, warped_points, f2_points, params,
                          nsample, nsample_q):
    """Mirrors the PyTorch forward (eval-mode BN folded into the convs)."""
    def sqdist(a, b):
        cross = jnp.einsum("bnc,bmc->bnm", a, b, precision=jax.lax.Precision.HIGHEST)
        return (jnp.sum(a * a, -1)[:, :, None] + jnp.sum(b * b, -1)[:, None, :] - 2.0 * cross)

    def knn_idx(k, xyz, new_xyz):
        d = sqdist(new_xyz, xyz)
        _, idx = lax.top_k(-d, k)
        return idx

    def gather(points, idx):
        return jax.vmap(lambda p, i: p[i])(points, idx)

    # ---- stage 1
    idx_q = knn_idx(nsample_q, f2_xyz, warped_xyz)                    # (B, N, Kq)
    qi_xyz = gather(f2_xyz, idx_q)
    qi_pts = gather(f2_points, idx_q)
    pi_xyz = jnp.broadcast_to(warped_xyz[:, :, None, :], qi_xyz.shape)
    pi_pts = jnp.broadcast_to(warped_points[:, :, None, :], qi_pts.shape)
    diff = qi_xyz - pi_xyz
    euc = jnp.sqrt(jnp.sum(diff * diff, -1, keepdims=True) + 1e-20)
    xyz10 = jnp.concatenate([pi_xyz, qi_xyz, diff, euc], -1)
    h = jnp.concatenate([xyz10, pi_pts, qi_pts], -1)
    for (w, b) in params["mlp1"]:
        h = jax.nn.relu(h @ w + b)
    e = jax.nn.relu(xyz10 @ params["enc1"][0] + params["enc1"][1])
    pc = jnp.concatenate([e, h], -1)
    for (w, b) in params["mlp2"]:
        pc = jax.nn.relu(pc @ w + b)
    WQ = jax.nn.softmax(pc, axis=2)
    pf = jnp.sum(WQ * h, axis=2)                                      # (B, N, F1)

    # ---- stage 2
    idx = knn_idx(nsample, warped_xyz, warped_xyz)                    # (B, N, K)
    gx = gather(warped_xyz, idx)
    gp = gather(pf, idx)
    nx = jnp.broadcast_to(warped_xyz[:, :, None, :], gx.shape)
    npts = jnp.broadcast_to(warped_points[:, :, None, :],
                            gx.shape[:3] + (warped_points.shape[-1],))
    diff = gx - nx
    euc = jnp.sqrt(jnp.sum(diff * diff, -1, keepdims=True) + 1e-20)
    xyz10 = jnp.concatenate([nx, gx, diff, euc], -1)
    enc = jax.nn.relu(xyz10 @ params["enc2"][0] + params["enc2"][1])
    h2 = jnp.concatenate([enc, npts, gp], -1)
    for (w, b) in params["mlp3"]:
        h2 = jax.nn.relu(h2 @ w + b)
    WP = jax.nn.softmax(h2, axis=2)
    return jnp.sum(WP * gp, axis=2)                                   # (B, N, F1)


# ----------------------------------------------------------------------------- test


if __name__ == "__main__":
    key = jax.random.PRNGKey(0)
    B, N, M = 2, 32, 48
    in_channel = 8
    mlp1 = [16, 32]
    mlp2 = [32, 32]
    nsample, nsample_q = 4, 6

    ks = jax.random.split(key, 5)
    warped_xyz = jax.random.normal(ks[0], (B, N, 3), jnp.float32)
    f2_xyz = jax.random.normal(ks[1], (B, M, 3), jnp.float32)
    warped_points = jax.random.normal(ks[2], (B, N, in_channel), jnp.float32)
    f2_points = jax.random.normal(ks[3], (B, M, in_channel), jnp.float32)
    params = make_cost_volume_params(ks[4], in_channel, mlp1, mlp2)

    ref = cost_volume_reference(warped_xyz, f2_xyz, warped_points, f2_points,
                                params, nsample, nsample_q)

    # exact-precision path (f32 MXU matmuls): strict check against the pure-JAX reference
    out_f32 = cost_volume_forward(warped_xyz, f2_xyz, warped_points, f2_points,
                                  params, nsample, nsample_q,
                                  compute_dtype=jnp.float32)
    out_f32 = jax.block_until_ready(out_f32)
    assert out_f32.shape == (B, N, mlp1[-1])
    assert jnp.allclose(out_f32, ref, atol=2e-2, rtol=2e-2), (
        "f32 path mismatch vs pure-JAX reference, max abs diff "
        f"{jnp.max(jnp.abs(out_f32 - ref))}")

    # production path (bf16 MXU matmuls, f32 accumulation): looser relative-error check
    out_bf16 = cost_volume_forward(warped_xyz, f2_xyz, warped_points, f2_points,
                                   params, nsample, nsample_q,
                                   compute_dtype=jnp.bfloat16)
    out_bf16 = jax.block_until_ready(out_bf16)
    rel = jnp.linalg.norm(out_bf16 - ref) / (jnp.linalg.norm(ref) + 1e-12)
    assert rel < 5e-2, f"bf16 path relative error too large: {rel}"

    print("KERNEL_OK")
</pallas_src>

<mosaic_0001>
module attributes {stable_mosaic.version = 11 : i64} {
  func.func @_stage1_kernel(%arg0: i32, %arg1: i32, %arg2: memref<1x32x3xf32, #tpu.memory_space<vmem>>, %arg3: memref<1x32x8xf32, #tpu.memory_space<vmem>>, %arg4: memref<1x3x48xf32, #tpu.memory_space<vmem>>, %arg5: memref<1x48x11xf32, #tpu.memory_space<vmem>>, %arg6: memref<3x16xf32, #tpu.memory_space<vmem>>, %arg7: memref<3x16xf32, #tpu.memory_space<vmem>>, %arg8: memref<3x16xf32, #tpu.memory_space<vmem>>, %arg9: memref<1x16xf32, #tpu.memory_space<vmem>>, %arg10: memref<8x16xf32, #tpu.memory_space<vmem>>, %arg11: memref<8x16xf32, #tpu.memory_space<vmem>>, %arg12: memref<1x16xf32, #tpu.memory_space<vmem>>, %arg13: memref<16x32xf32, #tpu.memory_space<vmem>>, %arg14: memref<1x32xf32, #tpu.memory_space<vmem>>, %arg15: memref<3x32xf32, #tpu.memory_space<vmem>>, %arg16: memref<3x32xf32, #tpu.memory_space<vmem>>, %arg17: memref<3x32xf32, #tpu.memory_space<vmem>>, %arg18: memref<1x32xf32, #tpu.memory_space<vmem>>, %arg19: memref<1x32xf32, #tpu.memory_space<vmem>>, %arg20: memref<32x32xf32, #tpu.memory_space<vmem>>, %arg21: memref<32x32xf32, #tpu.memory_space<vmem>>, %arg22: memref<1x32xf32, #tpu.memory_space<vmem>>, %arg23: memref<32x32xf32, #tpu.memory_space<vmem>>, %arg24: memref<1x32xf32, #tpu.memory_space<vmem>>, %arg25: memref<1x32x32xf32, #tpu.memory_space<vmem>>) attributes {dimension_semantics = [#tpu.dimension_semantics<parallel>, #tpu.dimension_semantics<parallel>], iteration_bounds = array<i64: 2, 1>, scalar_prefetch = 0 : i64, scratch_operands = 0 : i64, tpu.core_type = #tpu.core_type<tc>, window_params = [{transform_indices = @transform_0, window_bounds = array<i64: 1, 32, 3>}, {transform_indices = @transform_1, window_bounds = array<i64: 1, 32, 8>}, {transform_indices = @transform_2, window_bounds = array<i64: 1, 3, 48>}, {transform_indices = @transform_3, window_bounds = array<i64: 1, 48, 11>}, {pipeline_mode = #tpu.pipeline_mode<synchronous>, transform_indices = @transform_4, window_bounds = array<i64: 3, 16>}, {pipeline_mode = #tpu.pipeline_mode<synchronous>, transform_indices = @transform_5, window_bounds = array<i64: 3, 16>}, {pipeline_mode = #tpu.pipeline_mode<synchronous>, transform_indices = @transform_6, window_bounds = array<i64: 3, 16>}, {pipeline_mode = #tpu.pipeline_mode<synchronous>, transform_indices = @transform_7, window_bounds = array<i64: 1, 16>}, {pipeline_mode = #tpu.pipeline_mode<synchronous>, transform_indices = @transform_8, window_bounds = array<i64: 8, 16>}, {pipeline_mode = #tpu.pipeline_mode<synchronous>, transform_indices = @transform_9, window_bounds = array<i64: 8, 16>}, {pipeline_mode = #tpu.pipeline_mode<synchronous>, transform_indices = @transform_10, window_bounds = array<i64: 1, 16>}, {pipeline_mode = #tpu.pipeline_mode<synchronous>, transform_indices = @transform_11, window_bounds = array<i64: 16, 32>}, {pipeline_mode = #tpu.pipeline_mode<synchronous>, transform_indices = @transform_12, window_bounds = array<i64: 1, 32>}, {pipeline_mode = #tpu.pipeline_mode<synchronous>, transform_indices = @transform_13, window_bounds = array<i64: 3, 32>}, {pipeline_mode = #tpu.pipeline_mode<synchronous>, transform_indices = @transform_14, window_bounds = array<i64: 3, 32>}, {pipeline_mode = #tpu.pipeline_mode<synchronous>, transform_indices = @transform_15, window_bounds = array<i64: 3, 32>}, {pipeline_mode = #tpu.pipeline_mode<synchronous>, transform_indices = @transform_16, window_bounds = array<i64: 1, 32>}, {pipeline_mode = #tpu.pipeline_mode<synchronous>, transform_indices = @transform_17, window_bounds = array<i64: 1, 32>}, {pipeline_mode = #tpu.pipeline_mode<synchronous>, transform_indices = @transform_18, window_bounds = array<i64: 32, 32>}, {pipeline_mode = #tpu.pipeline_mode<synchronous>, transform_indices = @transform_19, window_bounds = array<i64: 32, 32>}, {pipeline_mode = #tpu.pipeline_mode<synchronous>, transform_indices = @transform_20, window_bounds = array<i64: 1, 32>}, {pipeline_mode = #tpu.pipeline_mode<synchronous>, transform_indices = @transform_21, window_bounds = array<i64: 32, 32>}, {pipeline_mode = #tpu.pipeline_mode<synchronous>, transform_indices = @transform_22, window_bounds = array<i64: 1, 32>}, {transform_indices = @transform_23, window_bounds = array<i64: 1, 32, 32>}]} {
    %c0 = arith.constant 0 : index
    %c0_0 = arith.constant 0 : index
    %c0_1 = arith.constant 0 : index
    %0 = vector.load %arg2[%c0, %c0_0, %c0_1] : memref<1x32x3xf32, #tpu.memory_space<vmem>>, vector<1x32x3xf32>
    %1 = vector.shape_cast %0 : vector<1x32x3xf32> to vector<32x3xf32>
    %c0_2 = arith.constant 0 : index
    %c0_3 = arith.constant 0 : index
    %c0_4 = arith.constant 0 : index
    %2 = vector.load %arg3[%c0_2, %c0_3, %c0_4] : memref<1x32x8xf32, #tpu.memory_space<vmem>>, vector<1x32x8xf32>
    %3 = vector.shape_cast %2 : vector<1x32x8xf32> to vector<32x8xf32>
    %c0_5 = arith.constant 0 : index
    %c0_6 = arith.constant 0 : index
    %c0_7 = arith.constant 0 : index
    %4 = vector.load %arg4[%c0_5, %c0_6, %c0_7] : memref<1x3x48xf32, #tpu.memory_space<vmem>>, vector<1x3x48xf32>
    %5 = vector.shape_cast %4 : vector<1x3x48xf32> to vector<3x48xf32>
    %6 = vector.extract_strided_slice %1 {offsets = [0, 0], sizes = [32, 1], strides = [1, 1]} : vector<32x3xf32> to vector<32x1xf32>
    %7 = vector.extract_strided_slice %5 {offsets = [0, 0], sizes = [1, 48], strides = [1, 1]} : vector<3x48xf32> to vector<1x48xf32>
    %8 = vector.broadcast %6 : vector<32x1xf32> to vector<32x48xf32>
    %9 = vector.broadcast %7 : vector<1x48xf32> to vector<32x48xf32>
    %10 = arith.subf %8, %9 : vector<32x48xf32>
    %11 = vector.extract_strided_slice %1 {offsets = [0, 1], sizes = [32, 1], strides = [1, 1]} : vector<32x3xf32> to vector<32x1xf32>
    %12 = vector.extract_strided_slice %5 {offsets = [1, 0], sizes = [1, 48], strides = [1, 1]} : vector<3x48xf32> to vector<1x48xf32>
    %13 = vector.broadcast %11 : vector<32x1xf32> to vector<32x48xf32>
    %14 = vector.broadcast %12 : vector<1x48xf32> to vector<32x48xf32>
    %15 = arith.subf %13, %14 : vector<32x48xf32>
    %16 = vector.extract_strided_slice %1 {offsets = [0, 2], sizes = [32, 1], strides = [1, 1]} : vector<32x3xf32> to vector<32x1xf32>
    %17 = vector.extract_strided_slice %5 {offsets = [2, 0], sizes = [1, 48], strides = [1, 1]} : vector<3x48xf32> to vector<1x48xf32>
    %18 = vector.broadcast %16 : vector<32x1xf32> to vector<32x48xf32>
    %19 = vector.broadcast %17 : vector<1x48xf32> to vector<32x48xf32>
    %20 = arith.subf %18, %19 : vector<32x48xf32>
    %21 = arith.mulf %10, %10 : vector<32x48xf32>
    %22 = arith.mulf %15, %15 : vector<32x48xf32>
    %23 = arith.addf %21, %22 : vector<32x48xf32>
    %24 = arith.mulf %20, %20 : vector<32x48xf32>
    %25 = arith.addf %23, %24 : vector<32x48xf32>
    %26 = tpu.iota {dimensions = array<i32: 1>} : vector<32x48xi32>
    %c0_8 = arith.constant 0 : index
    %c0_9 = arith.constant 0 : index
    %27 = vector.load %arg6[%c0_8, %c0_9] : memref<3x16xf32, #tpu.memory_space<vmem>>, vector<3x16xf32>
    %cst = arith.constant dense<0.000000e+00> : vector<32x16xf32>
    %28 = tpu.matmul %1, %27, %cst {dimension_numbers = #tpu.dot_dimension_numbers<[1], [0], [0], [1], [0, 0, 1, 1], [], []>} : vector<32x3xf32>, vector<3x16xf32>, vector<32x16xf32> -> vector<32x16xf32>
    %c0_10 = arith.constant 0 : index
    %c0_11 = arith.constant 0 : index
    %29 = vector.load %arg10[%c0_10, %c0_11] : memref<8x16xf32, #tpu.memory_space<vmem>>, vector<8x16xf32>
    %cst_12 = arith.constant dense<0.000000e+00> : vector<32x16xf32>
    %30 = tpu.matmul %3, %29, %cst_12 {dimension_numbers = #tpu.dot_dimension_numbers<[1], [0], [0], [1], [0, 0, 1, 1], [], []>} : vector<32x8xf32>, vector<8x16xf32>, vector<32x16xf32> -> vector<32x16xf32>
    %31 = arith.addf %28, %30 : vector<32x16xf32>
    %c0_13 = arith.constant 0 : index
    %c0_14 = arith.constant 0 : index
    %32 = vector.load %arg12[%c0_13, %c0_14] : memref<1x16xf32, #tpu.memory_space<vmem>>, vector<1x16xf32>
    %33 = vector.broadcast %32 : vector<1x16xf32> to vector<32x16xf32>
    %34 = arith.addf %31, %33 : vector<32x16xf32>
    %c0_15 = arith.constant 0 : index
    %c0_16 = arith.constant 0 : index
    %35 = vector.load %arg15[%c0_15, %c0_16] : memref<3x32xf32, #tpu.memory_space<vmem>>, vector<3x32xf32>
    %cst_17 = arith.constant dense<0.000000e+00> : vector<32x32xf32>
    %36 = tpu.matmul %1, %35, %cst_17 {dimension_numbers = #tpu.dot_dimension_numbers<[1], [0], [0], [1], [0, 0, 1, 1], [], []>} : vector<32x3xf32>, vector<3x32xf32>, vector<32x32xf32> -> vector<32x32xf32>
    %c0_18 = arith.constant 0 : index
    %c0_19 = arith.constant 0 : index
    %37 = vector.load %arg19[%c0_18, %c0_19] : memref<1x32xf32, #tpu.memory_space<vmem>>, vector<1x32xf32>
    %38 = vector.broadcast %37 : vector<1x32xf32> to vector<32x32xf32>
    %39 = arith.addf %36, %38 : vector<32x32xf32>
    %cst_20 = arith.constant 0xFF800000 : f32
    %40 = vector.broadcast %cst_20 : f32 to vector<32x32xf32>
    %cst_21 = arith.constant 0.000000e+00 : f32
    %41 = vector.broadcast %cst_21 : f32 to vector<32x32xf32>
    %cst_22 = arith.constant 0.000000e+00 : f32
    %42 = vector.broadcast %cst_22 : f32 to vector<32x32xf32>
    %c0_i32 = arith.constant 0 : i32
    %cst_23 = arith.constant dense<0x7F800000> : vector<32xf32>
    %43 = vector.multi_reduction <minimumf>, %25, %cst_23 [1] : vector<32x48xf32> to vector<32xf32>
    %44 = vector.shape_cast %43 : vector<32xf32> to vector<32x1xf32>
    %45 = vector.broadcast %44 : vector<32x1xf32> to vector<32x48xf32>
    %46 = arith.cmpf oeq, %25, %45 : vector<32x48xf32>
    %c48_i32 = arith.constant 48 : i32
    %47 = vector.broadcast %c48_i32 : i32 to vector<32x48xi32>
    %48 = arith.select %46, %26, %47 : vector<32x48xi1>, vector<32x48xi32>
    %cst_24 = arith.constant dense<2147483647> : vector<32xi32>
    %49 = vector.multi_reduction <minsi>, %48, %cst_24 [1] : vector<32x48xi32> to vector<32xi32>
    %50 = vector.shape_cast %49 : vector<32xi32> to vector<32x1xi32>
    %51 = vector.broadcast %50 : vector<32x1xi32> to vector<32x48xi32>
    %52 = arith.cmpi eq, %26, %51 : vector<32x48xi32>
    %cst_25 = arith.constant 0x7F800000 : f32
    %53 = vector.broadcast %cst_25 : f32 to vector<32x48xf32>
    %54 = arith.select %52, %53, %25 : vector<32x48xi1>, vector<32x48xf32>
    %c0_26 = arith.constant 0 : index
    %c0_27 = arith.constant 0 : index
    %c0_28 = arith.constant 0 : index
    %55 = vector.load %arg5[%c0_26, %c0_27, %c0_28] : memref<1x48x11xf32, #tpu.memory_space<vmem>>, vector<1x48x11xf32>
    %56 = vector.shape_cast %55 : vector<1x48x11xf32> to vector<48x11xf32>
    %57 = arith.extui %52 : vector<32x48xi1> to vector<32x48xi32>
    %58 = arith.sitofp %57 : vector<32x48xi32> to vector<32x48xf32>
    %cst_29 = arith.constant dense<0.000000e+00> : vector<32x11xf32>
    %59 = tpu.matmul %58, %56, %cst_29 {dimension_numbers = #tpu.dot_dimension_numbers<[1], [0], [0], [1], [0, 0, 1, 1], [], []>} : vector<32x48xf32>, vector<48x11xf32>, vector<32x11xf32> -> vector<32x11xf32>
    %60 = vector.extract_strided_slice %59 {offsets = [0, 0], sizes = [32, 3], strides = [1, 1]} : vector<32x11xf32> to vector<32x3xf32>
    %61 = vector.extract_strided_slice %59 {offsets = [0, 3], sizes = [32, 8], strides = [1, 1]} : vector<32x11xf32> to vector<32x8xf32>
    %62 = arith.subf %60, %1 : vector<32x3xf32>
    %63 = arith.mulf %62, %62 : vector<32x3xf32>
    %cst_30 = arith.constant dense<0.000000e+00> : vector<32xf32>
    %64 = vector.multi_reduction <add>, %63, %cst_30 [1] : vector<32x3xf32> to vector<32xf32>
    %65 = vector.shape_cast %64 : vector<32xf32> to vector<32x1xf32>
    %cst_31 = arith.constant 9.99999968E-21 : f32
    %66 = vector.broadcast %cst_31 : f32 to vector<32x1xf32>
    %67 = arith.addf %65, %66 : vector<32x1xf32>
    %68 = math.sqrt %67 : vector<32x1xf32>
    %c0_32 = arith.constant 0 : index
    %c0_33 = arith.constant 0 : index
    %69 = vector.load %arg7[%c0_32, %c0_33] : memref<3x16xf32, #tpu.memory_space<vmem>>, vector<3x16xf32>
    %cst_34 = arith.constant dense<0.000000e+00> : vector<32x16xf32>
    %70 = tpu.matmul %60, %69, %cst_34 {dimension_numbers = #tpu.dot_dimension_numbers<[1], [0], [0], [1], [0, 0, 1, 1], [], []>} : vector<32x3xf32>, vector<3x16xf32>, vector<32x16xf32> -> vector<32x16xf32>
    %71 = arith.addf %34, %70 : vector<32x16xf32>
    %c0_35 = arith.constant 0 : index
    %c0_36 = arith.constant 0 : index
    %72 = vector.load %arg8[%c0_35, %c0_36] : memref<3x16xf32, #tpu.memory_space<vmem>>, vector<3x16xf32>
    %cst_37 = arith.constant dense<0.000000e+00> : vector<32x16xf32>
    %73 = tpu.matmul %62, %72, %cst_37 {dimension_numbers = #tpu.dot_dimension_numbers<[1], [0], [0], [1], [0, 0, 1, 1], [], []>} : vector<32x3xf32>, vector<3x16xf32>, vector<32x16xf32> -> vector<32x16xf32>
    %74 = arith.addf %71, %73 : vector<32x16xf32>
    %c0_38 = arith.constant 0 : index
    %c0_39 = arith.constant 0 : index
    %75 = vector.load %arg9[%c0_38, %c0_39] : memref<1x16xf32, #tpu.memory_space<vmem>>, vector<1x16xf32>
    %76 = vector.broadcast %68 : vector<32x1xf32> to vector<32x16xf32>
    %77 = vector.broadcast %75 : vector<1x16xf32> to vector<32x16xf32>
    %78 = arith.mulf %76, %77 : vector<32x16xf32>
    %79 = arith.addf %74, %78 : vector<32x16xf32>
    %c0_40 = arith.constant 0 : index
    %c0_41 = arith.constant 0 : index
    %80 = vector.load %arg11[%c0_40, %c0_41] : memref<8x16xf32, #tpu.memory_space<vmem>>, vector<8x16xf32>
    %cst_42 = arith.constant dense<0.000000e+00> : vector<32x16xf32>
    %81 = tpu.matmul %61, %80, %cst_42 {dimension_numbers = #tpu.dot_dimension_numbers<[1], [0], [0], [1], [0, 0, 1, 1], [], []>} : vector<32x8xf32>, vector<8x16xf32>, vector<32x16xf32> -> vector<32x16xf32>
    %82 = arith.addf %79, %81 : vector<32x16xf32>
    %cst_43 = arith.constant 0.000000e+00 : f32
    %83 = vector.broadcast %cst_43 : f32 to vector<32x16xf32>
    %84 = arith.maximumf %82, %83 : vector<32x16xf32>
    %c0_44 = arith.constant 0 : index
    %c0_45 = arith.constant 0 : index
    %85 = vector.load %arg13[%c0_44, %c0_45] : memref<16x32xf32, #tpu.memory_space<vmem>>, vector<16x32xf32>
    %cst_46 = arith.constant dense<0.000000e+00> : vector<32x32xf32>
    %86 = tpu.matmul %84, %85, %cst_46 {dimension_numbers = #tpu.dot_dimension_numbers<[1], [0], [0], [1], [0, 0, 1, 1], [], []>} : vector<32x16xf32>, vector<16x32xf32>, vector<32x32xf32> -> vector<32x32xf32>
    %c0_47 = arith.constant 0 : index
    %c0_48 = arith.constant 0 : index
    %87 = vector.load %arg14[%c0_47, %c0_48] : memref<1x32xf32, #tpu.memory_space<vmem>>, vector<1x32xf32>
    %88 = vector.broadcast %87 : vector<1x32xf32> to vector<32x32xf32>
    %89 = arith.addf %86, %88 : vector<32x32xf32>
    %cst_49 = arith.constant 0.000000e+00 : f32
    %90 = vector.broadcast %cst_49 : f32 to vector<32x32xf32>
    %91 = arith.maximumf %89, %90 : vector<32x32xf32>
    %c0_50 = arith.constant 0 : index
    %c0_51 = arith.constant 0 : index
    %92 = vector.load %arg16[%c0_50, %c0_51] : memref<3x32xf32, #tpu.memory_space<vmem>>, vector<3x32xf32>
    %cst_52 = arith.constant dense<0.000000e+00> : vector<32x32xf32>
    %93 = tpu.matmul %60, %92, %cst_52 {dimension_numbers = #tpu.dot_dimension_numbers<[1], [0], [0], [1], [0, 0, 1, 1], [], []>} : vector<32x3xf32>, vector<3x32xf32>, vector<32x32xf32> -> vector<32x32xf32>
    %94 = arith.addf %39, %93 : vector<32x32xf32>
    %c0_53 = arith.constant 0 : index
    %c0_54 = arith.constant 0 : index
    %95 = vector.load %arg17[%c0_53, %c0_54] : memref<3x32xf32, #tpu.memory_space<vmem>>, vector<3x32xf32>
    %cst_55 = arith.constant dense<0.000000e+00> : vector<32x32xf32>
    %96 = tpu.matmul %62, %95, %cst_55 {dimension_numbers = #tpu.dot_dimension_numbers<[1], [0], [0], [1], [0, 0, 1, 1], [], []>} : vector<32x3xf32>, vector<3x32xf32>, vector<32x32xf32> -> vector<32x32xf32>
    %97 = arith.addf %94, %96 : vector<32x32xf32>
    %c0_56 = arith.constant 0 : index
    %c0_57 = arith.constant 0 : index
    %98 = vector.load %arg18[%c0_56, %c0_57] : memref<1x32xf32, #tpu.memory_space<vmem>>, vector<1x32xf32>
    %99 = vector.broadcast %68 : vector<32x1xf32> to vector<32x32xf32>
    %100 = vector.broadcast %98 : vector<1x32xf32> to vector<32x32xf32>
    %101 = arith.mulf %99, %100 : vector<32x32xf32>
    %102 = arith.addf %97, %101 : vector<32x32xf32>
    %cst_58 = arith.constant 0.000000e+00 : f32
    %103 = vector.broadcast %cst_58 : f32 to vector<32x32xf32>
    %104 = arith.maximumf %102, %103 : vector<32x32xf32>
    %c0_59 = arith.constant 0 : index
    %c0_60 = arith.constant 0 : index
    %105 = vector.load %arg20[%c0_59, %c0_60] : memref<32x32xf32, #tpu.memory_space<vmem>>, vector<32x32xf32>
    %cst_61 = arith.constant dense<0.000000e+00> : vector<32x32xf32>
    %106 = tpu.matmul %104, %105, %cst_61 {dimension_numbers = #tpu.dot_dimension_numbers<[1], [0], [0], [1], [0, 0, 1, 1], [], []>} : vector<32x32xf32>, vector<32x32xf32>, vector<32x32xf32> -> vector<32x32xf32>
    %c0_62 = arith.constant 0 : index
    %c0_63 = arith.constant 0 : index
    %107 = vector.load %arg21[%c0_62, %c0_63] : memref<32x32xf32, #tpu.memory_space<vmem>>, vector<32x32xf32>
    %cst_64 = arith.constant dense<0.000000e+00> : vector<32x32xf32>
    %108 = tpu.matmul %91, %107, %cst_64 {dimension_numbers = #tpu.dot_dimension_numbers<[1], [0], [0], [1], [0, 0, 1, 1], [], []>} : vector<32x32xf32>, vector<32x32xf32>, vector<32x32xf32> -> vector<32x32xf32>
    %109 = arith.addf %106, %108 : vector<32x32xf32>
    %c0_65 = arith.constant 0 : index
    %c0_66 = arith.constant 0 : index
    %110 = vector.load %arg22[%c0_65, %c0_66] : memref<1x32xf32, #tpu.memory_space<vmem>>, vector<1x32xf32>
    %111 = vector.broadcast %110 : vector<1x32xf32> to vector<32x32xf32>
    %112 = arith.addf %109, %111 : vector<32x32xf32>
    %cst_67 = arith.constant 0.000000e+00 : f32
    %113 = vector.broadcast %cst_67 : f32 to vector<32x32xf32>
    %114 = arith.maximumf %112, %113 : vector<32x32xf32>
    %c0_68 = arith.constant 0 : index
    %c0_69 = arith.constant 0 : index
    %115 = vector.load %arg23[%c0_68, %c0_69] : memref<32x32xf32, #tpu.memory_space<vmem>>, vector<32x32xf32>
    %cst_70 = arith.constant dense<0.000000e+00> : vector<32x32xf32>
    %116 = tpu.matmul %114, %115, %cst_70 {dimension_numbers = #tpu.dot_dimension_numbers<[1], [0], [0], [1], [0, 0, 1, 1], [], []>} : vector<32x32xf32>, vector<32x32xf32>, vector<32x32xf32> -> vector<32x32xf32>
    %c0_71 = arith.constant 0 : index
    %c0_72 = arith.constant 0 : index
    %117 = vector.load %arg24[%c0_71, %c0_72] : memref<1x32xf32, #tpu.memory_space<vmem>>, vector<1x32xf32>
    %118 = vector.broadcast %117 : vector<1x32xf32> to vector<32x32xf32>
    %119 = arith.addf %116, %118 : vector<32x32xf32>
    %cst_73 = arith.constant 0.000000e+00 : f32
    %120 = vector.broadcast %cst_73 : f32 to vector<32x32xf32>
    %121 = arith.maximumf %119, %120 : vector<32x32xf32>
    %122 = arith.maximumf %40, %121 : vector<32x32xf32>
    %123 = arith.subf %40, %122 : vector<32x32xf32>
    %124 = math.exp %123 : vector<32x32xf32>
    %125 = arith.subf %121, %122 : vector<32x32xf32>
    %126 = math.exp %125 : vector<32x32xf32>
    %127 = arith.mulf %124, %41 : vector<32x32xf32>
    %128 = arith.addf %127, %126 : vector<32x32xf32>
    %129 = arith.mulf %124, %42 : vector<32x32xf32>
    %130 = arith.mulf %126, %91 : vector<32x32xf32>
    %131 = arith.addf %129, %130 : vector<32x32xf32>
    %c1_i32 = arith.constant 1 : i32
    %cst_74 = arith.constant dense<0x7F800000> : vector<32xf32>
    %132 = vector.multi_reduction <minimumf>, %54, %cst_74 [1] : vector<32x48xf32> to vector<32xf32>
    %133 = vector.shape_cast %132 : vector<32xf32> to vector<32x1xf32>
    %134 = vector.broadcast %133 : vector<32x1xf32> to vector<32x48xf32>
    %135 = arith.cmpf oeq, %54, %134 : vector<32x48xf32>
    %c48_i32_75 = arith.constant 48 : i32
    %136 = vector.broadcast %c48_i32_75 : i32 to vector<32x48xi32>
    %137 = arith.select %135, %26, %136 : vector<32x48xi1>, vector<32x48xi32>
    %cst_76 = arith.constant dense<2147483647> : vector<32xi32>
    %138 = vector.multi_reduction <minsi>, %137, %cst_76 [1] : vector<32x48xi32> to vector<32xi32>
    %139 = vector.shape_cast %138 : vector<32xi32> to vector<32x1xi32>
    %140 = vector.broadcast %139 : vector<32x1xi32> to vector<32x48xi32>
    %141 = arith.cmpi eq, %26, %140 : vector<32x48xi32>
    %cst_77 = arith.constant 0x7F800000 : f32
    %142 = vector.broadcast %cst_77 : f32 to vector<32x48xf32>
    %143 = arith.select %141, %142, %54 : vector<32x48xi1>, vector<32x48xf32>
    %c0_78 = arith.constant 0 : index
    %c0_79 = arith.constant 0 : index
    %c0_80 = arith.constant 0 : index
    %144 = vector.load %arg5[%c0_78, %c0_79, %c0_80] : memref<1x48x11xf32, #tpu.memory_space<vmem>>, vector<1x48x11xf32>
    %145 = vector.shape_cast %144 : vector<1x48x11xf32> to vector<48x11xf32>
    %146 = arith.extui %141 : vector<32x48xi1> to vector<32x48xi32>
    %147 = arith.sitofp %146 : vector<32x48xi32> to vector<32x48xf32>
    %cst_81 = arith.constant dense<0.000000e+00> : vector<32x11xf32>
    %148 = tpu.matmul %147, %145, %cst_81 {dimension_numbers = #tpu.dot_dimension_numbers<[1], [0], [0], [1], [0, 0, 1, 1], [], []>} : vector<32x48xf32>, vector<48x11xf32>, vector<32x11xf32> -> vector<32x11xf32>
    %149 = vector.extract_strided_slice %148 {offsets = [0, 0], sizes = [32, 3], strides = [1, 1]} : vector<32x11xf32> to vector<32x3xf32>
    %150 = vector.extract_strided_slice %148 {offsets = [0, 3], sizes = [32, 8], strides = [1, 1]} : vector<32x11xf32> to vector<32x8xf32>
    %151 = arith.subf %149, %1 : vector<32x3xf32>
    %152 = arith.mulf %151, %151 : vector<32x3xf32>
    %cst_82 = arith.constant dense<0.000000e+00> : vector<32xf32>
    %153 = vector.multi_reduction <add>, %152, %cst_82 [1] : vector<32x3xf32> to vector<32xf32>
    %154 = vector.shape_cast %153 : vector<32xf32> to vector<32x1xf32>
    %cst_83 = arith.constant 9.99999968E-21 : f32
    %155 = vector.broadcast %cst_83 : f32 to vector<32x1xf32>
    %156 = arith.addf %154, %155 : vector<32x1xf32>
    %157 = math.sqrt %156 : vector<32x1xf32>
    %c0_84 = arith.constant 0 : index
    %c0_85 = arith.constant 0 : index
    %158 = vector.load %arg7[%c0_84, %c0_85] : memref<3x16xf32, #tpu.memory_space<vmem>>, vector<3x16xf32>
    %cst_86 = arith.constant dense<0.000000e+00> : vector<32x16xf32>
    %159 = tpu.matmul %149, %158, %cst_86 {dimension_numbers = #tpu.dot_dimension_numbers<[1], [0], [0], [1], [0, 0, 1, 1], [], []>} : vector<32x3xf32>, vector<3x16xf32>, vector<32x16xf32> -> vector<32x16xf32>
    %160 = arith.addf %34, %159 : vector<32x16xf32>
    %c0_87 = arith.constant 0 : index
    %c0_88 = arith.constant 0 : index
    %161 = vector.load %arg8[%c0_87, %c0_88] : memref<3x16xf32, #tpu.memory_space<vmem>>, vector<3x16xf32>
    %cst_89 = arith.constant dense<0.000000e+00> : vector<32x16xf32>
    %162 = tpu.matmul %151, %161, %cst_89 {dimension_numbers = #tpu.dot_dimension_numbers<[1], [0], [0], [1], [0, 0, 1, 1], [], []>} : vector<32x3xf32>, vector<3x16xf32>, vector<32x16xf32> -> vector<32x16xf32>
    %163 = arith.addf %160, %162 : vector<32x16xf32>
    %c0_90 = arith.constant 0 : index
    %c0_91 = arith.constant 0 : index
    %164 = vector.load %arg9[%c0_90, %c0_91] : memref<1x16xf32, #tpu.memory_space<vmem>>, vector<1x16xf32>
    %165 = vector.broadcast %157 : vector<32x1xf32> to vector<32x16xf32>
    %166 = vector.broadcast %164 : vector<1x16xf32> to vector<32x16xf32>
    %167 = arith.mulf %165, %166 : vector<32x16xf32>
    %168 = arith.addf %163, %167 : vector<32x16xf32>
    %c0_92 = arith.constant 0 : index
    %c0_93 = arith.constant 0 : index
    %169 = vector.load %arg11[%c0_92, %c0_93] : memref<8x16xf32, #tpu.memory_space<vmem>>, vector<8x16xf32>
    %cst_94 = arith.constant dense<0.000000e+00> : vector<32x16xf32>
    %170 = tpu.matmul %150, %169, %cst_94 {dimension_numbers = #tpu.dot_dimension_numbers<[1], [0], [0], [1], [0, 0, 1, 1], [], []>} : vector<32x8xf32>, vector<8x16xf32>, vector<32x16xf32> -> vector<32x16xf32>
    %171 = arith.addf %168, %170 : vector<32x16xf32>
    %cst_95 = arith.constant 0.000000e+00 : f32
    %172 = vector.broadcast %cst_95 : f32 to vector<32x16xf32>
    %173 = arith.maximumf %171, %172 : vector<32x16xf32>
    %c0_96 = arith.constant 0 : index
    %c0_97 = arith.constant 0 : index
    %174 = vector.load %arg13[%c0_96, %c0_97] : memref<16x32xf32, #tpu.memory_space<vmem>>, vector<16x32xf32>
    %cst_98 = arith.constant dense<0.000000e+00> : vector<32x32xf32>
    %175 = tpu.matmul %173, %174, %cst_98 {dimension_numbers = #tpu.dot_dimension_numbers<[1], [0], [0], [1], [0, 0, 1, 1], [], []>} : vector<32x16xf32>, vector<16x32xf32>, vector<32x32xf32> -> vector<32x32xf32>
    %c0_99 = arith.constant 0 : index
    %c0_100 = arith.constant 0 : index
    %176 = vector.load %arg14[%c0_99, %c0_100] : memref<1x32xf32, #tpu.memory_space<vmem>>, vector<1x32xf32>
    %177 = vector.broadcast %176 : vector<1x32xf32> to vector<32x32xf32>
    %178 = arith.addf %175, %177 : vector<32x32xf32>
    %cst_101 = arith.constant 0.000000e+00 : f32
    %179 = vector.broadcast %cst_101 : f32 to vector<32x32xf32>
    %180 = arith.maximumf %178, %179 : vector<32x32xf32>
    %c0_102 = arith.constant 0 : index
    %c0_103 = arith.constant 0 : index
    %181 = vector.load %arg16[%c0_102, %c0_103] : memref<3x32xf32, #tpu.memory_space<vmem>>, vector<3x32xf32>
    %cst_104 = arith.constant dense<0.000000e+00> : vector<32x32xf32>
    %182 = tpu.matmul %149, %181, %cst_104 {dimension_numbers = #tpu.dot_dimension_numbers<[1], [0], [0], [1], [0, 0, 1, 1], [], []>} : vector<32x3xf32>, vector<3x32xf32>, vector<32x32xf32> -> vector<32x32xf32>
    %183 = arith.addf %39, %182 : vector<32x32xf32>
    %c0_105 = arith.constant 0 : index
    %c0_106 = arith.constant 0 : index
    %184 = vector.load %arg17[%c0_105, %c0_106] : memref<3x32xf32, #tpu.memory_space<vmem>>, vector<3x32xf32>
    %cst_107 = arith.constant dense<0.000000e+00> : vector<32x32xf32>
    %185 = tpu.matmul %151, %184, %cst_107 {dimension_numbers = #tpu.dot_dimension_numbers<[1], [0], [0], [1], [0, 0, 1, 1], [], []>} : vector<32x3xf32>, vector<3x32xf32>, vector<32x32xf32> -> vector<32x32xf32>
    %186 = arith.addf %183, %185 : vector<32x32xf32>
    %c0_108 = arith.constant 0 : index
    %c0_109 = arith.constant 0 : index
    %187 = vector.load %arg18[%c0_108, %c0_109] : memref<1x32xf32, #tpu.memory_space<vmem>>, vector<1x32xf32>
    %188 = vector.broadcast %157 : vector<32x1xf32> to vector<32x32xf32>
    %189 = vector.broadcast %187 : vector<1x32xf32> to vector<32x32xf32>
    %190 = arith.mulf %188, %189 : vector<32x32xf32>
    %191 = arith.addf %186, %190 : vector<32x32xf32>
    %cst_110 = arith.constant 0.000000e+00 : f32
    %192 = vector.broadcast %cst_110 : f32 to vector<32x32xf32>
    %193 = arith.maximumf %191, %192 : vector<32x32xf32>
    %c0_111 = arith.constant 0 : index
    %c0_112 = arith.constant 0 : index
    %194 = vector.load %arg20[%c0_111, %c0_112] : memref<32x32xf32, #tpu.memory_space<vmem>>, vector<32x32xf32>
    %cst_113 = arith.constant dense<0.000000e+00> : vector<32x32xf32>
    %195 = tpu.matmul %193, %194, %cst_113 {dimension_numbers = #tpu.dot_dimension_numbers<[1], [0], [0], [1], [0, 0, 1, 1], [], []>} : vector<32x32xf32>, vector<32x32xf32>, vector<32x32xf32> -> vector<32x32xf32>
    %c0_114 = arith.constant 0 : index
    %c0_115 = arith.constant 0 : index
    %196 = vector.load %arg21[%c0_114, %c0_115] : memref<32x32xf32, #tpu.memory_space<vmem>>, vector<32x32xf32>
    %cst_116 = arith.constant dense<0.000000e+00> : vector<32x32xf32>
    %197 = tpu.matmul %180, %196, %cst_116 {dimension_numbers = #tpu.dot_dimension_numbers<[1], [0], [0], [1], [0, 0, 1, 1], [], []>} : vector<32x32xf32>, vector<32x32xf32>, vector<32x32xf32> -> vector<32x32xf32>
    %198 = arith.addf %195, %197 : vector<32x32xf32>
    %c0_117 = arith.constant 0 : index
    %c0_118 = arith.constant 0 : index
    %199 = vector.load %arg22[%c0_117, %c0_118] : memref<1x32xf32, #tpu.memory_space<vmem>>, vector<1x32xf32>
    %200 = vector.broadcast %199 : vector<1x32xf32> to vector<32x32xf32>
    %201 = arith.addf %198, %200 : vector<32x32xf32>
    %cst_119 = arith.constant 0.000000e+00 : f32
    %202 = vector.broadcast %cst_119 : f32 to vector<32x32xf32>
    %203 = arith.maximumf %201, %202 : vector<32x32xf32>
    %c0_120 = arith.constant 0 : index
    %c0_121 = arith.constant 0 : index
    %204 = vector.load %arg23[%c0_120, %c0_121] : memref<32x32xf32, #tpu.memory_space<vmem>>, vector<32x32xf32>
    %cst_122 = arith.constant dense<0.000000e+00> : vector<32x32xf32>
    %205 = tpu.matmul %203, %204, %cst_122 {dimension_numbers = #tpu.dot_dimension_numbers<[1], [0], [0], [1], [0, 0, 1, 1], [], []>} : vector<32x32xf32>, vector<32x32xf32>, vector<32x32xf32> -> vector<32x32xf32>
    %c0_123 = arith.constant 0 : index
    %c0_124 = arith.constant 0 : index
    %206 = vector.load %arg24[%c0_123, %c0_124] : memref<1x32xf32, #tpu.memory_space<vmem>>, vector<1x32xf32>
    %207 = vector.broadcast %206 : vector<1x32xf32> to vector<32x32xf32>
    %208 = arith.addf %205, %207 : vector<32x32xf32>
    %cst_125 = arith.constant 0.000000e+00 : f32
    %209 = vector.broadcast %cst_125 : f32 to vector<32x32xf32>
    %210 = arith.maximumf %208, %209 : vector<32x32xf32>
    %211 = arith.maximumf %122, %210 : vector<32x32xf32>
    %212 = arith.subf %122, %211 : vector<32x32xf32>
    %213 = math.exp %212 : vector<32x32xf32>
    %214 = arith.subf %210, %211 : vector<32x32xf32>
    %215 = math.exp %214 : vector<32x32xf32>
    %216 = arith.mulf %213, %128 : vector<32x32xf32>
    %217 = arith.addf %216, %215 : vector<32x32xf32>
    %218 = arith.mulf %213, %131 : vector<32x32xf32>
    %219 = arith.mulf %215, %180 : vector<32x32xf32>
    %220 = arith.addf %218, %219 : vector<32x32xf32>
    %c2_i32 = arith.constant 2 : i32
    %cst_126 = arith.constant dense<0x7F800000> : vector<32xf32>
    %221 = vector.multi_reduction <minimumf>, %143, %cst_126 [1] : vector<32x48xf32> to vector<32xf32>
    %222 = vector.shape_cast %221 : vector<32xf32> to vector<32x1xf32>
    %223 = vector.broadcast %222 : vector<32x1xf32> to vector<32x48xf32>
    %224 = arith.cmpf oeq, %143, %223 : vector<32x48xf32>
    %c48_i32_127 = arith.constant 48 : i32
    %225 = vector.broadcast %c48_i32_127 : i32 to vector<32x48xi32>
    %226 = arith.select %224, %26, %225 : vector<32x48xi1>, vector<32x48xi32>
    %cst_128 = arith.constant dense<2147483647> : vector<32xi32>
    %227 = vector.multi_reduction <minsi>, %226, %cst_128 [1] : vector<32x48xi32> to vector<32xi32>
    %228 = vector.shape_cast %227 : vector<32xi32> to vector<32x1xi32>
    %229 = vector.broadcast %228 : vector<32x1xi32> to vector<32x48xi32>
    %230 = arith.cmpi eq, %26, %229 : vector<32x48xi32>
    %cst_129 = arith.constant 0x7F800000 : f32
    %231 = vector.broadcast %cst_129 : f32 to vector<32x48xf32>
    %232 = arith.select %230, %231, %143 : vector<32x48xi1>, vector<32x48xf32>
    %c0_130 = arith.constant 0 : index
    %c0_131 = arith.constant 0 : index
    %c0_132 = arith.constant 0 : index
    %233 = vector.load %arg5[%c0_130, %c0_131, %c0_132] : memref<1x48x11xf32, #tpu.memory_space<vmem>>, vector<1x48x11xf32>
    %234 = vector.shape_cast %233 : vector<1x48x11xf32> to vector<48x11xf32>
    %235 = arith.extui %230 : vector<32x48xi1> to vector<32x48xi32>
    %236 = arith.sitofp %235 : vector<32x48xi32> to vector<32x48xf32>
    %cst_133 = arith.constant dense<0.000000e+00> : vector<32x11xf32>
    %237 = tpu.matmul %236, %234, %cst_133 {dimension_numbers = #tpu.dot_dimension_numbers<[1], [0], [0], [1], [0, 0, 1, 1], [], []>} : vector<32x48xf32>, vector<48x11xf32>, vector<32x11xf32> -> vector<32x11xf32>
    %238 = vector.extract_strided_slice %237 {offsets = [0, 0], sizes = [32, 3], strides = [1, 1]} : vector<32x11xf32> to vector<32x3xf32>
    %239 = vector.extract_strided_slice %237 {offsets = [0, 3], sizes = [32, 8], strides = [1, 1]} : vector<32x11xf32> to vector<32x8xf32>
    %240 = arith.subf %238, %1 : vector<32x3xf32>
    %241 = arith.mulf %240, %240 : vector<32x3xf32>
    %cst_134 = arith.constant dense<0.000000e+00> : vector<32xf32>
    %242 = vector.multi_reduction <add>, %241, %cst_134 [1] : vector<32x3xf32> to vector<32xf32>
    %243 = vector.shape_cast %242 : vector<32xf32> to vector<32x1xf32>
    %cst_135 = arith.constant 9.99999968E-21 : f32
    %244 = vector.broadcast %cst_135 : f32 to vector<32x1xf32>
    %245 = arith.addf %243, %244 : vector<32x1xf32>
    %246 = math.sqrt %245 : vector<32x1xf32>
    %c0_136 = arith.constant 0 : index
    %c0_137 = arith.constant 0 : index
    %247 = vector.load %arg7[%c0_136, %c0_137] : memref<3x16xf32, #tpu.memory_space<vmem>>, vector<3x16xf32>
    %cst_138 = arith.constant dense<0.000000e+00> : vector<32x16xf32>
    %248 = tpu.matmul %238, %247, %cst_138 {dimension_numbers = #tpu.dot_dimension_numbers<[1], [0], [0], [1], [0, 0, 1, 1], [], []>} : vector<32x3xf32>, vector<3x16xf32>, vector<32x16xf32> -> vector<32x16xf32>
    %249 = arith.addf %34, %248 : vector<32x16xf32>
    %c0_139 = arith.constant 0 : index
    %c0_140 = arith.constant 0 : index
    %250 = vector.load %arg8[%c0_139, %c0_140] : memref<3x16xf32, #tpu.memory_space<vmem>>, vector<3x16xf32>
    %cst_141 = arith.constant dense<0.000000e+00> : vector<32x16xf32>
    %251 = tpu.matmul %240, %250, %cst_141 {dimension_numbers = #tpu.dot_dimension_numbers<[1], [0], [0], [1], [0, 0, 1, 1], [], []>} : vector<32x3xf32>, vector<3x16xf32>, vector<32x16xf32> -> vector<32x16xf32>
    %252 = arith.addf %249, %251 : vector<32x16xf32>
    %c0_142 = arith.constant 0 : index
    %c0_143 = arith.constant 0 : index
    %253 = vector.load %arg9[%c0_142, %c0_143] : memref<1x16xf32, #tpu.memory_space<vmem>>, vector<1x16xf32>
    %254 = vector.broadcast %246 : vector<32x1xf32> to vector<32x16xf32>
    %255 = vector.broadcast %253 : vector<1x16xf32> to vector<32x16xf32>
    %256 = arith.mulf %254, %255 : vector<32x16xf32>
    %257 = arith.addf %252, %256 : vector<32x16xf32>
    %c0_144 = arith.constant 0 : index
    %c0_145 = arith.constant 0 : index
    %258 = vector.load %arg11[%c0_144, %c0_145] : memref<8x16xf32, #tpu.memory_space<vmem>>, vector<8x16xf32>
    %cst_146 = arith.constant dense<0.000000e+00> : vector<32x16xf32>
    %259 = tpu.matmul %239, %258, %cst_146 {dimension_numbers = #tpu.dot_dimension_numbers<[1], [0], [0], [1], [0, 0, 1, 1], [], []>} : vector<32x8xf32>, vector<8x16xf32>, vector<32x16xf32> -> vector<32x16xf32>
    %260 = arith.addf %257, %259 : vector<32x16xf32>
    %cst_147 = arith.constant 0.000000e+00 : f32
    %261 = vector.broadcast %cst_147 : f32 to vector<32x16xf32>
    %262 = arith.maximumf %260, %261 : vector<32x16xf32>
    %c0_148 = arith.constant 0 : index
    %c0_149 = arith.constant 0 : index
    %263 = vector.load %arg13[%c0_148, %c0_149] : memref<16x32xf32, #tpu.memory_space<vmem>>, vector<16x32xf32>
    %cst_150 = arith.constant dense<0.000000e+00> : vector<32x32xf32>
    %264 = tpu.matmul %262, %263, %cst_150 {dimension_numbers = #tpu.dot_dimension_numbers<[1], [0], [0], [1], [0, 0, 1, 1], [], []>} : vector<32x16xf32>, vector<16x32xf32>, vector<32x32xf32> -> vector<32x32xf32>
    %c0_151 = arith.constant 0 : index
    %c0_152 = arith.constant 0 : index
    %265 = vector.load %arg14[%c0_151, %c0_152] : memref<1x32xf32, #tpu.memory_space<vmem>>, vector<1x32xf32>
    %266 = vector.broadcast %265 : vector<1x32xf32> to vector<32x32xf32>
    %267 = arith.addf %264, %266 : vector<32x32xf32>
    %cst_153 = arith.constant 0.000000e+00 : f32
    %268 = vector.broadcast %cst_153 : f32 to vector<32x32xf32>
    %269 = arith.maximumf %267, %268 : vector<32x32xf32>
    %c0_154 = arith.constant 0 : index
    %c0_155 = arith.constant 0 : index
    %270 = vector.load %arg16[%c0_154, %c0_155] : memref<3x32xf32, #tpu.memory_space<vmem>>, vector<3x32xf32>
    %cst_156 = arith.constant dense<0.000000e+00> : vector<32x32xf32>
    %271 = tpu.matmul %238, %270, %cst_156 {dimension_numbers = #tpu.dot_dimension_numbers<[1], [0], [0], [1], [0, 0, 1, 1], [], []>} : vector<32x3xf32>, vector<3x32xf32>, vector<32x32xf32> -> vector<32x32xf32>
    %272 = arith.addf %39, %271 : vector<32x32xf32>
    %c0_157 = arith.constant 0 : index
    %c0_158 = arith.constant 0 : index
    %273 = vector.load %arg17[%c0_157, %c0_158] : memref<3x32xf32, #tpu.memory_space<vmem>>, vector<3x32xf32>
    %cst_159 = arith.constant dense<0.000000e+00> : vector<32x32xf32>
    %274 = tpu.matmul %240, %273, %cst_159 {dimension_numbers = #tpu.dot_dimension_numbers<[1], [0], [0], [1], [0, 0, 1, 1], [], []>} : vector<32x3xf32>, vector<3x32xf32>, vector<32x32xf32> -> vector<32x32xf32>
    %275 = arith.addf %272, %274 : vector<32x32xf32>
    %c0_160 = arith.constant 0 : index
    %c0_161 = arith.constant 0 : index
    %276 = vector.load %arg18[%c0_160, %c0_161] : memref<1x32xf32, #tpu.memory_space<vmem>>, vector<1x32xf32>
    %277 = vector.broadcast %246 : vector<32x1xf32> to vector<32x32xf32>
    %278 = vector.broadcast %276 : vector<1x32xf32> to vector<32x32xf32>
    %279 = arith.mulf %277, %278 : vector<32x32xf32>
    %280 = arith.addf %275, %279 : vector<32x32xf32>
    %cst_162 = arith.constant 0.000000e+00 : f32
    %281 = vector.broadcast %cst_162 : f32 to vector<32x32xf32>
    %282 = arith.maximumf %280, %281 : vector<32x32xf32>
    %c0_163 = arith.constant 0 : index
    %c0_164 = arith.constant 0 : index
    %283 = vector.load %arg20[%c0_163, %c0_164] : memref<32x32xf32, #tpu.memory_space<vmem>>, vector<32x32xf32>
    %cst_165 = arith.constant dense<0.000000e+00> : vector<32x32xf32>
    %284 = tpu.matmul %282, %283, %cst_165 {dimension_numbers = #tpu.dot_dimension_numbers<[1], [0], [0], [1], [0, 0, 1, 1], [], []>} : vector<32x32xf32>, vector<32x32xf32>, vector<32x32xf32> -> vector<32x32xf32>
    %c0_166 = arith.constant 0 : index
    %c0_167 = arith.constant 0 : index
    %285 = vector.load %arg21[%c0_166, %c0_167] : memref<32x32xf32, #tpu.memory_space<vmem>>, vector<32x32xf32>
    %cst_168 = arith.constant dense<0.000000e+00> : vector<32x32xf32>
    %286 = tpu.matmul %269, %285, %cst_168 {dimension_numbers = #tpu.dot_dimension_numbers<[1], [0], [0], [1], [0, 0, 1, 1], [], []>} : vector<32x32xf32>, vector<32x32xf32>, vector<32x32xf32> -> vector<32x32xf32>
    %287 = arith.addf %284, %286 : vector<32x32xf32>
    %c0_169 = arith.constant 0 : index
    %c0_170 = arith.constant 0 : index
    %288 = vector.load %arg22[%c0_169, %c0_170] : memref<1x32xf32, #tpu.memory_space<vmem>>, vector<1x32xf32>
    %289 = vector.broadcast %288 : vector<1x32xf32> to vector<32x32xf32>
    %290 = arith.addf %287, %289 : vector<32x32xf32>
    %cst_171 = arith.constant 0.000000e+00 : f32
    %291 = vector.broadcast %cst_171 : f32 to vector<32x32xf32>
    %292 = arith.maximumf %290, %291 : vector<32x32xf32>
    %c0_172 = arith.constant 0 : index
    %c0_173 = arith.constant 0 : index
    %293 = vector.load %arg23[%c0_172, %c0_173] : memref<32x32xf32, #tpu.memory_space<vmem>>, vector<32x32xf32>
    %cst_174 = arith.constant dense<0.000000e+00> : vector<32x32xf32>
    %294 = tpu.matmul %292, %293, %cst_174 {dimension_numbers = #tpu.dot_dimension_numbers<[1], [0], [0], [1], [0, 0, 1, 1], [], []>} : vector<32x32xf32>, vector<32x32xf32>, vector<32x32xf32> -> vector<32x32xf32>
    %c0_175 = arith.constant 0 : index
    %c0_176 = arith.constant 0 : index
    %295 = vector.load %arg24[%c0_175, %c0_176] : memref<1x32xf32, #tpu.memory_space<vmem>>, vector<1x32xf32>
    %296 = vector.broadcast %295 : vector<1x32xf32> to vector<32x32xf32>
    %297 = arith.addf %294, %296 : vector<32x32xf32>
    %cst_177 = arith.constant 0.000000e+00 : f32
    %298 = vector.broadcast %cst_177 : f32 to vector<32x32xf32>
    %299 = arith.maximumf %297, %298 : vector<32x32xf32>
    %300 = arith.maximumf %211, %299 : vector<32x32xf32>
    %301 = arith.subf %211, %300 : vector<32x32xf32>
    %302 = math.exp %301 : vector<32x32xf32>
    %303 = arith.subf %299, %300 : vector<32x32xf32>
    %304 = math.exp %303 : vector<32x32xf32>
    %305 = arith.mulf %302, %217 : vector<32x32xf32>
    %306 = arith.addf %305, %304 : vector<32x32xf32>
    %307 = arith.mulf %302, %220 : vector<32x32xf32>
    %308 = arith.mulf %304, %269 : vector<32x32xf32>
    %309 = arith.addf %307, %308 : vector<32x32xf32>
    %c3_i32 = arith.constant 3 : i32
    %cst_178 = arith.constant dense<0x7F800000> : vector<32xf32>
    %310 = vector.multi_reduction <minimumf>, %232, %cst_178 [1] : vector<32x48xf32> to vector<32xf32>
    %311 = vector.shape_cast %310 : vector<32xf32> to vector<32x1xf32>
    %312 = vector.broadcast %311 : vector<32x1xf32> to vector<32x48xf32>
    %313 = arith.cmpf oeq, %232, %312 : vector<32x48xf32>
    %c48_i32_179 = arith.constant 48 : i32
    %314 = vector.broadcast %c48_i32_179 : i32 to vector<32x48xi32>
    %315 = arith.select %313, %26, %314 : vector<32x48xi1>, vector<32x48xi32>
    %cst_180 = arith.constant dense<2147483647> : vector<32xi32>
    %316 = vector.multi_reduction <minsi>, %315, %cst_180 [1] : vector<32x48xi32> to vector<32xi32>
    %317 = vector.shape_cast %316 : vector<32xi32> to vector<32x1xi32>
    %318 = vector.broadcast %317 : vector<32x1xi32> to vector<32x48xi32>
    %319 = arith.cmpi eq, %26, %318 : vector<32x48xi32>
    %cst_181 = arith.constant 0x7F800000 : f32
    %320 = vector.broadcast %cst_181 : f32 to vector<32x48xf32>
    %321 = arith.select %319, %320, %232 : vector<32x48xi1>, vector<32x48xf32>
    %c0_182 = arith.constant 0 : index
    %c0_183 = arith.constant 0 : index
    %c0_184 = arith.constant 0 : index
    %322 = vector.load %arg5[%c0_182, %c0_183, %c0_184] : memref<1x48x11xf32, #tpu.memory_space<vmem>>, vector<1x48x11xf32>
    %323 = vector.shape_cast %322 : vector<1x48x11xf32> to vector<48x11xf32>
    %324 = arith.extui %319 : vector<32x48xi1> to vector<32x48xi32>
    %325 = arith.sitofp %324 : vector<32x48xi32> to vector<32x48xf32>
    %cst_185 = arith.constant dense<0.000000e+00> : vector<32x11xf32>
    %326 = tpu.matmul %325, %323, %cst_185 {dimension_numbers = #tpu.dot_dimension_numbers<[1], [0], [0], [1], [0, 0, 1, 1], [], []>} : vector<32x48xf32>, vector<48x11xf32>, vector<32x11xf32> -> vector<32x11xf32>
    %327 = vector.extract_strided_slice %326 {offsets = [0, 0], sizes = [32, 3], strides = [1, 1]} : vector<32x11xf32> to vector<32x3xf32>
    %328 = vector.extract_strided_slice %326 {offsets = [0, 3], sizes = [32, 8], strides = [1, 1]} : vector<32x11xf32> to vector<32x8xf32>
    %329 = arith.subf %327, %1 : vector<32x3xf32>
    %330 = arith.mulf %329, %329 : vector<32x3xf32>
    %cst_186 = arith.constant dense<0.000000e+00> : vector<32xf32>
    %331 = vector.multi_reduction <add>, %330, %cst_186 [1] : vector<32x3xf32> to vector<32xf32>
    %332 = vector.shape_cast %331 : vector<32xf32> to vector<32x1xf32>
    %cst_187 = arith.constant 9.99999968E-21 : f32
    %333 = vector.broadcast %cst_187 : f32 to vector<32x1xf32>
    %334 = arith.addf %332, %333 : vector<32x1xf32>
    %335 = math.sqrt %334 : vector<32x1xf32>
    %c0_188 = arith.constant 0 : index
    %c0_189 = arith.constant 0 : index
    %336 = vector.load %arg7[%c0_188, %c0_189] : memref<3x16xf32, #tpu.memory_space<vmem>>, vector<3x16xf32>
    %cst_190 = arith.constant dense<0.000000e+00> : vector<32x16xf32>
    %337 = tpu.matmul %327, %336, %cst_190 {dimension_numbers = #tpu.dot_dimension_numbers<[1], [0], [0], [1], [0, 0, 1, 1], [], []>} : vector<32x3xf32>, vector<3x16xf32>, vector<32x16xf32> -> vector<32x16xf32>
    %338 = arith.addf %34, %337 : vector<32x16xf32>
    %c0_191 = arith.constant 0 : index
    %c0_192 = arith.constant 0 : index
    %339 = vector.load %arg8[%c0_191, %c0_192] : memref<3x16xf32, #tpu.memory_space<vmem>>, vector<3x16xf32>
    %cst_193 = arith.constant dense<0.000000e+00> : vector<32x16xf32>
    %340 = tpu.matmul %329, %339, %cst_193 {dimension_numbers = #tpu.dot_dimension_numbers<[1], [0], [0], [1], [0, 0, 1, 1], [], []>} : vector<32x3xf32>, vector<3x16xf32>, vector<32x16xf32> -> vector<32x16xf32>
    %341 = arith.addf %338, %340 : vector<32x16xf32>
    %c0_194 = arith.constant 0 : index
    %c0_195 = arith.constant 0 : index
    %342 = vector.load %arg9[%c0_194, %c0_195] : memref<1x16xf32, #tpu.memory_space<vmem>>, vector<1x16xf32>
    %343 = vector.broadcast %335 : vector<32x1xf32> to vector<32x16xf32>
    %344 = vector.broadcast %342 : vector<1x16xf32> to vector<32x16xf32>
    %345 = arith.mulf %343, %344 : vector<32x16xf32>
    %346 = arith.addf %341, %345 : vector<32x16xf32>
    %c0_196 = arith.constant 0 : index
    %c0_197 = arith.constant 0 : index
    %347 = vector.load %arg11[%c0_196, %c0_197] : memref<8x16xf32, #tpu.memory_space<vmem>>, vector<8x16xf32>
    %cst_198 = arith.constant dense<0.000000e+00> : vector<32x16xf32>
    %348 = tpu.matmul %328, %347, %cst_198 {dimension_numbers = #tpu.dot_dimension_numbers<[1], [0], [0], [1], [0, 0, 1, 1], [], []>} : vector<32x8xf32>, vector<8x16xf32>, vector<32x16xf32> -> vector<32x16xf32>
    %349 = arith.addf %346, %348 : vector<32x16xf32>
    %cst_199 = arith.constant 0.000000e+00 : f32
    %350 = vector.broadcast %cst_199 : f32 to vector<32x16xf32>
    %351 = arith.maximumf %349, %350 : vector<32x16xf32>
    %c0_200 = arith.constant 0 : index
    %c0_201 = arith.constant 0 : index
    %352 = vector.load %arg13[%c0_200, %c0_201] : memref<16x32xf32, #tpu.memory_space<vmem>>, vector<16x32xf32>
    %cst_202 = arith.constant dense<0.000000e+00> : vector<32x32xf32>
    %353 = tpu.matmul %351, %352, %cst_202 {dimension_numbers = #tpu.dot_dimension_numbers<[1], [0], [0], [1], [0, 0, 1, 1], [], []>} : vector<32x16xf32>, vector<16x32xf32>, vector<32x32xf32> -> vector<32x32xf32>
    %c0_203 = arith.constant 0 : index
    %c0_204 = arith.constant 0 : index
    %354 = vector.load %arg14[%c0_203, %c0_204] : memref<1x32xf32, #tpu.memory_space<vmem>>, vector<1x32xf32>
    %355 = vector.broadcast %354 : vector<1x32xf32> to vector<32x32xf32>
    %356 = arith.addf %353, %355 : vector<32x32xf32>
    %cst_205 = arith.constant 0.000000e+00 : f32
    %357 = vector.broadcast %cst_205 : f32 to vector<32x32xf32>
    %358 = arith.maximumf %356, %357 : vector<32x32xf32>
    %c0_206 = arith.constant 0 : index
    %c0_207 = arith.constant 0 : index
    %359 = vector.load %arg16[%c0_206, %c0_207] : memref<3x32xf32, #tpu.memory_space<vmem>>, vector<3x32xf32>
    %cst_208 = arith.constant dense<0.000000e+00> : vector<32x32xf32>
    %360 = tpu.matmul %327, %359, %cst_208 {dimension_numbers = #tpu.dot_dimension_numbers<[1], [0], [0], [1], [0, 0, 1, 1], [], []>} : vector<32x3xf32>, vector<3x32xf32>, vector<32x32xf32> -> vector<32x32xf32>
    %361 = arith.addf %39, %360 : vector<32x32xf32>
    %c0_209 = arith.constant 0 : index
    %c0_210 = arith.constant 0 : index
    %362 = vector.load %arg17[%c0_209, %c0_210] : memref<3x32xf32, #tpu.memory_space<vmem>>, vector<3x32xf32>
    %cst_211 = arith.constant dense<0.000000e+00> : vector<32x32xf32>
    %363 = tpu.matmul %329, %362, %cst_211 {dimension_numbers = #tpu.dot_dimension_numbers<[1], [0], [0], [1], [0, 0, 1, 1], [], []>} : vector<32x3xf32>, vector<3x32xf32>, vector<32x32xf32> -> vector<32x32xf32>
    %364 = arith.addf %361, %363 : vector<32x32xf32>
    %c0_212 = arith.constant 0 : index
    %c0_213 = arith.constant 0 : index
    %365 = vector.load %arg18[%c0_212, %c0_213] : memref<1x32xf32, #tpu.memory_space<vmem>>, vector<1x32xf32>
    %366 = vector.broadcast %335 : vector<32x1xf32> to vector<32x32xf32>
    %367 = vector.broadcast %365 : vector<1x32xf32> to vector<32x32xf32>
    %368 = arith.mulf %366, %367 : vector<32x32xf32>
    %369 = arith.addf %364, %368 : vector<32x32xf32>
    %cst_214 = arith.constant 0.000000e+00 : f32
    %370 = vector.broadcast %cst_214 : f32 to vector<32x32xf32>
    %371 = arith.maximumf %369, %370 : vector<32x32xf32>
    %c0_215 = arith.constant 0 : index
    %c0_216 = arith.constant 0 : index
    %372 = vector.load %arg20[%c0_215, %c0_216] : memref<32x32xf32, #tpu.memory_space<vmem>>, vector<32x32xf32>
    %cst_217 = arith.constant dense<0.000000e+00> : vector<32x32xf32>
    %373 = tpu.matmul %371, %372, %cst_217 {dimension_numbers = #tpu.dot_dimension_numbers<[1], [0], [0], [1], [0, 0, 1, 1], [], []>} : vector<32x32xf32>, vector<32x32xf32>, vector<32x32xf32> -> vector<32x32xf32>
    %c0_218 = arith.constant 0 : index
    %c0_219 = arith.constant 0 : index
    %374 = vector.load %arg21[%c0_218, %c0_219] : memref<32x32xf32, #tpu.memory_space<vmem>>, vector<32x32xf32>
    %cst_220 = arith.constant dense<0.000000e+00> : vector<32x32xf32>
    %375 = tpu.matmul %358, %374, %cst_220 {dimension_numbers = #tpu.dot_dimension_numbers<[1], [0], [0], [1], [0, 0, 1, 1], [], []>} : vector<32x32xf32>, vector<32x32xf32>, vector<32x32xf32> -> vector<32x32xf32>
    %376 = arith.addf %373, %375 : vector<32x32xf32>
    %c0_221 = arith.constant 0 : index
    %c0_222 = arith.constant 0 : index
    %377 = vector.load %arg22[%c0_221, %c0_222] : memref<1x32xf32, #tpu.memory_space<vmem>>, vector<1x32xf32>
    %378 = vector.broadcast %377 : vector<1x32xf32> to vector<32x32xf32>
    %379 = arith.addf %376, %378 : vector<32x32xf32>
    %cst_223 = arith.constant 0.000000e+00 : f32
    %380 = vector.broadcast %cst_223 : f32 to vector<32x32xf32>
    %381 = arith.maximumf %379, %380 : vector<32x32xf32>
    %c0_224 = arith.constant 0 : index
    %c0_225 = arith.constant 0 : index
    %382 = vector.load %arg23[%c0_224, %c0_225] : memref<32x32xf32, #tpu.memory_space<vmem>>, vector<32x32xf32>
    %cst_226 = arith.constant dense<0.000000e+00> : vector<32x32xf32>
    %383 = tpu.matmul %381, %382, %cst_226 {dimension_numbers = #tpu.dot_dimension_numbers<[1], [0], [0], [1], [0, 0, 1, 1], [], []>} : vector<32x32xf32>, vector<32x32xf32>, vector<32x32xf32> -> vector<32x32xf32>
    %c0_227 = arith.constant 0 : index
    %c0_228 = arith.constant 0 : index
    %384 = vector.load %arg24[%c0_227, %c0_228] : memref<1x32xf32, #tpu.memory_space<vmem>>, vector<1x32xf32>
    %385 = vector.broadcast %384 : vector<1x32xf32> to vector<32x32xf32>
    %386 = arith.addf %383, %385 : vector<32x32xf32>
    %cst_229 = arith.constant 0.000000e+00 : f32
    %387 = vector.broadcast %cst_229 : f32 to vector<32x32xf32>
    %388 = arith.maximumf %386, %387 : vector<32x32xf32>
    %389 = arith.maximumf %300, %388 : vector<32x32xf32>
    %390 = arith.subf %300, %389 : vector<32x32xf32>
    %391 = math.exp %390 : vector<32x32xf32>
    %392 = arith.subf %388, %389 : vector<32x32xf32>
    %393 = math.exp %392 : vector<32x32xf32>
    %394 = arith.mulf %391, %306 : vector<32x32xf32>
    %395 = arith.addf %394, %393 : vector<32x32xf32>
    %396 = arith.mulf %391, %309 : vector<32x32xf32>
    %397 = arith.mulf %393, %358 : vector<32x32xf32>
    %398 = arith.addf %396, %397 : vector<32x32xf32>
    %c4_i32 = arith.constant 4 : i32
    %cst_230 = arith.constant dense<0x7F800000> : vector<32xf32>
    %399 = vector.multi_reduction <minimumf>, %321, %cst_230 [1] : vector<32x48xf32> to vector<32xf32>
    %400 = vector.shape_cast %399 : vector<32xf32> to vector<32x1xf32>
    %401 = vector.broadcast %400 : vector<32x1xf32> to vector<32x48xf32>
    %402 = arith.cmpf oeq, %321, %401 : vector<32x48xf32>
    %c48_i32_231 = arith.constant 48 : i32
    %403 = vector.broadcast %c48_i32_231 : i32 to vector<32x48xi32>
    %404 = arith.select %402, %26, %403 : vector<32x48xi1>, vector<32x48xi32>
    %cst_232 = arith.constant dense<2147483647> : vector<32xi32>
    %405 = vector.multi_reduction <minsi>, %404, %cst_232 [1] : vector<32x48xi32> to vector<32xi32>
    %406 = vector.shape_cast %405 : vector<32xi32> to vector<32x1xi32>
    %407 = vector.broadcast %406 : vector<32x1xi32> to vector<32x48xi32>
    %408 = arith.cmpi eq, %26, %407 : vector<32x48xi32>
    %cst_233 = arith.constant 0x7F800000 : f32
    %409 = vector.broadcast %cst_233 : f32 to vector<32x48xf32>
    %410 = arith.select %408, %409, %321 : vector<32x48xi1>, vector<32x48xf32>
    %c0_234 = arith.constant 0 : index
    %c0_235 = arith.constant 0 : index
    %c0_236 = arith.constant 0 : index
    %411 = vector.load %arg5[%c0_234, %c0_235, %c0_236] : memref<1x48x11xf32, #tpu.memory_space<vmem>>, vector<1x48x11xf32>
    %412 = vector.shape_cast %411 : vector<1x48x11xf32> to vector<48x11xf32>
    %413 = arith.extui %408 : vector<32x48xi1> to vector<32x48xi32>
    %414 = arith.sitofp %413 : vector<32x48xi32> to vector<32x48xf32>
    %cst_237 = arith.constant dense<0.000000e+00> : vector<32x11xf32>
    %415 = tpu.matmul %414, %412, %cst_237 {dimension_numbers = #tpu.dot_dimension_numbers<[1], [0], [0], [1], [0, 0, 1, 1], [], []>} : vector<32x48xf32>, vector<48x11xf32>, vector<32x11xf32> -> vector<32x11xf32>
    %416 = vector.extract_strided_slice %415 {offsets = [0, 0], sizes = [32, 3], strides = [1, 1]} : vector<32x11xf32> to vector<32x3xf32>
    %417 = vector.extract_strided_slice %415 {offsets = [0, 3], sizes = [32, 8], strides = [1, 1]} : vector<32x11xf32> to vector<32x8xf32>
    %418 = arith.subf %416, %1 : vector<32x3xf32>
    %419 = arith.mulf %418, %418 : vector<32x3xf32>
    %cst_238 = arith.constant dense<0.000000e+00> : vector<32xf32>
    %420 = vector.multi_reduction <add>, %419, %cst_238 [1] : vector<32x3xf32> to vector<32xf32>
    %421 = vector.shape_cast %420 : vector<32xf32> to vector<32x1xf32>
    %cst_239 = arith.constant 9.99999968E-21 : f32
    %422 = vector.broadcast %cst_239 : f32 to vector<32x1xf32>
    %423 = arith.addf %421, %422 : vector<32x1xf32>
    %424 = math.sqrt %423 : vector<32x1xf32>
    %c0_240 = arith.constant 0 : index
    %c0_241 = arith.constant 0 : index
    %425 = vector.load %arg7[%c0_240, %c0_241] : memref<3x16xf32, #tpu.memory_space<vmem>>, vector<3x16xf32>
    %cst_242 = arith.constant dense<0.000000e+00> : vector<32x16xf32>
    %426 = tpu.matmul %416, %425, %cst_242 {dimension_numbers = #tpu.dot_dimension_numbers<[1], [0], [0], [1], [0, 0, 1, 1], [], []>} : vector<32x3xf32>, vector<3x16xf32>, vector<32x16xf32> -> vector<32x16xf32>
    %427 = arith.addf %34, %426 : vector<32x16xf32>
    %c0_243 = arith.constant 0 : index
    %c0_244 = arith.constant 0 : index
    %428 = vector.load %arg8[%c0_243, %c0_244] : memref<3x16xf32, #tpu.memory_space<vmem>>, vector<3x16xf32>
    %cst_245 = arith.constant dense<0.000000e+00> : vector<32x16xf32>
    %429 = tpu.matmul %418, %428, %cst_245 {dimension_numbers = #tpu.dot_dimension_numbers<[1], [0], [0], [1], [0, 0, 1, 1], [], []>} : vector<32x3xf32>, vector<3x16xf32>, vector<32x16xf32> -> vector<32x16xf32>
    %430 = arith.addf %427, %429 : vector<32x16xf32>
    %c0_246 = arith.constant 0 : index
    %c0_247 = arith.constant 0 : index
    %431 = vector.load %arg9[%c0_246, %c0_247] : memref<1x16xf32, #tpu.memory_space<vmem>>, vector<1x16xf32>
    %432 = vector.broadcast %424 : vector<32x1xf32> to vector<32x16xf32>
    %433 = vector.broadcast %431 : vector<1x16xf32> to vector<32x16xf32>
    %434 = arith.mulf %432, %433 : vector<32x16xf32>
    %435 = arith.addf %430, %434 : vector<32x16xf32>
    %c0_248 = arith.constant 0 : index
    %c0_249 = arith.constant 0 : index
    %436 = vector.load %arg11[%c0_248, %c0_249] : memref<8x16xf32, #tpu.memory_space<vmem>>, vector<8x16xf32>
    %cst_250 = arith.constant dense<0.000000e+00> : vector<32x16xf32>
    %437 = tpu.matmul %417, %436, %cst_250 {dimension_numbers = #tpu.dot_dimension_numbers<[1], [0], [0], [1], [0, 0, 1, 1], [], []>} : vector<32x8xf32>, vector<8x16xf32>, vector<32x16xf32> -> vector<32x16xf32>
    %438 = arith.addf %435, %437 : vector<32x16xf32>
    %cst_251 = arith.constant 0.000000e+00 : f32
    %439 = vector.broadcast %cst_251 : f32 to vector<32x16xf32>
    %440 = arith.maximumf %438, %439 : vector<32x16xf32>
    %c0_252 = arith.constant 0 : index
    %c0_253 = arith.constant 0 : index
    %441 = vector.load %arg13[%c0_252, %c0_253] : memref<16x32xf32, #tpu.memory_space<vmem>>, vector<16x32xf32>
    %cst_254 = arith.constant dense<0.000000e+00> : vector<32x32xf32>
    %442 = tpu.matmul %440, %441, %cst_254 {dimension_numbers = #tpu.dot_dimension_numbers<[1], [0], [0], [1], [0, 0, 1, 1], [], []>} : vector<32x16xf32>, vector<16x32xf32>, vector<32x32xf32> -> vector<32x32xf32>
    %c0_255 = arith.constant 0 : index
    %c0_256 = arith.constant 0 : index
    %443 = vector.load %arg14[%c0_255, %c0_256] : memref<1x32xf32, #tpu.memory_space<vmem>>, vector<1x32xf32>
    %444 = vector.broadcast %443 : vector<1x32xf32> to vector<32x32xf32>
    %445 = arith.addf %442, %444 : vector<32x32xf32>
    %cst_257 = arith.constant 0.000000e+00 : f32
    %446 = vector.broadcast %cst_257 : f32 to vector<32x32xf32>
    %447 = arith.maximumf %445, %446 : vector<32x32xf32>
    %c0_258 = arith.constant 0 : index
    %c0_259 = arith.constant 0 : index
    %448 = vector.load %arg16[%c0_258, %c0_259] : memref<3x32xf32, #tpu.memory_space<vmem>>, vector<3x32xf32>
    %cst_260 = arith.constant dense<0.000000e+00> : vector<32x32xf32>
    %449 = tpu.matmul %416, %448, %cst_260 {dimension_numbers = #tpu.dot_dimension_numbers<[1], [0], [0], [1], [0, 0, 1, 1], [], []>} : vector<32x3xf32>, vector<3x32xf32>, vector<32x32xf32> -> vector<32x32xf32>
    %450 = arith.addf %39, %449 : vector<32x32xf32>
    %c0_261 = arith.constant 0 : index
    %c0_262 = arith.constant 0 : index
    %451 = vector.load %arg17[%c0_261, %c0_262] : memref<3x32xf32, #tpu.memory_space<vmem>>, vector<3x32xf32>
    %cst_263 = arith.constant dense<0.000000e+00> : vector<32x32xf32>
    %452 = tpu.matmul %418, %451, %cst_263 {dimension_numbers = #tpu.dot_dimension_numbers<[1], [0], [0], [1], [0, 0, 1, 1], [], []>} : vector<32x3xf32>, vector<3x32xf32>, vector<32x32xf32> -> vector<32x32xf32>
    %453 = arith.addf %450, %452 : vector<32x32xf32>
    %c0_264 = arith.constant 0 : index
    %c0_265 = arith.constant 0 : index
    %454 = vector.load %arg18[%c0_264, %c0_265] : memref<1x32xf32, #tpu.memory_space<vmem>>, vector<1x32xf32>
    %455 = vector.broadcast %424 : vector<32x1xf32> to vector<32x32xf32>
    %456 = vector.broadcast %454 : vector<1x32xf32> to vector<32x32xf32>
    %457 = arith.mulf %455, %456 : vector<32x32xf32>
    %458 = arith.addf %453, %457 : vector<32x32xf32>
    %cst_266 = arith.constant 0.000000e+00 : f32
    %459 = vector.broadcast %cst_266 : f32 to vector<32x32xf32>
    %460 = arith.maximumf %458, %459 : vector<32x32xf32>
    %c0_267 = arith.constant 0 : index
    %c0_268 = arith.constant 0 : index
    %461 = vector.load %arg20[%c0_267, %c0_268] : memref<32x32xf32, #tpu.memory_space<vmem>>, vector<32x32xf32>
    %cst_269 = arith.constant dense<0.000000e+00> : vector<32x32xf32>
    %462 = tpu.matmul %460, %461, %cst_269 {dimension_numbers = #tpu.dot_dimension_numbers<[1], [0], [0], [1], [0, 0, 1, 1], [], []>} : vector<32x32xf32>, vector<32x32xf32>, vector<32x32xf32> -> vector<32x32xf32>
    %c0_270 = arith.constant 0 : index
    %c0_271 = arith.constant 0 : index
    %463 = vector.load %arg21[%c0_270, %c0_271] : memref<32x32xf32, #tpu.memory_space<vmem>>, vector<32x32xf32>
    %cst_272 = arith.constant dense<0.000000e+00> : vector<32x32xf32>
    %464 = tpu.matmul %447, %463, %cst_272 {dimension_numbers = #tpu.dot_dimension_numbers<[1], [0], [0], [1], [0, 0, 1, 1], [], []>} : vector<32x32xf32>, vector<32x32xf32>, vector<32x32xf32> -> vector<32x32xf32>
    %465 = arith.addf %462, %464 : vector<32x32xf32>
    %c0_273 = arith.constant 0 : index
    %c0_274 = arith.constant 0 : index
    %466 = vector.load %arg22[%c0_273, %c0_274] : memref<1x32xf32, #tpu.memory_space<vmem>>, vector<1x32xf32>
    %467 = vector.broadcast %466 : vector<1x32xf32> to vector<32x32xf32>
    %468 = arith.addf %465, %467 : vector<32x32xf32>
    %cst_275 = arith.constant 0.000000e+00 : f32
    %469 = vector.broadcast %cst_275 : f32 to vector<32x32xf32>
    %470 = arith.maximumf %468, %469 : vector<32x32xf32>
    %c0_276 = arith.constant 0 : index
    %c0_277 = arith.constant 0 : index
    %471 = vector.load %arg23[%c0_276, %c0_277] : memref<32x32xf32, #tpu.memory_space<vmem>>, vector<32x32xf32>
    %cst_278 = arith.constant dense<0.000000e+00> : vector<32x32xf32>
    %472 = tpu.matmul %470, %471, %cst_278 {dimension_numbers = #tpu.dot_dimension_numbers<[1], [0], [0], [1], [0, 0, 1, 1], [], []>} : vector<32x32xf32>, vector<32x32xf32>, vector<32x32xf32> -> vector<32x32xf32>
    %c0_279 = arith.constant 0 : index
    %c0_280 = arith.constant 0 : index
    %473 = vector.load %arg24[%c0_279, %c0_280] : memref<1x32xf32, #tpu.memory_space<vmem>>, vector<1x32xf32>
    %474 = vector.broadcast %473 : vector<1x32xf32> to vector<32x32xf32>
    %475 = arith.addf %472, %474 : vector<32x32xf32>
    %cst_281 = arith.constant 0.000000e+00 : f32
    %476 = vector.broadcast %cst_281 : f32 to vector<32x32xf32>
    %477 = arith.maximumf %475, %476 : vector<32x32xf32>
    %478 = arith.maximumf %389, %477 : vector<32x32xf32>
    %479 = arith.subf %389, %478 : vector<32x32xf32>
    %480 = math.exp %479 : vector<32x32xf32>
    %481 = arith.subf %477, %478 : vector<32x32xf32>
    %482 = math.exp %481 : vector<32x32xf32>
    %483 = arith.mulf %480, %395 : vector<32x32xf32>
    %484 = arith.addf %483, %482 : vector<32x32xf32>
    %485 = arith.mulf %480, %398 : vector<32x32xf32>
    %486 = arith.mulf %482, %447 : vector<32x32xf32>
    %487 = arith.addf %485, %486 : vector<32x32xf32>
    %c5_i32 = arith.constant 5 : i32
    %cst_282 = arith.constant dense<0x7F800000> : vector<32xf32>
    %488 = vector.multi_reduction <minimumf>, %410, %cst_282 [1] : vector<32x48xf32> to vector<32xf32>
    %489 = vector.shape_cast %488 : vector<32xf32> to vector<32x1xf32>
    %490 = vector.broadcast %489 : vector<32x1xf32> to vector<32x48xf32>
    %491 = arith.cmpf oeq, %410, %490 : vector<32x48xf32>
    %c48_i32_283 = arith.constant 48 : i32
    %492 = vector.broadcast %c48_i32_283 : i32 to vector<32x48xi32>
    %493 = arith.select %491, %26, %492 : vector<32x48xi1>, vector<32x48xi32>
    %cst_284 = arith.constant dense<2147483647> : vector<32xi32>
    %494 = vector.multi_reduction <minsi>, %493, %cst_284 [1] : vector<32x48xi32> to vector<32xi32>
    %495 = vector.shape_cast %494 : vector<32xi32> to vector<32x1xi32>
    %496 = vector.broadcast %495 : vector<32x1xi32> to vector<32x48xi32>
    %497 = arith.cmpi eq, %26, %496 : vector<32x48xi32>
    %cst_285 = arith.constant 0x7F800000 : f32
    %498 = vector.broadcast %cst_285 : f32 to vector<32x48xf32>
    %499 = arith.select %497, %498, %410 : vector<32x48xi1>, vector<32x48xf32>
    %c0_286 = arith.constant 0 : index
    %c0_287 = arith.constant 0 : index
    %c0_288 = arith.constant 0 : index
    %500 = vector.load %arg5[%c0_286, %c0_287, %c0_288] : memref<1x48x11xf32, #tpu.memory_space<vmem>>, vector<1x48x11xf32>
    %501 = vector.shape_cast %500 : vector<1x48x11xf32> to vector<48x11xf32>
    %502 = arith.extui %497 : vector<32x48xi1> to vector<32x48xi32>
    %503 = arith.sitofp %502 : vector<32x48xi32> to vector<32x48xf32>
    %cst_289 = arith.constant dense<0.000000e+00> : vector<32x11xf32>
    %504 = tpu.matmul %503, %501, %cst_289 {dimension_numbers = #tpu.dot_dimension_numbers<[1], [0], [0], [1], [0, 0, 1, 1], [], []>} : vector<32x48xf32>, vector<48x11xf32>, vector<32x11xf32> -> vector<32x11xf32>
    %505 = vector.extract_strided_slice %504 {offsets = [0, 0], sizes = [32, 3], strides = [1, 1]} : vector<32x11xf32> to vector<32x3xf32>
    %506 = vector.extract_strided_slice %504 {offsets = [0, 3], sizes = [32, 8], strides = [1, 1]} : vector<32x11xf32> to vector<32x8xf32>
    %507 = arith.subf %505, %1 : vector<32x3xf32>
    %508 = arith.mulf %507, %507 : vector<32x3xf32>
    %cst_290 = arith.constant dense<0.000000e+00> : vector<32xf32>
    %509 = vector.multi_reduction <add>, %508, %cst_290 [1] : vector<32x3xf32> to vector<32xf32>
    %510 = vector.shape_cast %509 : vector<32xf32> to vector<32x1xf32>
    %cst_291 = arith.constant 9.99999968E-21 : f32
    %511 = vector.broadcast %cst_291 : f32 to vector<32x1xf32>
    %512 = arith.addf %510, %511 : vector<32x1xf32>
    %513 = math.sqrt %512 : vector<32x1xf32>
    %c0_292 = arith.constant 0 : index
    %c0_293 = arith.constant 0 : index
    %514 = vector.load %arg7[%c0_292, %c0_293] : memref<3x16xf32, #tpu.memory_space<vmem>>, vector<3x16xf32>
    %cst_294 = arith.constant dense<0.000000e+00> : vector<32x16xf32>
    %515 = tpu.matmul %505, %514, %cst_294 {dimension_numbers = #tpu.dot_dimension_numbers<[1], [0], [0], [1], [0, 0, 1, 1], [], []>} : vector<32x3xf32>, vector<3x16xf32>, vector<32x16xf32> -> vector<32x16xf32>
    %516 = arith.addf %34, %515 : vector<32x16xf32>
    %c0_295 = arith.constant 0 : index
    %c0_296 = arith.constant 0 : index
    %517 = vector.load %arg8[%c0_295, %c0_296] : memref<3x16xf32, #tpu.memory_space<vmem>>, vector<3x16xf32>
    %cst_297 = arith.constant dense<0.000000e+00> : vector<32x16xf32>
    %518 = tpu.matmul %507, %517, %cst_297 {dimension_numbers = #tpu.dot_dimension_numbers<[1], [0], [0], [1], [0, 0, 1, 1], [], []>} : vector<32x3xf32>, vector<3x16xf32>, vector<32x16xf32> -> vector<32x16xf32>
    %519 = arith.addf %516, %518 : vector<32x16xf32>
    %c0_298 = arith.constant 0 : index
    %c0_299 = arith.constant 0 : index
    %520 = vector.load %arg9[%c0_298, %c0_299] : memref<1x16xf32, #tpu.memory_space<vmem>>, vector<1x16xf32>
    %521 = vector.broadcast %513 : vector<32x1xf32> to vector<32x16xf32>
    %522 = vector.broadcast %520 : vector<1x16xf32> to vector<32x16xf32>
    %523 = arith.mulf %521, %522 : vector<32x16xf32>
    %524 = arith.addf %519, %523 : vector<32x16xf32>
    %c0_300 = arith.constant 0 : index
    %c0_301 = arith.constant 0 : index
    %525 = vector.load %arg11[%c0_300, %c0_301] : memref<8x16xf32, #tpu.memory_space<vmem>>, vector<8x16xf32>
    %cst_302 = arith.constant dense<0.000000e+00> : vector<32x16xf32>
    %526 = tpu.matmul %506, %525, %cst_302 {dimension_numbers = #tpu.dot_dimension_numbers<[1], [0], [0], [1], [0, 0, 1, 1], [], []>} : vector<32x8xf32>, vector<8x16xf32>, vector<32x16xf32> -> vector<32x16xf32>
    %527 = arith.addf %524, %526 : vector<32x16xf32>
    %cst_303 = arith.constant 0.000000e+00 : f32
    %528 = vector.broadcast %cst_303 : f32 to vector<32x16xf32>
    %529 = arith.maximumf %527, %528 : vector<32x16xf32>
    %c0_304 = arith.constant 0 : index
    %c0_305 = arith.constant 0 : index
    %530 = vector.load %arg13[%c0_304, %c0_305] : memref<16x32xf32, #tpu.memory_space<vmem>>, vector<16x32xf32>
    %cst_306 = arith.constant dense<0.000000e+00> : vector<32x32xf32>
    %531 = tpu.matmul %529, %530, %cst_306 {dimension_numbers = #tpu.dot_dimension_numbers<[1], [0], [0], [1], [0, 0, 1, 1], [], []>} : vector<32x16xf32>, vector<16x32xf32>, vector<32x32xf32> -> vector<32x32xf32>
    %c0_307 = arith.constant 0 : index
    %c0_308 = arith.constant 0 : index
    %532 = vector.load %arg14[%c0_307, %c0_308] : memref<1x32xf32, #tpu.memory_space<vmem>>, vector<1x32xf32>
    %533 = vector.broadcast %532 : vector<1x32xf32> to vector<32x32xf32>
    %534 = arith.addf %531, %533 : vector<32x32xf32>
    %cst_309 = arith.constant 0.000000e+00 : f32
    %535 = vector.broadcast %cst_309 : f32 to vector<32x32xf32>
    %536 = arith.maximumf %534, %535 : vector<32x32xf32>
    %c0_310 = arith.constant 0 : index
    %c0_311 = arith.constant 0 : index
    %537 = vector.load %arg16[%c0_310, %c0_311] : memref<3x32xf32, #tpu.memory_space<vmem>>, vector<3x32xf32>
    %cst_312 = arith.constant dense<0.000000e+00> : vector<32x32xf32>
    %538 = tpu.matmul %505, %537, %cst_312 {dimension_numbers = #tpu.dot_dimension_numbers<[1], [0], [0], [1], [0, 0, 1, 1], [], []>} : vector<32x3xf32>, vector<3x32xf32>, vector<32x32xf32> -> vector<32x32xf32>
    %539 = arith.addf %39, %538 : vector<32x32xf32>
    %c0_313 = arith.constant 0 : index
    %c0_314 = arith.constant 0 : index
    %540 = vector.load %arg17[%c0_313, %c0_314] : memref<3x32xf32, #tpu.memory_space<vmem>>, vector<3x32xf32>
    %cst_315 = arith.constant dense<0.000000e+00> : vector<32x32xf32>
    %541 = tpu.matmul %507, %540, %cst_315 {dimension_numbers = #tpu.dot_dimension_numbers<[1], [0], [0], [1], [0, 0, 1, 1], [], []>} : vector<32x3xf32>, vector<3x32xf32>, vector<32x32xf32> -> vector<32x32xf32>
    %542 = arith.addf %539, %541 : vector<32x32xf32>
    %c0_316 = arith.constant 0 : index
    %c0_317 = arith.constant 0 : index
    %543 = vector.load %arg18[%c0_316, %c0_317] : memref<1x32xf32, #tpu.memory_space<vmem>>, vector<1x32xf32>
    %544 = vector.broadcast %513 : vector<32x1xf32> to vector<32x32xf32>
    %545 = vector.broadcast %543 : vector<1x32xf32> to vector<32x32xf32>
    %546 = arith.mulf %544, %545 : vector<32x32xf32>
    %547 = arith.addf %542, %546 : vector<32x32xf32>
    %cst_318 = arith.constant 0.000000e+00 : f32
    %548 = vector.broadcast %cst_318 : f32 to vector<32x32xf32>
    %549 = arith.maximumf %547, %548 : vector<32x32xf32>
    %c0_319 = arith.constant 0 : index
    %c0_320 = arith.constant 0 : index
    %550 = vector.load %arg20[%c0_319, %c0_320] : memref<32x32xf32, #tpu.memory_space<vmem>>, vector<32x32xf32>
    %cst_321 = arith.constant dense<0.000000e+00> : vector<32x32xf32>
    %551 = tpu.matmul %549, %550, %cst_321 {dimension_numbers = #tpu.dot_dimension_numbers<[1], [0], [0], [1], [0, 0, 1, 1], [], []>} : vector<32x32xf32>, vector<32x32xf32>, vector<32x32xf32> -> vector<32x32xf32>
    %c0_322 = arith.constant 0 : index
    %c0_323 = arith.constant 0 : index
    %552 = vector.load %arg21[%c0_322, %c0_323] : memref<32x32xf32, #tpu.memory_space<vmem>>, vector<32x32xf32>
    %cst_324 = arith.constant dense<0.000000e+00> : vector<32x32xf32>
    %553 = tpu.matmul %536, %552, %cst_324 {dimension_numbers = #tpu.dot_dimension_numbers<[1], [0], [0], [1], [0, 0, 1, 1], [], []>} : vector<32x32xf32>, vector<32x32xf32>, vector<32x32xf32> -> vector<32x32xf32>
    %554 = arith.addf %551, %553 : vector<32x32xf32>
    %c0_325 = arith.constant 0 : index
    %c0_326 = arith.constant 0 : index
    %555 = vector.load %arg22[%c0_325, %c0_326] : memref<1x32xf32, #tpu.memory_space<vmem>>, vector<1x32xf32>
    %556 = vector.broadcast %555 : vector<1x32xf32> to vector<32x32xf32>
    %557 = arith.addf %554, %556 : vector<32x32xf32>
    %cst_327 = arith.constant 0.000000e+00 : f32
    %558 = vector.broadcast %cst_327 : f32 to vector<32x32xf32>
    %559 = arith.maximumf %557, %558 : vector<32x32xf32>
    %c0_328 = arith.constant 0 : index
    %c0_329 = arith.constant 0 : index
    %560 = vector.load %arg23[%c0_328, %c0_329] : memref<32x32xf32, #tpu.memory_space<vmem>>, vector<32x32xf32>
    %cst_330 = arith.constant dense<0.000000e+00> : vector<32x32xf32>
    %561 = tpu.matmul %559, %560, %cst_330 {dimension_numbers = #tpu.dot_dimension_numbers<[1], [0], [0], [1], [0, 0, 1, 1], [], []>} : vector<32x32xf32>, vector<32x32xf32>, vector<32x32xf32> -> vector<32x32xf32>
    %c0_331 = arith.constant 0 : index
    %c0_332 = arith.constant 0 : index
    %562 = vector.load %arg24[%c0_331, %c0_332] : memref<1x32xf32, #tpu.memory_space<vmem>>, vector<1x32xf32>
    %563 = vector.broadcast %562 : vector<1x32xf32> to vector<32x32xf32>
    %564 = arith.addf %561, %563 : vector<32x32xf32>
    %cst_333 = arith.constant 0.000000e+00 : f32
    %565 = vector.broadcast %cst_333 : f32 to vector<32x32xf32>
    %566 = arith.maximumf %564, %565 : vector<32x32xf32>
    %567 = arith.maximumf %478, %566 : vector<32x32xf32>
    %568 = arith.subf %478, %567 : vector<32x32xf32>
    %569 = math.exp %568 : vector<32x32xf32>
    %570 = arith.subf %566, %567 : vector<32x32xf32>
    %571 = math.exp %570 : vector<32x32xf32>
    %572 = arith.mulf %569, %484 : vector<32x32xf32>
    %573 = arith.addf %572, %571 : vector<32x32xf32>
    %574 = arith.mulf %569, %487 : vector<32x32xf32>
    %575 = arith.mulf %571, %536 : vector<32x32xf32>
    %576 = arith.addf %574, %575 : vector<32x32xf32>
    %577 = tpu.reciprocal %573 {approx = true} : vector<32x32xf32> -> vector<32x32xf32>
    %578 = arith.mulf %576, %577 : vector<32x32xf32>
    %c0_334 = arith.constant 0 : index
    %c0_335 = arith.constant 0 : index
    %c0_336 = arith.constant 0 : index
    %579 = vector.load %arg25[%c0_334, %c0_335, %c0_336] : memref<1x32x32xf32, #tpu.memory_space<vmem>>, vector<1x32x32xf32>
    %580 = vector.shape_cast %579 : vector<1x32x32xf32> to vector<32x32xf32>
    %581 = vector.shape_cast %578 : vector<32x32xf32> to vector<1x32x32xf32>
    tpu.vector_store %arg25[%c0_334, %c0_335, %c0_336], %581 {strides = array<i32>} : memref<1x32x32xf32, #tpu.memory_space<vmem>>, vector<1x32x32xf32>,
    return
  }
  func.func @transform_0(%arg0: i32, %arg1: i32) -> (i32, i32, i32) {
    %c0_i32 = arith.constant 0 : i32
    %c0_i32_0 = arith.constant 0 : i32
    return %arg0, %arg1, %c0_i32 : i32, i32, i32
  }
  func.func @transform_1(%arg0: i32, %arg1: i32) -> (i32, i32, i32) {
    %c0_i32 = arith.constant 0 : i32
    %c0_i32_0 = arith.constant 0 : i32
    return %arg0, %arg1, %c0_i32 : i32, i32, i32
  }
  func.func @transform_2(%arg0: i32, %arg1: i32) -> (i32, i32, i32) {
    %c0_i32 = arith.constant 0 : i32
    %c0_i32_0 = arith.constant 0 : i32
    %c0_i32_1 = arith.constant 0 : i32
    return %arg0, %c0_i32, %c0_i32_0 : i32, i32, i32
  }
  func.func @transform_3(%arg0: i32, %arg1: i32) -> (i32, i32, i32) {
    %c0_i32 = arith.constant 0 : i32
    %c0_i32_0 = arith.constant 0 : i32
    %c0_i32_1 = arith.constant 0 : i32
    return %arg0, %c0_i32, %c0_i32_0 : i32, i32, i32
  }
  func.func @transform_4(%arg0: i32, %arg1: i32) -> (i32, i32) {
    %c0_i32 = arith.constant 0 : i32
    %c0_i32_0 = arith.constant 0 : i32
    %c0_i32_1 = arith.constant 0 : i32
    return %c0_i32, %c0_i32_0 : i32, i32
  }
  func.func @transform_5(%arg0: i32, %arg1: i32) -> (i32, i32) {
    %c0_i32 = arith.constant 0 : i32
    %c0_i32_0 = arith.constant 0 : i32
    %c0_i32_1 = arith.constant 0 : i32
    return %c0_i32, %c0_i32_0 : i32, i32
  }
  func.func @transform_6(%arg0: i32, %arg1: i32) -> (i32, i32) {
    %c0_i32 = arith.constant 0 : i32
    %c0_i32_0 = arith.constant 0 : i32
    %c0_i32_1 = arith.constant 0 : i32
    return %c0_i32, %c0_i32_0 : i32, i32
  }
  func.func @transform_7(%arg0: i32, %arg1: i32) -> (i32, i32) {
    %c0_i32 = arith.constant 0 : i32
    %c0_i32_0 = arith.constant 0 : i32
    %c0_i32_1 = arith.constant 0 : i32
    return %c0_i32, %c0_i32_0 : i32, i32
  }
  func.func @transform_8(%arg0: i32, %arg1: i32) -> (i32, i32) {
    %c0_i32 = arith.constant 0 : i32
    %c0_i32_0 = arith.constant 0 : i32
    %c0_i32_1 = arith.constant 0 : i32
    return %c0_i32, %c0_i32_0 : i32, i32
  }
  func.func @transform_9(%arg0: i32, %arg1: i32) -> (i32, i32) {
    %c0_i32 = arith.constant 0 : i32
    %c0_i32_0 = arith.constant 0 : i32
    %c0_i32_1 = arith.constant 0 : i32
    return %c0_i32, %c0_i32_0 : i32, i32
  }
  func.func @transform_10(%arg0: i32, %arg1: i32) -> (i32, i32) {
    %c0_i32 = arith.constant 0 : i32
    %c0_i32_0 = arith.constant 0 : i32
    %c0_i32_1 = arith.constant 0 : i32
    return %c0_i32, %c0_i32_0 : i32, i32
  }
  func.func @transform_11(%arg0: i32, %arg1: i32) -> (i32, i32) {
    %c0_i32 = arith.constant 0 : i32
    %c0_i32_0 = arith.constant 0 : i32
    %c0_i32_1 = arith.constant 0 : i32
    return %c0_i32, %c0_i32_0 : i32, i32
  }
  func.func @transform_12(%arg0: i32, %arg1: i32) -> (i32, i32) {
    %c0_i32 = arith.constant 0 : i32
    %c0_i32_0 = arith.constant 0 : i32
    %c0_i32_1 = arith.constant 0 : i32
    return %c0_i32, %c0_i32_0 : i32, i32
  }
  func.func @transform_13(%arg0: i32, %arg1: i32) -> (i32, i32) {
    %c0_i32 = arith.constant 0 : i32
    %c0_i32_0 = arith.constant 0 : i32
    %c0_i32_1 = arith.constant 0 : i32
    return %c0_i32, %c0_i32_0 : i32, i32
  }
  func.func @transform_14(%arg0: i32, %arg1: i32) -> (i32, i32) {
    %c0_i32 = arith.constant 0 : i32
    %c0_i32_0 = arith.constant 0 : i32
    %c0_i32_1 = arith.constant 0 : i32
    return %c0_i32, %c0_i32_0 : i32, i32
  }
  func.func @transform_15(%arg0: i32, %arg1: i32) -> (i32, i32) {
    %c0_i32 = arith.constant 0 : i32
    %c0_i32_0 = arith.constant 0 : i32
    %c0_i32_1 = arith.constant 0 : i32
    return %c0_i32, %c0_i32_0 : i32, i32
  }
  func.func @transform_16(%arg0: i32, %arg1: i32) -> (i32, i32) {
    %c0_i32 = arith.constant 0 : i32
    %c0_i32_0 = arith.constant 0 : i32
    %c0_i32_1 = arith.constant 0 : i32
    return %c0_i32, %c0_i32_0 : i32, i32
  }
  func.func @transform_17(%arg0: i32, %arg1: i32) -> (i32, i32) {
    %c0_i32 = arith.constant 0 : i32
    %c0_i32_0 = arith.constant 0 : i32
    %c0_i32_1 = arith.constant 0 : i32
    return %c0_i32, %c0_i32_0 : i32, i32
  }
  func.func @transform_18(%arg0: i32, %arg1: i32) -> (i32, i32) {
    %c0_i32 = arith.constant 0 : i32
    %c0_i32_0 = arith.constant 0 : i32
    %c0_i32_1 = arith.constant 0 : i32
    return %c0_i32, %c0_i32_0 : i32, i32
  }
  func.func @transform_19(%arg0: i32, %arg1: i32) -> (i32, i32) {
    %c0_i32 = arith.constant 0 : i32
    %c0_i32_0 = arith.constant 0 : i32
    %c0_i32_1 = arith.constant 0 : i32
    return %c0_i32, %c0_i32_0 : i32, i32
  }
  func.func @transform_20(%arg0: i32, %arg1: i32) -> (i32, i32) {
    %c0_i32 = arith.constant 0 : i32
    %c0_i32_0 = arith.constant 0 : i32
    %c0_i32_1 = arith.constant 0 : i32
    return %c0_i32, %c0_i32_0 : i32, i32
  }
  func.func @transform_21(%arg0: i32, %arg1: i32) -> (i32, i32) {
    %c0_i32 = arith.constant 0 : i32
    %c0_i32_0 = arith.constant 0 : i32
    %c0_i32_1 = arith.constant 0 : i32
    return %c0_i32, %c0_i32_0 : i32, i32
  }
  func.func @transform_22(%arg0: i32, %arg1: i32) -> (i32, i32) {
    %c0_i32 = arith.constant 0 : i32
    %c0_i32_0 = arith.constant 0 : i32
    %c0_i32_1 = arith.constant 0 : i32
    return %c0_i32, %c0_i32_0 : i32, i32
  }
  func.func @transform_23(%arg0: i32, %arg1: i32) -> (i32, i32, i32) {
    %c0_i32 = arith.constant 0 : i32
    %c0_i32_0 = arith.constant 0 : i32
    return %arg0, %arg1, %c0_i32 : i32, i32, i32
  }
}

</mosaic_0001>

<bundles_post_ra>
// kernel: tpu_custom_call.1
= control target key start
LH: loop header
LB: loop body
LE: loop exit
PB: predicated region body
PF: predicated region fallthrough
CT: control target
= control target key end

     0   :  { %s13556_s0 = inlined_call_operand.vmem [shape: f32[2,32,3], index: 0, kind: input, shape index: {}]   ;;  %s13557_s1 = inlined_call_operand.vmem [shape: f32[2,32,8], index: 1, kind: input, shape index: {}]   ;;  %s13558_s2 = inlined_call_operand.vmem [shape: f32[2,3,48], index: 2, kind: input, shape index: {}]   ;;  %s13559_s3 = inlined_call_operand.vmem [shape: f32[2,48,11], index: 3, kind: input, shape index: {}]   ;;  %s13560_s4 = inlined_call_operand.vmem [shape: f32[3,16], index: 4, kind: input, shape index: {}]   ;;  %s13561_s5 = inlined_call_operand.vmem [shape: f32[3,16], index: 5, kind: input, shape index: {}]   ;;  %s13562_s6 = inlined_call_operand.vmem [shape: f32[3,16], index: 6, kind: input, shape index: {}]   ;;  %s13563_s7 = inlined_call_operand.vmem [shape: f32[1,16], index: 7, kind: input, shape index: {}]   ;;  %s13564_s8 = inlined_call_operand.vmem [shape: f32[8,16], index: 8, kind: input, shape index: {}]   ;;  %s13565_s9 = inlined_call_operand.vmem [shape: f32[8,16], index: 9, kind: input, shape index: {}]   ;;  %s13566_s10 = inlined_call_operand.vmem [shape: f32[1,16], index: 10, kind: input, shape index: {}]   ;;  %s13567_s11 = inlined_call_operand.vmem [shape: f32[16,32], index: 11, kind: input, shape index: {}]   ;;  %s13568_s12 = inlined_call_operand.vmem [shape: f32[1,32], index: 12, kind: input, shape index: {}]   ;;  %s13569_s13 = inlined_call_operand.vmem [shape: f32[3,32], index: 13, kind: input, shape index: {}]   ;;  %s13570_s14 = inlined_call_operand.vmem [shape: f32[3,32], index: 14, kind: input, shape index: {}]   ;;  %s13571_s15 = inlined_call_operand.vmem [shape: f32[3,32], index: 15, kind: input, shape index: {}]   ;;  %s13572_s16 = inlined_call_operand.vmem [shape: f32[1,32], index: 16, kind: input, shape index: {}]   ;;  %s13573_s17 = inlined_call_operand.vmem [shape: f32[1,32], index: 17, kind: input, shape index: {}]   ;;  %s13574_s18 = inlined_call_operand.vmem [shape: f32[32,32], index: 18, kind: input, shape index: {}]   ;;  %s13575_s19 = inlined_call_operand.vmem [shape: f32[32,32], index: 19, kind: input, shape index: {}]   ;;  %s13576_s20 = inlined_call_operand.vmem [shape: f32[1,32], index: 20, kind: input, shape index: {}]   ;;  %s13577_s21 = inlined_call_operand.vmem [shape: f32[32,32], index: 21, kind: input, shape index: {}]   ;;  %s13578_s22 = inlined_call_operand.vmem [shape: f32[1,32], index: 22, kind: input, shape index: {}]   ;;  %s13579_s23 = inlined_call_operand.hbm [shape: f32[2,32,32], index: 23, kind: output, shape index: {}]  }
   0x1   :  { %13696 = sst [smem:[#allocation39_spill]] %s13556_s0 }
   0x2   :  { %13697 = sst [smem:[#allocation40_spill]] %s13557_s1 }
   0x3   :  { %13698 = sst [smem:[#allocation41_spill]] %s13558_s2 }
   0x4   :  { %13699 = sst [smem:[#allocation42_spill]] %s13559_s3 }
   0x5   :  { %13700 = sst [smem:[#allocation43_spill]] %s13560_s4 }
   0x6   :  { %13701 = sst [smem:[#allocation44_spill]] %s13561_s5 }
   0x7   :  { %13702 = sst [smem:[#allocation45_spill]] %s13562_s6 }
   0x8   :  { %13703 = sst [smem:[#allocation46_spill]] %s13563_s7 }
   0x9   :  { %13704 = sst [smem:[#allocation47_spill]] %s13569_s13 }
   0xa   :  { %28 = vsyncpa [#allocation3], 0 }
   0xb   :  { %30 = vsyncpa [#allocation3 + $0x1], 0  ;;  %s10969_s4 = smov 0   ;;  %s10971_s30 = smov 0  }
   0xc   :  { %s10973_s24 = smov 0   ;;  %s10975_s25 = smov 0  }
   0xd   :  { %s10977_s5 = smov 0   ;;  %s10979_s1 = smov 0  }
   0xe LB: > { %13705 = sst [smem:[#allocation5_spill]] %s10819_s4  ;;  %s8673_s26 = sadd.s32 4294967295, %s10839_s1   ;;  %s10839_s1 = sphi %s10979_s1, %s36_s1   ;;  %s10835_s5 = sphi %s10977_s5, %s13871_s5   ;;  %s10831_s25 = sphi %s10975_s25, %s13867_s25   ;;  %s10827_s24 = sphi %s10973_s24, %s13866_s24   ;;  %s10823_s30 = sphi %s10971_s30, %s13870_s30   ;;  %s10819_s4 = sphi %s10969_s4, %s13869_s4  }
   0xf   : > { %13706 = sst [smem:[#allocation6_spill]] %s10827_s24  ;;  %s8674_s2 = sadd.s32 4294967294, %s10839_s1  }
  0x10   : > { %13707 = sst [smem:[#allocation7_spill]] %s10835_s5  ;;  %s48_s6 = sadd.s32 1, %s10835_s5 }
  0x11   : > { %s564_s27 = sadd.s32 1, %s10827_s24  ;;  %p50_p0 = scmp.ge.s32.totalorder %s48_s6, 2 }
  0x12   : > { %p574_p1 = scmp.ne.s32.totalorder %s10827_s24, %s10823_s30  ;;  %p575_p2 = scmp.eq.s32.totalorder %s8673_s26, 1 }
  0x13   : > { %p580_p3 = scmp.ne.s32.totalorder %s10823_s30, %s10819_s4  ;;  %s13873_s6 = smov (%p50_p0, %s48_s6), 0 }
  0x14   : > { %13708 = sst [smem:[#allocation8_spill]] %s13873_s6  ;;  %p11009_p4 = por %p575_p2, %p574_p1 }
  0x15   : > { %p581_p5 = scmp.eq.s32.totalorder %s8674_s2, 1  ;;  %s559_s28 = ssub.s32 %s10835_s5, %s13873_s6 }
  0x16   : > { %p8677_p6 = scmp.ge.s32.totalorder %s10839_s1, 1  ;;  %p562_p7 = scmp.eq.s32.totalorder %s559_s28, 0 }
  0x17   : > { %p11016_p8 = por %p581_p5, %p580_p3  ;;  %p697_p9 = scmp.lt.s32.totalorder %s10839_s1, 3 }
  0x18   : > { %s11022_s3 = scalar_select %p562_p7, %s10827_s24, %s564_s27  }
  0x19   : > { %s13710_s29 = scalar_select %p11016_p8, 1, 0 }
  0x1a   : > { %13712 = sst [smem:[#allocation10_spill]] %s11022_s3  ;;  %p698_p10 = pnand %p8677_p6, %p697_p9 }
  0x1b   : > { %13711 = sst [smem:[#allocation9_spill]] %s13710_s29 }
  0x1c   : > { %701 = sbr.rel (%p698_p10) target bundleno = 6128 (0x17f0), region = 112 }
  0x23   : > { %p784_p11 = scmp.lt.s32.totalorder %s10831_s25, 1  ;;  %v10841_v0 = vmov 1   ;;  %v10842_v1 = vmov 0   ;;  %s13713_s6 = sld [smem:[#allocation39_spill]]  ;;  %v10843_v5 = vmov 2   ;;  %v842_v7 = vlaneseq }
  0x24   : > { %10566 = vset.pattern.permute.xlu0 %v10841_v0  ;;  %10568 = vset.pattern.permute.xlu1 %v10842_v1  ;;  %vm1225_vm0 = vcmask 392192   ;;  %s13716_s2 = sld [smem:[#allocation42_spill]]  ;;  %vm1029_vm5 = vcmask 1042432   ;;  %s13718_s13 = sld [smem:[#allocation47_spill]]  ;;  %vm1020_vm6 = vcmask 23552   ;;  %vm922_vm11 = vcmask 64512  }
  0x25   : > { %s11026_s0 = scalar_select %p784_p11, %s10831_s25, 1  ;;  %v843_v8 = vshrl.u32 %v842_v7, 7 }
  0x26   : > { %s13723_s4 = sld [smem:[#allocation43_spill]]  ;;  %s13724_s29 = sld [smem:[#allocation44_spill]] }
  0x27   : > { %s13584_s26 = sshll.u32 %s11026_s0, 5  ;;  %v868_v9 = vsub.s32 1, %v843_v8  ;;  %v844_v11 = vsub.s32 0, %v843_v8  ;;  %v892_v16 = vsub.s32 2, %v843_v8  ;;  %s13725_s3 = sld [smem:[#allocation45_spill]] }
  0x28   : > { %s13744_s24 = smov 125  }
  0x29   : > { %s11034_s27 = scalar_lea.vmem %s13713_s6, %s13584_s26  ;;  %s8683_s6 = sshll.u32 %s11026_s0, 2 }
  0x2a   : > { %v11037_v2 = vld [vmem:[%s11034_s27 + $0x8] sm:$0xff]  ;;  %v11040_v3 = vld [vmem:[%s11034_s27] sm:$0xff]  ;;  %v11047_v4 = vld [vmem:[%s11034_s27 + $0x18] sm:$0xff]  ;;  %s13714_s26 = sld [smem:[#allocation41_spill]] }
  0x2b   : > { %829 = vperm.xlu1 %10568, %v11037_v2   ;;  %851 = vperm.xlu0 %10566, %v11040_v3   ;;  %v11052_v6 = vld [vmem:[%s11034_s27 + $0x10] sm:$0xff] }
  0x2c   : > { %9425 = vmatprep.mubr.msk.f32.mxu1 %vm1020_vm6, %v11040_v3 }
  0x2f   : > { %10569 = vset.pattern.permute.xlu1 %v10841_v0  ;;  %10567 = vset.pattern.permute.xlu0 %v10842_v1 }
  0x30   : > { %855 = vperm.xlu1 %10569, %v11037_v2   ;;  %824 = vperm.xlu0 %10567, %v11040_v3   ;;  %s806_s5 = scalar_lea.vmem %s13714_s26, %s8683_s6 }
  0x31   : > { %v821_v10 = vld [vmem:[%s806_s5] sm:$0x7]  ;;  %s10503_s5 = smul.u32 48, %s11026_s0 }
  0x32   : > { %v869_v14 = vrot.slane %v821_v10, %v868_v9  ;;  %v845_v17 = vrot.slane %v821_v10, %v844_v11  ;;  %v893_v22 = vrot.slane %v821_v10, %v892_v16 }
  0x33   : > { %s811_s28 = scalar_lea.vmem %s13716_s2, %s10503_s5  ;;  %s13721_s5 = sshll.u32 %s11026_s0, 5 }
  0x34   : > { %10570 = vset.pattern.permute.xlu1 %v10843_v5  ;;  %839 = vperm.xlu0 %10567, %v11047_v4   ;;  %s13722_s2 = sld [smem:[#allocation40_spill]] }
  0x35   : > { %875 = vperm.xlu1 %10570, %v11040_v3  }
  0x38   : > { %10573 = vset.pattern.permute.xlu0 %v10843_v5 }
  0x39   : > { %10571 = vset.pattern.permute.xlu1 %v10842_v1  ;;  %879 = vperm.xlu0 %10573, %v11037_v2  }
  0x3a   : > { %834 = vperm.xlu1 %10571, %v11052_v6  }
  0x3d   : > { %887 = vperm.xlu0 %10573, %v11047_v4  }
  0x3e   : > { %10572 = vset.pattern.permute.xlu1 %v10841_v0  ;;  %v11082_v0 = vand.u32 127, %v842_v7 }
  0x3f   : > { %859 = vperm.xlu1 %10572, %v11052_v6  }
  0x40   : > { %13715 = vst [vmem:[#allocation11_spill] sm:$0xff] %v11082_v0 }
  0x43   : > { %863 = vperm.xlu1 %10572, %v11047_v4  }
  0x47   : > { %10574 = vset.pattern.permute.xlu1 %v10843_v5 }
  0x48   : > { %883 = vperm.xlu1 %10574, %v11052_v6  }
  0xaa   : > { %v830_v12 = vpop.permute.xlu1 %829  ;;  %v852_v13 = vpop.permute.xlu0 %851 }
  0xab   : > { %v870_v15 = vsub.f32 %v852_v13, %v869_v14  ;;  %v847_v27 = vsub.f32 %v830_v12, %v845_v17 }
  0xad   : > { %v902_v21 = vmul.f32 %v870_v15, %v870_v15  ;;  %v899_v33 = vmul.f32 %v847_v27, %v847_v27  ;;  %v1316_v27 = vld [vmem:[%s811_s28 + $0x10] sm:$0xff] }
  0xaf   : > { %v856_v18 = vpop.permute.xlu1 %855  ;;  %v825_v19 = vpop.permute.xlu0 %824 }
  0xb0   : > { %v846_v20 = vsub.f32 %v825_v19, %v845_v17  ;;  %v871_v24 = vsub.f32 %v856_v18, %v869_v14 }
  0xb2   : > { %v898_v23 = vmul.f32 %v846_v20, %v846_v20  ;;  %v903_v30 = vmul.f32 %v871_v24, %v871_v24 }
  0xb3   : > { %v840_v25 = vpop.permute.xlu0 %839 }
  0xb4   : > { %v876_v26 = vpop.permute.xlu1 %875  ;;  %v906_v28 = vadd.f32 %v902_v21, %v898_v23  ;;  %v907_v37 = vadd.f32 %v903_v30, %v899_v33  ;;  %v849_v44 = vsub.f32 %v840_v25, %v845_v17  ;;  %v1314_v25 = vld [vmem:[%s811_s28] sm:$0xff]  ;;  %v1319_v33 = vld [vmem:[%s811_s28 + $0x28] sm:$0xff] }
  0xb5   : > { %v894_v29 = vsub.f32 %v876_v26, %v893_v22  ;;  %v1315_v26 = vld [vmem:[%s811_s28 + $0x8] sm:$0xff]  ;;  %v1129_v30 = vld [vmem:[%s13718_s13] sm:$0x7]  ;;  %s13727_s13 = sld [smem:[#allocation46_spill]] }
  0xb6   : > { %v901_v50 = vmul.f32 %v849_v44, %v849_v44  ;;  %9423 = vmatprep.subr.msk.mxu1 %vm1029_vm5, %v1129_v30 }
  0xb7   : > { %v910_v31 = vmul.f32 %v894_v29, %v894_v29  ;;  %v11100_v29 = vpack.c.bf16 %v1315_v26, %v1314_v25  ;;  %9424 = vmatpush3.msk.msra.mxu1 %vm1029_vm5, %v1129_v30 }
  0xb8   : > { %v880_v32 = vpop.permute.xlu0 %879  ;;  %9426 = vmatmul.mubr.msk.f32.vlgmr.msra.gmra.mrb[0].mxu1 %vm1020_vm6, %v11037_v2 }
  0xb9   : > { %v11065_v34 = vadd.f32 %v910_v31, %v906_v28  ;;  %v895_v35 = vsub.f32 %v880_v32, %v893_v22  ;;  %v835_v36 = vpop.permute.xlu1 %834  ;;  %v1317_v28 = vld [vmem:[%s811_s28 + $0x18] sm:$0xff]  ;;  %13717 = vst [vmem:[#allocation12_spill] sm:$0xff] %v11100_v29  ;;  %v1318_v32 = vld [vmem:[%s811_s28 + $0x20] sm:$0xff]  ;;  %10092 = vmatprep.subr.bf16.mxu1 %v11100_v29  ;;  %9428 = vmatprep.mubr.msk.f32.mxu1 %vm1020_vm6, %v11052_v6  ;;  %s801_s28 = scalar_lea.vmem %s13722_s2, %s13721_s5  ;;  %s13589_s5 = smov 125  }
  0xba   : > { %v848_v49 = vsub.f32 %v835_v36, %v845_v17  ;;  %v11105_v31 = vpack.c.bf16 %v1317_v28, %v1316_v27  ;;  %10094 = vmatpush3.bf16.msra.mxu1 %v11100_v29  ;;  %s780_s2 = sand.u32 1, %s10823_s30  }
  0xbb   : > { %v911_v38 = vmul.f32 %v895_v35, %v895_v35  ;;  %v1226_v39 = vsel %vm1225_vm0, %v11065_v34, inf  ;;  %v11117_v35 = vpack.c.bf16 %v1319_v33, %v1318_v32  ;;  %v11185_v33 = vld [vmem:[%s13724_s29] sm:$0x7] }
  0xbc   : > { %1227 = vmin.xlane.f32.xlu1 %v1226_v39  ;;  %v888_v42 = vpop.permute.xlu0 %887  ;;  %v900_v56 = vmul.f32 %v848_v49, %v848_v49  ;;  %13719 = vst [vmem:[#allocation13_spill] sm:$0xff] %v11105_v31  ;;  %10096 = vmatprep.subr.bf16.mxu1 %v11105_v31 }
  0xbd   : > { %v11069_v40 = vadd.f32 %v911_v38, %v907_v37  ;;  %v897_v45 = vsub.f32 %v888_v42, %v893_v22  ;;  %13720 = vst [vmem:[#allocation14_spill] sm:$0xff] %v11117_v35  ;;  %9429 = vmatmul.mubr.msk.f32.gmra.mrb[2].mxu1 %vm1020_vm6, %v11047_v4 }
  0xbe   : > { %v860_v41 = vpop.permute.xlu1 %859  ;;  %10098 = vmatpush3.bf16.msra.mxu1 %v11105_v31 }
  0xbf   : > { %v1229_v43 = vsel %vm1225_vm0, %v11069_v40, inf  ;;  %v872_v46 = vsub.f32 %v860_v41, %v869_v14  ;;  %v913_v52 = vmul.f32 %v897_v45, %v897_v45  ;;  %10100 = vmatprep.subr.bf16.mxu1 %v11117_v35 }
  0xc0   : > { %1230 = vmin.xlane.f32.xlu0 %v1229_v43 }
  0xc1   : > { %v904_v53 = vmul.f32 %v872_v46, %v872_v46 }
  0xc2   : > { %v864_v47 = vpop.permute.xlu1 %863  ;;  %10102 = vmatpush3.bf16.msra.mxu1 %v11117_v35 }
  0xc3   : > { %v873_v48 = vsub.f32 %v864_v47, %v869_v14  ;;  %v908_v59 = vadd.f32 %v904_v53, %v900_v56  ;;  %v921_v53 = vld [vmem:[%s13564_s8] sm:$0xff]  ;;  %v818_v56 = vld [vmem:[%s801_s28 + $0x8] sm:$0xff] }
  0xc4   : > { %9407 = vmatprep.subr.mxu0 %v921_v53 }
  0xc5   : > { %v905_v51 = vmul.f32 %v873_v48, %v873_v48  ;;  %9408 = vmatpush3.msra.mxu0 %v921_v53 }
  0xc7   : > { %v909_v54 = vadd.f32 %v905_v51, %v901_v50  ;;  %v884_v55 = vpop.permute.xlu1 %883 }
  0xc8   : > { %v896_v57 = vsub.f32 %v884_v55, %v893_v22  ;;  %v817_v55 = vld [vmem:[%s801_s28] sm:$0xff] }
  0xc9   : > { %v11073_v58 = vadd.f32 %v913_v52, %v909_v54  ;;  %v920_v54 = vld [vmem:[%s13723_s4] sm:$0x7]  ;;  %9409 = vmatprep.mubr.msk.f32.mxu0 %vm922_vm11, %v817_v55  ;;  %s9001_s4 = sshll.u32 %s10831_s25, 9  ;;  %s13510_s25 = scalar_lea.sflag [#allocation3], %s780_s2 }
  0xca   : > { %v912_v60 = vmul.f32 %v896_v57, %v896_v57  ;;  %v819_v57 = vld [vmem:[%s801_s28 + $0x10] sm:$0xff]  ;;  %9410 = vmatmul.mubr.msk.f32.vlgmr.msra.gmra.mrb[0].mxu0 %vm922_vm11, %v818_v56  ;;  %9415 = vmatprep.subr.msk.mxu0 %vm1029_vm5, %v920_v54  ;;  %s13504_s26 = scalar_lea.hbm %s13579_s23, %s9001_s4 }
  0xcb   : > { %v1235_v61 = vsel %vm1225_vm0, %v11073_v58, inf  ;;  %9412 = vmatprep.mubr.msk.f32.mxu0 %vm922_vm11, %v819_v57  ;;  %9416 = vmatpush3.msk.msra.mxu0 %vm1029_vm5, %v920_v54 }
  0xcc   : > { %v11077_v62 = vadd.f32 %v912_v60, %v908_v59  ;;  %1236 = vmin.xlane.f32.xlu0 %v1235_v61  ;;  %v820_v59 = vld [vmem:[%s801_s28 + $0x18] sm:$0xff]  ;;  %9449 = vmatprep.subr.msk.mxu0 %vm1029_vm5, %v11185_v33 }
  0xce   : > { %v1232_v63 = vsel %vm1225_vm0, %v11077_v62, inf  ;;  %9413 = vmatmul.mubr.msk.f32.gmra.mrb[2].mxu0 %vm922_vm11, %v820_v59 }
  0xcf   : > { %1233 = vmin.xlane.f32.xlu1 %v1232_v63  ;;  %9417 = vmatprep.mubr.msk.f32.mxu0 %vm1020_vm6, %v11040_v3 }
  0xd2   : > { %9418 = vmatmul.mubr.msk.f32.vlgmr.msra.gmra.mrb[0].mxu0 %vm1020_vm6, %v11037_v2 }
  0xd3   : > { %9420 = vmatprep.mubr.msk.f32.mxu0 %vm1020_vm6, %v11052_v6  ;;  %9450 = vmatpush3.msk.msra.mxu0 %vm1029_vm5, %v11185_v33 }
  0xd6   : > { %9421 = vmatmul.mubr.msk.f32.gmra.mrb[2].mxu0 %vm1020_vm6, %v11047_v4 }
 0x149   : > { %v1228_v1 = vpop.xlane.xlu1 %1227 }
 0x14a   : > { %vm1238_vm1 = vcmp.eq.f32.partialorder %v11065_v34, %v1228_v1 }
 0x14b   : > { %v1242_v5 = vsel %vm1238_vm1, %v11082_v0, 48 }
 0x14c   : > { %v1246_v8 = vsel %vm1225_vm0, %v1242_v5, 2147483647 }
 0x14d   : > { %v1231_v9 = vpop.xlane.xlu0 %1230  ;;  %v1248_v10 = vshra.s32 %v1246_v8, 16  ;;  %v1247_v36 = vand.u32 65535, %v1246_v8 }
 0x14e   : > { %vm1239_vm2 = vcmp.eq.f32.partialorder %v11069_v40, %v1231_v9 }
 0x14f   : > { %v1243_v11 = vsel %vm1239_vm2, %v11082_v0, 48  ;;  %v1250_v12 = vcvt.s32.f32 %v1248_v10  ;;  %v1249_v38 = vcvt.s32.f32 %v1247_v36  ;;  %v11194_v36 = vld [vmem:[%s13725_s3] sm:$0x7] }
 0x150   : > { %v1261_v13 = vsel %vm1225_vm0, %v1243_v11, 2147483647  ;;  %9457 = vmatprep.subr.msk.mxu0 %vm1029_vm5, %v11194_v36 }
 0x151   : > { %1251 = vmin.xlane.f32.xlu1 %v1250_v12  ;;  %v1263_v14 = vshra.s32 %v1261_v13, 16  ;;  %v1262_v39 = vand.u32 65535, %v1261_v13 }
 0x153   : > { %v1265_v7 = vcvt.s32.f32 %v1263_v14  ;;  %v1264_v43 = vcvt.s32.f32 %v1262_v39  ;;  %v11211_v39 = vld [vmem:[%s13565_s9] sm:$0xff] }
 0x155   : > { %1266 = vmin.xlane.f32.xlu0 %v1265_v7 }
 0x159   : > { %v1237_v15 = vpop.xlane.xlu0 %1236 }
 0x15a   : > { %vm1241_vm3 = vcmp.eq.f32.partialorder %v11073_v58, %v1237_v15  ;;  %v13595_v15 = vmov 0.0  }
 0x15b   : > { %v1245_v16 = vsel %vm1241_vm3, %v11082_v0, 48 }
 0x15c   : > { %v1234_v17 = vpop.xlane.xlu1 %1233  ;;  %v1291_v18 = vsel %vm1225_vm0, %v1245_v16, 2147483647 }
 0x15d   : > { %vm1240_vm4 = vcmp.eq.f32.partialorder %v11077_v62, %v1234_v17  ;;  %v1293_v19 = vshra.s32 %v1291_v18, 16  ;;  %v1292_v45 = vand.u32 65535, %v1291_v18 }
 0x15e   : > { %v1244_v20 = vsel %vm1240_vm4, %v11082_v0, 48 }
 0x15f   : > { %v1295_v21 = vcvt.s32.f32 %v1293_v19  ;;  %v1276_v22 = vsel %vm1225_vm0, %v1244_v20, 2147483647  ;;  %v1294_v48 = vcvt.s32.f32 %v1292_v45 }
 0x160   : > { %v1278_v23 = vshra.s32 %v1276_v22, 16  ;;  %v1277_v46 = vand.u32 65535, %v1276_v22 }
 0x161   : > { %1296 = vmin.xlane.f32.xlu0 %v1295_v21 }
 0x162   : > { %v1280_v24 = vcvt.s32.f32 %v1278_v23  ;;  %v1279_v51 = vcvt.s32.f32 %v1277_v46 }
 0x164   : > { %1281 = vmin.xlane.f32.xlu1 %v1280_v24 }
 0x18b   : > { %v11150_v60 = vpop.f32.mrb[0].mxu1 }
 0x18c   : > { %v11152_v61 = vpop.f32.mrb[1].mxu1 }
 0x190   : > { %v11154_v63 = vpop.f32.mrb[2].mxu1 }
 0x191   : > { %v11156_v1 = vpop.f32.mrb[3].mxu1 }
 0x1a5   : > { %v11289_v55 = vpop.f32.mrb[0].mxu0 }
 0x1a6   : > { %v11296_v57 = vpop.f32.mrb[1].mxu0 }
 0x1de   : > { %v1252_v37 = vpop.xlane.xlu1 %1251 }
 0x1df   : > { %vm1253_vm7 = vcmp.eq.f32.partialorder %v1250_v12, %v1252_v37  ;;  %v1258_v5 = vcvt.f32.s32 %v1252_v37 }
 0x1e0   : > { %v1254_v41 = vsel %vm1253_vm7, %v1249_v38, inf }
 0x1e1   : > { %1255 = vmin.xlane.f32.xlu1 %v1254_v41  ;;  %v1259_v9 = vshll.u32 %v1258_v5, 16  ;;  %v11300_v5 = vpop.f32.mrb[2].mxu0 }
 0x1e2   : > { %v1267_v42 = vpop.xlane.xlu0 %1266 }
 0x1e3   : > { %vm1268_vm8 = vcmp.eq.f32.partialorder %v1265_v7, %v1267_v42  ;;  %v1273_v10 = vcvt.f32.s32 %v1267_v42 }
 0x1e4   : > { %v1269_v44 = vsel %vm1268_vm8, %v1264_v43, inf }
 0x1e5   : > { %1270 = vmin.xlane.f32.xlu0 %v1269_v44  ;;  %v1274_v14 = vshll.u32 %v1273_v10, 16 }
 0x1ee   : > { %v1297_v47 = vpop.xlane.xlu0 %1296 }
 0x1ef   : > { %vm1298_vm9 = vcmp.eq.f32.partialorder %v1295_v21, %v1297_v47  ;;  %v1303_v19 = vcvt.f32.s32 %v1297_v47 }
 0x1f0   : > { %v1299_v49 = vsel %vm1298_vm9, %v1294_v48, inf }
 0x1f1   : > { %v1282_v50 = vpop.xlane.xlu1 %1281  ;;  %1300 = vmin.xlane.f32.xlu0 %v1299_v49  ;;  %v1304_v22 = vshll.u32 %v1303_v19, 16 }
 0x1f2   : > { %vm1283_vm10 = vcmp.eq.f32.partialorder %v1280_v24, %v1282_v50  ;;  %v1288_v20 = vcvt.f32.s32 %v1282_v50 }
 0x1f3   : > { %v1284_v52 = vsel %vm1283_vm10, %v1279_v51, inf }
 0x1f4   : > { %1285 = vmin.xlane.f32.xlu1 %v1284_v52  ;;  %v1289_v26 = vshll.u32 %v1288_v20, 16 }
 0x26e   : > { %v1256_v8 = vpop.xlane.xlu1 %1255 }
 0x26f   : > { %v1257_v11 = vcvt.f32.s32 %v1256_v8 }
 0x271   : > { %v11158_v12 = vadd.s32 %v1259_v9, %v1257_v11 }
 0x272   : > { %v1271_v13 = vpop.xlane.xlu0 %1270 }
 0x273   : > { %v1272_v7 = vcvt.f32.s32 %v1271_v13  ;;  %vm1306_vm12 = vcmp.eq.s32.totalorder %v11082_v0, %v11158_v12 }
 0x274   : > { %v8701_v16 = vsel %vm1306_vm12, 1.0, %v13595_v15 }
 0x275   : > { %v1275_v17 = vadd.s32 %v1274_v14, %v1272_v7  ;;  %9443 = vmatprep.mubr.msk.f32.mxu1 %vm1225_vm0, %v8701_v16 }
 0x277   : > { %vm1307_vm13 = vcmp.eq.s32.totalorder %v11082_v0, %v1275_v17 }
 0x278   : > { %v8702_v18 = vsel %vm1307_vm13, 1.0, %v13595_v15  ;;  %v11267_v49 = vsel %vm1307_vm13, inf, %v11069_v40  ;;  %v11285_v40 = vsel %vm1306_vm12, inf, %v11065_v34  ;;  %v11302_v34 = vpop.f32.mrb[3].mxu0  ;;  %vm1821_vm12 = vcmask 130048  }
 0x279   : > { %9444 = vmatmul.mubr.msk.f32.vlgmr.msra.gmra.mrb[4].mxu1 %vm1225_vm0, %v8702_v18  ;;  %v2501_v50 = vsel %vm1225_vm0, %v11267_v49, inf }
 0x27e   : > { %v1301_v21 = vpop.xlane.xlu0 %1300 }
 0x27f   : > { %v1302_v23 = vcvt.f32.s32 %v1301_v21 }
 0x281   : > { %v1305_v24 = vadd.s32 %v1304_v22, %v1302_v23  ;;  %v1286_v25 = vpop.xlane.xlu1 %1285 }
 0x282   : > { %v1287_v27 = vcvt.f32.s32 %v1286_v25  ;;  %v1812_v25 = vld [vmem:[%s13567_s11] sm:$0xff] }
 0x283   : > { %vm1309_vm14 = vcmp.eq.s32.totalorder %v11082_v0, %v1305_v24 }
 0x284   : > { %v1290_v28 = vadd.s32 %v1289_v26, %v1287_v27  ;;  %v8704_v32 = vsel %vm1309_vm14, 1.0, %v13595_v15  ;;  %v11274_v51 = vsel %vm1309_vm14, inf, %v11073_v58  ;;  %v2498_v58 = vsel %vm1225_vm0, %v11285_v40, inf  ;;  %v1813_v26 = vld [vmem:[%s13567_s11 + $0x8] sm:$0xff] }
 0x285   : > { %v2507_v52 = vsel %vm1225_vm0, %v11274_v51, inf }
 0x286   : > { %vm1308_vm15 = vcmp.eq.s32.totalorder %v11082_v0, %v1290_v28  ;;  %v11332_v28 = vpack.c.bf16 %v1813_v26, %v1812_v25 }
 0x287   : > { %v8703_v30 = vsel %vm1308_vm15, 1.0, %v13595_v15  ;;  %v11294_v56 = vsel %vm1308_vm15, inf, %v11077_v62 }
 0x288   : > { %9446 = vmatprep.mubr.msk.f32.mxu1 %vm1225_vm0, %v8703_v30  ;;  %v2504_v59 = vsel %vm1225_vm0, %v11294_v56, inf  ;;  %13726 = vst [vmem:[#allocation15_spill] sm:$0xff] %v11332_v28  ;;  %10104 = vmatprep.subr.bf16.mxu1 %v11332_v28 }
 0x289   : > { %9447 = vmatmul.mubr.msk.f32.gmra.mrb[6].mxu1 %vm1225_vm0, %v8704_v32 }
 0x28a   : > { %10106 = vmatpush3.bf16.msra.mxu1 %v11332_v28 }
 0x34c   : > { %v11198_v37 = vpop.f32.mrb[4].mxu1 }
 0x34d   : > { %1705 = vrot.lane.b32.xlu0 %v11198_v37, %s13589_s5  ;;  %v11202_v38 = vpop.f32.mrb[5].mxu1  ;;  %v11236_v44 = vsub.f32 %v11198_v37, %v11037_v2 }
 0x34e   : > { %1703 = vrot.lane.b32.xlu1 %v11202_v38, %s13589_s5  ;;  %9451 = vmatprep.mubr.msk.f32.mxu0 %vm1020_vm6, %v11202_v38  ;;  %v11224_v43 = vsub.f32 %v11202_v38, %v11040_v3 }
 0x34f   : > { %9452 = vmatmul.mubr.msk.f32.vlgmr.msra.gmra.mrb[4].mxu0 %vm1020_vm6, %v11198_v37  ;;  %v1430_v53 = vmul.f32 %v11236_v44, %v11236_v44 }
 0x350   : > { %9458 = vmatpush3.msk.msra.mxu0 %vm1029_vm5, %v11194_v36  ;;  %v1429_v2 = vmul.f32 %v11224_v43, %v11224_v43 }
 0x351   : > { %9465 = vmatprep.subr.mxu0 %v11211_v39  ;;  %v1436_v54 = vsel %vm1020_vm6, %v1430_v53, 0.0 }
 0x35c   : > { %v11218_v41 = vpop.f32.mrb[6].mxu1 }
 0x35d   : > { %v11220_v42 = vpop.f32.mrb[7].mxu1  ;;  %v11251_v45 = vsub.f32 %v11218_v41, %v11047_v4 }
 0x35e   : > { %1707 = vrot.lane.b32.xlu1 %v11220_v42, %s13589_s5  ;;  %9454 = vmatprep.mubr.msk.f32.mxu0 %vm1020_vm6, %v11220_v42  ;;  %v11240_v3 = vsub.f32 %v11220_v42, %v11052_v6  ;;  %v1433_v6 = vsel %vm1020_vm6, %v1429_v2, 0.0 }
 0x35f   : > { %9455 = vmatmul.mubr.msk.f32.gmra.mrb[6].mxu0 %vm1020_vm6, %v11218_v41  ;;  %v1432_v48 = vmul.f32 %v11251_v45, %v11251_v45 }
 0x360   : > { %9459 = vmatprep.mubr.msk.f32.mxu0 %vm1020_vm6, %v11224_v43  ;;  %v1431_v46 = vmul.f32 %v11240_v3, %v11240_v3 }
 0x361   : > { %v1442_v4 = vsel %vm1020_vm6, %v1432_v48, 0.0 }
 0x362   : > { %1709 = vrot.lane.b32.xlu1 %v11218_v41, %s13589_s5  ;;  %v1439_v47 = vsel %vm1020_vm6, %v1431_v46, 0.0  ;;  %s8678_s5 = sshll.u32 %s780_s2, 5 }
 0x363   : > { %9460 = vmatmul.mubr.msk.f32.vlgmr.msra.gmra.mrb[4].mxu0 %vm1020_vm6, %v11236_v44  ;;  %s782_s28 = scalar_lea.vmem [#allocation2], %s8678_s5  ;;  %s10846_s5 = smov [#allocation2]  }
 0x364   : > { %9462 = vmatprep.mubr.msk.f32.mxu0 %vm1020_vm6, %v11240_v3  ;;  %9466 = vmatpush3.msra.mxu0 %v11211_v39  ;;  %s8552_s0 = sshll.u32 %s782_s28, 4  ;;  %s10765_s4 = sshll.u32 %s10846_s5, 4  ;;  %s13506_s0 = int_to_ptr.vmem [resolvable:$true] %s8552_s0  ;;  %s10766_s4 = int_to_ptr.vmem [resolvable:$false] %s10765_s4 }
 0x365   : > { %s10761_s6 = scalar_lea.vmem %s13506_s0, 512  ;;  %p10768_p1 = scmp.lt.s32.totalorder %s13506_s0, %s10766_s4 }
 0x366   : > { %p10762_p12 = scmp.ne.s32.totalorder %s13506_s0, %s10761_s6 }
 0x367   : > { %9463 = vmatmul.mubr.msk.f32.gmra.mrb[6].mxu0 %vm1020_vm6, %v11251_v45 }
 0x368   : > { %p10763_p13 = pnand %p10762_p12, %p11009_p4 }
 0x36a   : > { %p10764_p0 = pneg %p10763_p13 }
 0x36c   : > { %1434 = vadd.xlane.f32.xlu0 %v1433_v6 }
 0x370   : > { %1440 = vadd.xlane.f32.xlu0 %v1439_v47 }
 0x374   : > { %1443 = vadd.xlane.f32.xlu0 %v1442_v4 }
 0x378   : > { %2502 = vmin.xlane.f32.xlu0 %v2501_v50 }
 0x37c   : > { %2508 = vmin.xlane.f32.xlu0 %v2507_v52  ;;  %v11357_v52 = vld [vmem:[%s13570_s14] sm:$0x7] }
 0x37d   : > { %9483 = vmatprep.subr.msk.mxu1 %vm1029_vm5, %v11357_v52 }
 0x386   : > { %1437 = vadd.xlane.f32.xlu1 %v1436_v54 }
 0x38a   : > { %2499 = vmin.xlane.f32.xlu1 %v2498_v58 }
 0x38e   : > { %2505 = vmin.xlane.f32.xlu1 %v2504_v59 }
 0x3bf   : > { %v1706_v9 = vpop.permute.xlu0 %1705 }
 0x3c0   : > { %v1704_v8 = vpop.permute.xlu1 %1703 }
 0x3c1   : > { %9467 = vmatprep.mubr.msk.f32.mxu0 %vm922_vm11, %v1704_v8 }
 0x3c2   : > { %9468 = vmatmul.mubr.msk.f32.vlgmr.msra.gmra.mrb[4].mxu0 %vm922_vm11, %v1706_v9 }
 0x3d0   : > { %v1708_v10 = vpop.permute.xlu1 %1707 }
 0x3d1   : > { %9470 = vmatprep.mubr.msk.f32.mxu0 %vm922_vm11, %v1708_v10 }
 0x3d4   : > { %v1710_v62 = vpop.permute.xlu1 %1709 }
 0x3d5   : > { %9471 = vmatmul.mubr.msk.f32.gmra.mrb[6].mxu0 %vm922_vm11, %v1710_v62 }
 0x3f9   : > { %v1435_v11 = vpop.xlane.xlu0 %1434 }
 0x3fa   : > { %v1445_v54 = vadd.f32 1e-20, %v1435_v11  ;;  %v8694_v11 = vld [vmem:[%s13566_s10] ss:$0 sm:$0xff] }
 0x3fb   : > { %v11379_v25 = vadd.f32 %v8694_v11, %v11296_v57 }
 0x3fc   : > { %vm1451_vm8 = vcmp.eq.f32.partialorder %v1445_v54, inf  ;;  %vm1453_vm10 = vcmp.eq.f32.partialorder %v1445_v54, 0.0 }
 0x3fd   : > { %v1441_v12 = vpop.xlane.xlu0 %1440 }
 0x3fe   : > { %v1447_v62 = vadd.f32 1e-20, %v1441_v12  ;;  %v11369_v12 = vld [vmem:[%s13727_s13] ss:$0 sm:$0xff] }
 0x400   : > { %vm1465_vm15 = vcmp.eq.f32.partialorder %v1447_v62, inf }
 0x401   : > { %v1444_v13 = vpop.xlane.xlu0 %1443 }
 0x402   : > { %v1448_v10 = vadd.f32 1e-20, %v1444_v13 }
 0x404   : > { %vm1472_vm14 = vcmp.eq.f32.partialorder %v1448_v10, inf }
 0x405   : > { %v2503_v14 = vpop.xlane.xlu0 %2502 }
 0x406   : > { %vm2511_vm1 = vcmp.eq.f32.partialorder %v11267_v49, %v2503_v14 }
 0x407   : > { %v2515_v7 = vsel %vm2511_vm1, %v11082_v0, 48 }
 0x408   : > { %v11311_v16 = vsel %vm1225_vm0, %v2515_v7, 2147483647 }
 0x409   : > { %v2509_v17 = vpop.xlane.xlu0 %2508  ;;  %v2535_v18 = vshra.s32 %v11311_v16, 16 }
 0x40a   : > { %vm2513_vm2 = vcmp.eq.f32.partialorder %v11274_v51, %v2509_v17 }
 0x40b   : > { %v2517_v19 = vsel %vm2513_vm2, %v11082_v0, 48  ;;  %v11316_v20 = vcvt.s32.f32 %v2535_v18  ;;  %v1454_v18 = vand.u32 2147483648, %v1445_v54  ;;  %vm1474_vm2 = vcmp.eq.f32.partialorder %v1448_v10, 0.0 }
 0x40c   : > { %v11319_v21 = vsel %vm1225_vm0, %v2517_v19, 2147483647 }
 0x40d   : > { %2538 = vmin.xlane.f32.xlu0 %v11316_v20  ;;  %v2565_v22 = vshra.s32 %v11319_v21, 16 }
 0x40f   : > { %v11323_v23 = vcvt.s32.f32 %v2565_v22  ;;  %v11374_v22 = vadd.f32 %v11289_v55, %v8694_v11  ;;  %v2534_v55 = vand.u32 65535, %v11311_v16  ;;  %v11395_v16 = vld [vmem:[%s13571_s15] sm:$0x7] }
 0x411   : > { %2568 = vmin.xlane.f32.xlu0 %v11323_v23 }
 0x413   : > { %v1438_v24 = vpop.xlane.xlu1 %1437 }
 0x414   : > { %v1446_v53 = vadd.f32 1e-20, %v1438_v24 }
 0x416   : > { %10575 = vrsqrt.f32 %v1446_v53  ;;  %vm1458_vm7 = vcmp.eq.f32.partialorder %v1446_v53, inf  ;;  %v1461_v7 = vand.u32 2147483648, %v1446_v53  ;;  %vm1460_vm9 = vcmp.eq.f32.partialorder %v1446_v53, 0.0 }
 0x417   : > { %v2500_v27 = vpop.xlane.xlu1 %2499  ;;  %10577 = vrsqrt.f32 %v1445_v54 }
 0x418   : > { %vm2510_vm3 = vcmp.eq.f32.partialorder %v11285_v40, %v2500_v27  ;;  %10579 = vrsqrt.f32 %v1448_v10 }
 0x419   : > { %v2514_v30 = vsel %vm2510_vm3, %v11082_v0, 48  ;;  %10581 = vrsqrt.f32 %v1447_v62  ;;  %vm1467_vm3 = vcmp.eq.f32.partialorder %v1447_v62, 0.0 }
 0x41a   : > { %v11338_v32 = vsel %vm1225_vm0, %v2514_v30, 2147483647 }
 0x41b   : > { %v2506_v2 = vpop.xlane.xlu1 %2505  ;;  %v2520_v6 = vshra.s32 %v11338_v32, 16 }
 0x41c   : > { %vm2512_vm4 = vcmp.eq.f32.partialorder %v11294_v56, %v2506_v2 }
 0x41d   : > { %v2516_v46 = vsel %vm2512_vm4, %v11082_v0, 48  ;;  %v11344_v47 = vcvt.s32.f32 %v2520_v6 }
 0x41e   : > { %v11347_v48 = vsel %vm1225_vm0, %v2516_v46, 2147483647 }
 0x41f   : > { %2523 = vmin.xlane.f32.xlu1 %v11344_v47  ;;  %v2550_v4 = vshra.s32 %v11347_v48, 16 }
 0x420   : > { %v10576_v58 = vpop.eup %10575 }
 0x421   : > { %v11351_v50 = vcvt.s32.f32 %v2550_v4  ;;  %v10578_v59 = vpop.eup %10577  ;;  %v1457_v8 = vmul.f32 %v10576_v58, %v1446_v53 }
 0x422   : > { %v1450_v9 = vmul.f32 %v10578_v59, %v1445_v54  ;;  %v10580_v6 = vpop.eup %10579 }
 0x423   : > { %2553 = vmin.xlane.f32.xlu1 %v11351_v50  ;;  %v1459_v14 = vsel %vm1458_vm7, %v1446_v53, %v1457_v8  ;;  %v10582_v53 = vpop.eup %10581  ;;  %v1471_v59 = vmul.f32 %v10580_v6, %v1448_v10 }
 0x424   : > { %v1452_v17 = vsel %vm1451_vm8, %v1445_v54, %v1450_v9  ;;  %v11361_v19 = vsel %vm1460_vm9, %v1461_v7, %v1459_v14  ;;  %v2536_v9 = vcvt.s32.f32 %v2534_v55  ;;  %v2564_v14 = vand.u32 65535, %v11319_v21 }
 0x425   : > { %v11371_v13 = vsel %vm1453_vm10, %v1454_v18, %v1452_v17  ;;  %v1695_v24 = vmul.f32 %v11369_v12, %v11361_v19  ;;  %v1464_v7 = vmul.f32 %v10582_v53, %v1447_v62  ;;  %v1473_v18 = vsel %vm1472_vm14, %v1448_v10, %v1471_v59 }
 0x426   : > { %v1694_v26 = vmul.f32 %v11369_v12, %v11371_v13  ;;  %v11416_v55 = vadd.f32 %v8694_v11, %v11302_v34  ;;  %v2549_v34 = vand.u32 65535, %v11347_v48  ;;  %vm2136_vm8 = vcmask 261120  }
 0x427   : > { %v10331_v27 = vadd.f32 %v1695_v24, %v11374_v22  ;;  %v2566_v24 = vcvt.s32.f32 %v2564_v14 }
 0x428   : > { %v10333_v2 = vadd.f32 %v1694_v26, %v11379_v25  ;;  %v1475_v26 = vand.u32 2147483648, %v1448_v10 }
 0x495   : > { %v9469_v30 = vpop.f32.mrb[4].mxu0 }
 0x496   : > { %v10332_v46 = vadd.f32 %v10331_v27, %v9469_v30  ;;  %v1785_v4 = vpop.f32.mrb[5].mxu0  ;;  %v1468_v27 = vand.u32 2147483648, %v1447_v62 }
 0x497   : > { %v10334_v54 = vadd.f32 %v10333_v2, %v1785_v4  ;;  %v11406_v2 = vsel %vm1474_vm2, %v1475_v26, %v1473_v18  ;;  %v2347_v18 = vld [vmem:[%s13577_s21 + $0x8] sm:$0xff]  ;;  %v11494_v26 = vld [vmem:[%s13568_s12] ss:$0 sm:$0xff] }
 0x498   : > { %v1809_v57 = vmax.f32 %v10332_v46, 0.0  ;;  %v11411_v46 = vadd.f32 %v11300_v5, %v8694_v11  ;;  %v1697_v4 = vmul.f32 %v11369_v12, %v11406_v2 }
 0x499   : > { %v1808_v58 = vmax.f32 %v10334_v54, 0.0  ;;  %v2519_v54 = vand.u32 65535, %v11338_v32 }
 0x49a   : > { %v11386_v8 = vpop.xlane.xlu0 %2538  ;;  %v10335_v10 = vadd.f32 %v1697_v4, %v11411_v46 }
 0x49b   : > { %9477 = vmatprep.mubr.msk.f32.mxu1 %vm1821_vm12, %v1808_v58  ;;  %vm2540_vm13 = vcmp.eq.f32.partialorder %v11316_v20, %v11386_v8  ;;  %v1466_v20 = vsel %vm1465_vm15, %v1447_v62, %v1464_v7  ;;  %v2521_v14 = vcvt.s32.f32 %v2519_v54 }
 0x49c   : > { %9478 = vmatmul.mubr.msk.f32.vlgmr.msra.gmra.mrb[8].mxu1 %vm1821_vm12, %v1809_v57  ;;  %v2541_v17 = vsel %vm2540_vm13, %v2536_v9, inf  ;;  %v11408_v6 = vsel %vm1467_vm3, %v1468_v27, %v1466_v20 }
 0x49d   : > { %2542 = vmin.xlane.f32.xlu0 %v2541_v17  ;;  %9484 = vmatpush3.msk.msra.mxu1 %vm1029_vm5, %v11357_v52  ;;  %v2551_v17 = vcvt.s32.f32 %v2549_v34 }
 0x49e   : > { %v11400_v21 = vpop.xlane.xlu0 %2568  ;;  %9491 = vmatprep.subr.msk.mxu1 %vm1029_vm5, %v11395_v16 }
 0x49f   : > { %vm2570_vm1 = vcmp.eq.f32.partialorder %v11323_v23, %v11400_v21  ;;  %v1696_v23 = vmul.f32 %v11369_v12, %v11408_v6 }
 0x4a0   : > { %v2571_v30 = vsel %vm2570_vm1, %v2566_v24, inf }
 0x4a1   : > { %2572 = vmin.xlane.f32.xlu0 %v2571_v30  ;;  %v10337_v62 = vadd.f32 %v1696_v23, %v11416_v55  ;;  %v2130_v23 = vld [vmem:[%s13574_s18 + $0x10] sm:$0xff] }
 0x4a8   : > { %v9472_v53 = vpop.f32.mrb[6].mxu0 }
 0x4a9   : > { %v10336_v58 = vadd.f32 %v10335_v10, %v9472_v53  ;;  %v1795_v59 = vpop.f32.mrb[7].mxu0  ;;  %v2131_v10 = vld [vmem:[%s13574_s18 + $0x18] sm:$0xff] }
 0x4aa   : > { %v10338_v5 = vadd.f32 %v10337_v62, %v1795_v59  ;;  %v11510_v54 = vpack.c.bf16 %v2131_v10, %v2130_v23 }
 0x4ab   : > { %v1811_v11 = vmax.f32 %v10336_v58, 0.0 }
 0x4ac   : > { %v1810_v57 = vmax.f32 %v10338_v5, 0.0  ;;  %v11423_v9 = vpop.xlane.xlu1 %2523  ;;  %13733 = vst [vmem:[#allocation21_spill] sm:$0xff] %v11510_v54 }
 0x4ad   : > { %vm2525_vm4 = vcmp.eq.f32.partialorder %v11344_v47, %v11423_v9 }
 0x4ae   : > { %9480 = vmatprep.mubr.msk.f32.mxu1 %vm1821_vm12, %v1810_v57  ;;  %v2526_v7 = vsel %vm2525_vm4, %v2521_v14, inf }
 0x4af   : > { %2527 = vmin.xlane.f32.xlu1 %v2526_v7  ;;  %9481 = vmatmul.mubr.msk.f32.gmra.mrb[10].mxu1 %vm1821_vm12, %v1811_v11  ;;  %v8695_v11 = vld [vmem:[%s13573_s17] ss:$0 sm:$0xff] }
 0x4b0   : > { %v11430_v32 = vpop.xlane.xlu1 %2553  ;;  %9485 = vmatprep.mubr.msk.f32.mxu1 %vm1020_vm6, %v11202_v38  ;;  %v2133_v38 = vld [vmem:[%s13575_s19 + $0x8] sm:$0xff]  ;;  %v11541_v7 = vadd.f32 %v11150_v60, %v8695_v11 }
 0x4b1   : > { %vm2555_vm7 = vcmp.eq.f32.partialorder %v11351_v50, %v11430_v32  ;;  %v2346_v50 = vld [vmem:[%s13577_s21] sm:$0xff] }
 0x4b2   : > { %v2556_v48 = vsel %vm2555_vm7, %v2551_v17, inf  ;;  %v11487_v24 = vpack.c.bf16 %v2347_v18, %v2346_v50  ;;  %13736 = vst [vmem:[#allocation24_spill] sm:$0xff] %v11541_v7  ;;  %v11546_v17 = vld [vmem:[%s13572_s16] ss:$0 sm:$0xff]  ;;  %v11561_v18 = vadd.f32 %v8695_v11, %v11156_v1 }
 0x4b3   : > { %2557 = vmin.xlane.f32.xlu1 %v2556_v48  ;;  %9486 = vmatmul.mubr.msk.f32.vlgmr.msra.gmra.mrb[12].mxu1 %vm1020_vm6, %v11198_v37  ;;  %v2132_v37 = vld [vmem:[%s13575_s19] sm:$0xff]  ;;  %v11549_v48 = vadd.f32 %v8695_v11, %v11152_v61  ;;  %v2116_v60 = vmul.f32 %v11546_v17, %v11371_v13  ;;  %v2118_v13 = vmul.f32 %v11546_v17, %v11408_v6  ;;  %v2349_v6 = vld [vmem:[%s13577_s21 + $0x18] sm:$0xff] }
 0x4b4   : > { %9492 = vmatpush3.msk.msra.mxu1 %vm1029_vm5, %v11395_v16  ;;  %9488 = vmatprep.mubr.msk.f32.mxu1 %vm1020_vm6, %v11220_v42  ;;  %v2134_v42 = vld [vmem:[%s13575_s19 + $0x10] sm:$0xff]  ;;  %13739 = vst [vmem:[#allocation27_spill] sm:$0xff] %v11561_v18 }
 0x4b5   : > { %10124 = vmatprep.subr.bf16.mxu1 %v11487_v24  ;;  %13737 = vst [vmem:[#allocation25_spill] sm:$0xff] %v11549_v48 }
 0x4b7   : > { %9489 = vmatmul.mubr.msk.f32.gmra.mrb[14].mxu1 %vm1020_vm6, %v11218_v41  ;;  %v11458_v41 = vpack.c.bf16 %v2133_v38, %v2132_v37 }
 0x4b8   : > { %9493 = vmatprep.mubr.msk.f32.mxu1 %vm1020_vm6, %v11224_v43  ;;  %v2135_v43 = vld [vmem:[%s13575_s19 + $0x18] sm:$0xff] }
 0x4b9   : > { %13728 = vst [vmem:[#allocation16_spill] sm:$0xff] %v11458_v41  ;;  %10108 = vmatprep.subr.bf16.mxu0 %v11458_v41 }
 0x4ba   : > { %10110 = vmatpush3.bf16.msra.mxu0 %v11458_v41 }
 0x4bb   : > { %9494 = vmatmul.mubr.msk.f32.vlgmr.msra.gmra.mrb[12].mxu1 %vm1020_vm6, %v11236_v44  ;;  %v11468_v44 = vpack.c.bf16 %v2135_v43, %v2134_v42  ;;  %v2117_v42 = vmul.f32 %v11546_v17, %v11361_v19  ;;  %v2119_v19 = vmul.f32 %v11546_v17, %v11406_v2  ;;  %v2348_v2 = vld [vmem:[%s13577_s21 + $0x10] sm:$0xff] }
 0x4bc   : > { %9496 = vmatprep.mubr.msk.f32.mxu1 %vm1020_vm6, %v11240_v3  ;;  %v2128_v3 = vld [vmem:[%s13574_s18] sm:$0xff]  ;;  %10126 = vmatpush3.bf16.msra.mxu1 %v11487_v24 }
 0x4bd   : > { %13729 = vst [vmem:[#allocation17_spill] sm:$0xff] %v11468_v44  ;;  %10112 = vmatprep.subr.bf16.mxu0 %v11468_v44 }
 0x4be   : > { %10114 = vmatpush3.bf16.msra.mxu0 %v11468_v44 }
 0x4bf   : > { %9497 = vmatmul.mubr.msk.f32.gmra.mrb[14].mxu1 %vm1020_vm6, %v11251_v45  ;;  %v2129_v45 = vld [vmem:[%s13574_s18 + $0x8] sm:$0xff] }
 0x4c0   : > { %v11478_v47 = vpack.c.bf16 %v2129_v45, %v2128_v3  ;;  %v11558_v45 = vadd.f32 %v11154_v63, %v8695_v11 }
 0x4c2   : > { %13730 = vst [vmem:[#allocation18_spill] sm:$0xff] %v11478_v47  ;;  %10116 = vmatprep.subr.bf16.mxu0 %v11478_v47  ;;  %13738 = vst [vmem:[#allocation26_spill] sm:$0xff] %v11558_v45 }
 0x56f   : > { %v9479_v20 = vpop.f32.mrb[8].mxu1 }
 0x570   : > { %v11497_v27 = vadd.f32 %v9479_v20, %v11494_v26  ;;  %v1900_v30 = vpop.f32.mrb[9].mxu1 }
 0x571   : > { %v11500_v4 = vadd.f32 %v11494_v26, %v1900_v30 }
 0x572   : > { %13731 = vst [vmem:[#allocation19_spill] sm:$0xff] %v11497_v27  ;;  %v13594_v62 = vmax.f32 %v11497_v27, 0.0 }
 0x573   : > { %13732 = vst [vmem:[#allocation20_spill] sm:$0xff] %v11500_v4  ;;  %v13593_v53 = vmax.f32 %v11500_v4, 0.0 }
 0x575   : > { %9507 = vmatprep.mubr.msk.f32.mxu0 %vm2136_vm8, %v13593_v53 }
 0x576   : > { %9508 = vmatmul.mubr.msk.f32.vlgmr.msra.gmra.mrb[8].mxu0 %vm2136_vm8, %v13594_v62 }
 0x577   : > { %10118 = vmatpush3.bf16.msra.mxu0 %v11478_v47 }
 0x578   : > { %10120 = vmatprep.subr.bf16.mxu0 %v11510_v54 }
 0x57b   : > { %10122 = vmatpush3.bf16.msra.mxu0 %v11510_v54 }
 0x57c   : > { %9559 = vmatprep.subr.msk.mxu0 %vm1029_vm5, %v11185_v33 }
 0x582   : > { %v9482_v58 = vpop.f32.mrb[10].mxu1 }
 0x583   : > { %v11524_v59 = vadd.f32 %v9482_v58, %v11494_v26  ;;  %v1910_v5 = vpop.f32.mrb[11].mxu1 }
 0x584   : > { %v11527_v57 = vadd.f32 %v11494_v26, %v1910_v5 }
 0x585   : > { %13734 = vst [vmem:[#allocation22_spill] sm:$0xff] %v11524_v59  ;;  %v13592_v34 = vmax.f32 %v11524_v59, 0.0 }
 0x586   : > { %13735 = vst [vmem:[#allocation23_spill] sm:$0xff] %v11527_v57  ;;  %v13591_v14 = vmax.f32 %v11527_v57, 0.0 }
 0x588   : > { %9510 = vmatprep.mubr.msk.f32.mxu0 %vm2136_vm8, %v13591_v14 }
 0x589   : > { %9511 = vmatmul.mubr.msk.f32.gmra.mrb[10].mxu0 %vm2136_vm8, %v13592_v34 }
 0x58e   : > { %v9495_v37 = vpop.f32.mrb[12].mxu1 }
 0x58f   : > { %v10339_v38 = vadd.f32 %v9495_v37, %v11541_v7  ;;  %v2086_v43 = vpop.f32.mrb[13].mxu1 }
 0x590   : > { %v10340_v3 = vadd.f32 %v2086_v43, %v11549_v48  ;;  %v11592_v43 = vld [vmem:[%s13576_s20] ss:$0 sm:$0xff] }
 0x591   : > { %v2121_v50 = vadd.f32 %v10339_v38, %v2117_v42  ;;  %v11583_v38 = vpack.c.bf16 %v2349_v6, %v2348_v2  ;;  %v2530_v42 = vcvt.f32.s32 %v11423_v9  ;;  %v2545_v9 = vcvt.f32.s32 %v11386_v8 }
 0x592   : > { %v2120_v61 = vadd.f32 %v10340_v3, %v2116_v60  ;;  %v9498_v20 = vpop.f32.mrb[14].mxu1 }
 0x593   : > { %v10341_v30 = vadd.f32 %v9498_v20, %v11558_v45  ;;  %v2096_v23 = vpop.f32.mrb[15].mxu1  ;;  %v2125_v63 = vmax.f32 %v2121_v50, 0.0  ;;  %10128 = vmatprep.subr.bf16.mxu1 %v11583_v38  ;;  %v2531_v20 = vshll.u32 %v2530_v42, 16  ;;  %v2546_v8 = vshll.u32 %v2545_v9, 16 }
 0x594   : > { %v2124_v10 = vmax.f32 %v2120_v61, 0.0  ;;  %v10342_v58 = vadd.f32 %v2096_v23, %v11561_v18  ;;  %10130 = vmatpush3.bf16.msra.mxu1 %v11583_v38 }
 0x595   : > { %v2123_v5 = vadd.f32 %v10341_v30, %v2119_v19  ;;  %10132 = vmatprep.subr.bf16.mxu1 %v11100_v29  ;;  %v2543_v30 = vpop.xlane.xlu0 %2542 }
 0x596   : > { %v2122_v37 = vadd.f32 %v10342_v58, %v2118_v13  ;;  %9521 = vmatprep.mubr.msk.f32.mxu0 %vm2136_vm8, %v2124_v10  ;;  %v2544_v2 = vcvt.f32.s32 %v2543_v30 }
 0x597   : > { %9522 = vmatmul.mubr.msk.f32.vlgmr.msra.gmra.mrb[8].mxu0 %vm2136_vm8, %v2125_v63  ;;  %v2127_v11 = vmax.f32 %v2123_v5, 0.0 }
 0x598   : > { %v2126_v1 = vmax.f32 %v2122_v37, 0.0  ;;  %9560 = vmatpush3.msk.msra.mxu0 %vm1029_vm5, %v11185_v33  ;;  %v2528_v33 = vpop.xlane.xlu1 %2527 }
 0x599   : > { %9567 = vmatprep.subr.msk.mxu0 %vm1029_vm5, %v11194_v36  ;;  %v2529_v3 = vcvt.f32.s32 %v2528_v33  ;;  %v2573_v6 = vpop.xlane.xlu0 %2572 }
 0x59a   : > { %9524 = vmatprep.mubr.msk.f32.mxu0 %vm2136_vm8, %v2126_v1  ;;  %v2560_v1 = vcvt.f32.s32 %v11430_v32 }
 0x59b   : > { %9525 = vmatmul.mubr.msk.f32.gmra.mrb[10].mxu0 %vm2136_vm8, %v2127_v11  ;;  %v11596_v23 = vadd.s32 %v2531_v20, %v2529_v3  ;;  %v2575_v3 = vcvt.f32.s32 %v11400_v21 }
 0x59c   : > { %v2558_v13 = vpop.xlane.xlu1 %2557  ;;  %v2561_v32 = vshll.u32 %v2560_v1, 16 }
 0x59d   : > { %v2559_v33 = vcvt.f32.s32 %v2558_v13  ;;  %vm2578_vm9 = vcmp.eq.s32.totalorder %v11082_v0, %v11596_v23  ;;  %v2576_v21 = vshll.u32 %v2575_v3, 16  ;;  %v11696_v3 = vld [vmem:[%s11034_s27 + $0x10] sm:$0xff] }
 0x59e   : > { %v8754_v20 = vsel %vm2578_vm9, 1.0, %v13595_v15 }
 0x59f   : > { %v11617_v30 = vadd.s32 %v2561_v32, %v2559_v33  ;;  %v11674_v33 = vld [vmem:[%s11034_s27] sm:$0xff]  ;;  %v11710_v32 = vld [vmem:[%s11034_s27 + $0x18] sm:$0xff] }
 0x5a1   : > { %vm2580_vm13 = vcmp.eq.s32.totalorder %v11082_v0, %v11617_v30 }
 0x66a   : > { %v9523_v60 = vpop.f32.mrb[8].mxu0 }
 0x66b   : > { %v2339_v50 = vadd.f32 %v9523_v60, %v11592_v43  ;;  %v2312_v61 = vpop.f32.mrb[9].mxu0 }
 0x66c   : > { %v2338_v19 = vadd.f32 %v11592_v43, %v2312_v61  ;;  %v2574_v61 = vcvt.f32.s32 %v2573_v6 }
 0x66d   : > { %v2343_v63 = vmax.f32 %v2339_v50, 0.0  ;;  %v11610_v50 = vadd.s32 %v2546_v8, %v2544_v2 }
 0x66e   : > { %v2342_v10 = vmax.f32 %v2338_v19, 0.0  ;;  %v9526_v58 = vpop.f32.mrb[10].mxu0  ;;  %v2577_v19 = vadd.s32 %v2576_v21, %v2574_v61 }
 0x66f   : > { %v2341_v5 = vadd.f32 %v9526_v58, %v11592_v43  ;;  %v2322_v37 = vpop.f32.mrb[11].mxu0  ;;  %vm2579_vm10 = vcmp.eq.s32.totalorder %v11082_v0, %v11610_v50  ;;  %v8756_v58 = vsel %vm2580_vm13, 1.0, %v13595_v15 }
 0x670   : > { %v2340_v11 = vadd.f32 %v11592_v43, %v2322_v37  ;;  %9535 = vmatprep.mubr.msk.f32.mxu1 %vm2136_vm8, %v2342_v10  ;;  %v8755_v10 = vsel %vm2579_vm10, 1.0, %v13595_v15  ;;  %vm2581_vm14 = vcmp.eq.s32.totalorder %v11082_v0, %v2577_v19  ;;  %v11732_v14 = vsel %vm2579_vm10, inf, %v11267_v49 }
 0x671   : > { %9536 = vmatmul.mubr.msk.f32.vlgmr.msra.gmra.mrb[16].mxu1 %vm2136_vm8, %v2343_v63  ;;  %v2345_v60 = vmax.f32 %v2341_v5, 0.0  ;;  %v8757_v9 = vsel %vm2581_vm14, 1.0, %v13595_v15  ;;  %13745 = vst [vmem:[#allocation32_spill] sm:$0xff] %v11732_v14  ;;  %v11748_v49 = vsel %vm2578_vm9, inf, %v11285_v40 }
 0x672   : > { %v2344_v42 = vmax.f32 %v2340_v11, 0.0  ;;  %10134 = vmatpush3.bf16.msra.mxu1 %v11100_v29  ;;  %13747 = vst [vmem:[#allocation34_spill] sm:$0xff] %v11748_v49 }
 0x673   : > { %10136 = vmatprep.subr.bf16.mxu1 %v11105_v31 }
 0x674   : > { %9538 = vmatprep.mubr.msk.f32.mxu1 %vm2136_vm8, %v2344_v42 }
 0x675   : > { %9539 = vmatmul.mubr.msk.f32.gmra.mrb[18].mxu1 %vm2136_vm8, %v2345_v60 }
 0x676   : > { %10138 = vmatpush3.bf16.msra.mxu1 %v11105_v31  ;;  %9553 = vmatprep.mubr.msk.f32.mxu1 %vm1225_vm0, %v8754_v20 }
 0x677   : > { %10140 = vmatprep.subr.bf16.mxu1 %v11117_v35 }
 0x67a   : > { %10142 = vmatpush3.bf16.msra.mxu1 %v11117_v35 }
 0x67b   : > { %10144 = vmatprep.subr.bf16.mxu1 %v11332_v28 }
 0x67d   : > { %9554 = vmatmul.mubr.msk.f32.vlgmr.msra.gmra.mrb[20].mxu1 %vm1225_vm0, %v8755_v10 }
 0x67e   : > { %9556 = vmatprep.mubr.msk.f32.mxu1 %vm1225_vm0, %v8756_v58  ;;  %10146 = vmatpush3.bf16.msra.mxu1 %v11332_v28 }
 0x67f   : > { %9593 = vmatprep.subr.msk.mxu1 %vm1029_vm5, %v11357_v52 }
 0x681   : > { %9557 = vmatmul.mubr.msk.f32.gmra.mrb[22].mxu1 %vm1225_vm0, %v8757_v9 }
 0x744   : > { %v11646_v13 = vpop.f32.mrb[16].mxu1 }
 0x745   : > { %13740 = vst [vmem:[#allocation28_spill] sm:$0xff] %v11646_v13  ;;  %v11648_v63 = vpop.f32.mrb[17].mxu1 }
 0x746   : > { %13741 = vst [vmem:[#allocation29_spill] sm:$0xff] %v11648_v63 }
 0x748   : > { %v11650_v5 = vpop.f32.mrb[18].mxu1 }
 0x749   : > { %13742 = vst [vmem:[#allocation30_spill] sm:$0xff] %v11650_v5  ;;  %v11652_v37 = vpop.f32.mrb[19].mxu1 }
 0x74a   : > { %13743 = vst [vmem:[#allocation31_spill] sm:$0xff] %v11652_v37 }
 0x750   : > { %v11654_v1 = vpop.f32.mrb[20].mxu1 }
 0x751   : > { %2955 = vrot.lane.b32.xlu0 %v11654_v1, %s13744_s24  ;;  %v11658_v11 = vpop.f32.mrb[21].mxu1 }
 0x752   : > { %2953 = vrot.lane.b32.xlu1 %v11658_v11, %s13744_s24  ;;  %9561 = vmatprep.mubr.msk.f32.mxu0 %vm1020_vm6, %v11658_v11  ;;  %v11678_v42 = vsub.f32 %v11658_v11, %v11674_v33 }
 0x753   : > { %9562 = vmatmul.mubr.msk.f32.vlgmr.msra.gmra.mrb[12].mxu0 %vm1020_vm6, %v11654_v1 }
 0x754   : > { %v11666_v2 = vpop.f32.mrb[22].mxu1  ;;  %9568 = vmatpush3.msk.msra.mxu0 %vm1029_vm5, %v11194_v36  ;;  %v11689_v36 = vld [vmem:[%s11034_s27 + $0x8] sm:$0xff]  ;;  %v2695_v20 = vmul.f32 %v11678_v42, %v11678_v42 }
 0x755   : > { %v11670_v6 = vpop.f32.mrb[23].mxu1  ;;  %9575 = vmatprep.subr.mxu0 %v11211_v39  ;;  %v11693_v8 = vsub.f32 %v11654_v1, %v11689_v36  ;;  %v11714_v61 = vsub.f32 %v11666_v2, %v11710_v32 }
 0x756   : > { %2957 = vrot.lane.b32.xlu1 %v11670_v6, %s13744_s24  ;;  %9564 = vmatprep.mubr.msk.f32.mxu0 %vm1020_vm6, %v11670_v6  ;;  %v11700_v60 = vsub.f32 %v11670_v6, %v11696_v3  ;;  %v2699_v21 = vsel %vm1020_vm6, %v2695_v20, 0.0 }
 0x757   : > { %9565 = vmatmul.mubr.msk.f32.gmra.mrb[14].mxu0 %vm1020_vm6, %v11666_v2  ;;  %v2698_v58 = vmul.f32 %v11714_v61, %v11714_v61  ;;  %v2696_v20 = vmul.f32 %v11693_v8, %v11693_v8 }
 0x758   : > { %9569 = vmatprep.mubr.msk.f32.mxu0 %vm1020_vm6, %v11678_v42  ;;  %v2697_v10 = vmul.f32 %v11700_v60, %v11700_v60 }
 0x759   : > { %v2708_v9 = vsel %vm1020_vm6, %v2698_v58, 0.0  ;;  %v3704_v58 = vsel %vm1225_vm0, %v11748_v49, inf }
 0x75a   : > { %2959 = vrot.lane.b32.xlu1 %v11666_v2, %s13744_s24 }
 0x75b   : > { %9570 = vmatmul.mubr.msk.f32.vlgmr.msra.gmra.mrb[12].mxu0 %vm1020_vm6, %v11693_v8 }
 0x75c   : > { %9572 = vmatprep.mubr.msk.f32.mxu0 %vm1020_vm6, %v11700_v60  ;;  %9576 = vmatpush3.msra.mxu0 %v11211_v39  ;;  %v2705_v39 = vsel %vm1020_vm6, %v2697_v10, 0.0  ;;  %v11741_v10 = vsel %vm2581_vm14, inf, %v11274_v51  ;;  %v11758_v51 = vsel %vm2580_vm13, inf, %v11294_v56 }
 0x75d   : > { %10148 = vmatprep.subr.bf16.mxu0 %v11458_v41  ;;  %13746 = vst [vmem:[#allocation33_spill] sm:$0xff] %v11741_v10  ;;  %v3713_v50 = vsel %vm1225_vm0, %v11741_v10, inf  ;;  %13748 = vst [vmem:[#allocation35_spill] sm:$0xff] %v11758_v51  ;;  %v3710_v19 = vsel %vm1225_vm0, %v11758_v51, inf }
 0x75f   : > { %9573 = vmatmul.mubr.msk.f32.gmra.mrb[14].mxu0 %vm1020_vm6, %v11714_v61 }
 0x770   : > { %2700 = vadd.xlane.f32.xlu0 %v2699_v21  ;;  %v3707_v21 = vsel %vm1225_vm0, %v11732_v14, inf }
 0x774   : > { %2706 = vadd.xlane.f32.xlu0 %v2705_v39  ;;  %v2702_v39 = vsel %vm1020_vm6, %v2696_v20, 0.0 }
 0x778   : > { %2709 = vadd.xlane.f32.xlu0 %v2708_v9 }
 0x77c   : > { %3708 = vmin.xlane.f32.xlu0 %v3707_v21 }
 0x77e   : > { %2703 = vadd.xlane.f32.xlu1 %v2702_v39 }
 0x780   : > { %3714 = vmin.xlane.f32.xlu0 %v3713_v50 }
 0x782   : > { %3705 = vmin.xlane.f32.xlu1 %v3704_v58 }
 0x786   : > { %3711 = vmin.xlane.f32.xlu1 %v3710_v19 }
 0x7c3   : > { %v2956_v23 = vpop.permute.xlu0 %2955 }
 0x7c4   : > { %v2954_v40 = vpop.permute.xlu1 %2953 }
 0x7c5   : > { %9577 = vmatprep.mubr.msk.f32.mxu0 %vm922_vm11, %v2954_v40 }
 0x7c6   : > { %9578 = vmatmul.mubr.msk.f32.vlgmr.msra.gmra.mrb[12].mxu0 %vm922_vm11, %v2956_v23 }
 0x7c7   : > { %10150 = vmatpush3.bf16.msra.mxu0 %v11458_v41 }
 0x7c8   : > { %v2958_v9 = vpop.permute.xlu1 %2957  ;;  %10152 = vmatprep.subr.bf16.mxu0 %v11468_v44 }
 0x7c9   : > { %9580 = vmatprep.mubr.msk.f32.mxu0 %vm922_vm11, %v2958_v9 }
 0x7cb   : > { %10154 = vmatpush3.bf16.msra.mxu0 %v11468_v44 }
 0x7cc   : > { %v2960_v56 = vpop.permute.xlu1 %2959  ;;  %10156 = vmatprep.subr.bf16.mxu0 %v11478_v47 }
 0x7cd   : > { %9581 = vmatmul.mubr.msk.f32.gmra.mrb[14].mxu0 %vm922_vm11, %v2960_v56 }
 0x7fd   : > { %v2701_v30 = vpop.xlane.xlu0 %2700 }
 0x7fe   : > { %v2711_v4 = vadd.f32 1e-20, %v2701_v30 }
 0x800   : > { %vm2717_vm7 = vcmp.eq.f32.partialorder %v2711_v4, inf  ;;  %vm2719_vm10 = vcmp.eq.f32.partialorder %v2711_v4, 0.0 }
 0x801   : > { %v2707_v20 = vpop.xlane.xlu0 %2706 }
 0x802   : > { %v2713_v27 = vadd.f32 1e-20, %v2707_v20 }
 0x804   : > { %vm2731_vm14 = vcmp.eq.f32.partialorder %v2713_v27, inf }
 0x805   : > { %v2710_v21 = vpop.xlane.xlu0 %2709 }
 0x809   : > { %v3709_v39 = vpop.xlane.xlu0 %3708 }
 0x80a   : > { %vm3717_vm15 = vcmp.eq.f32.partialorder %v11732_v14, %v3709_v39 }
 0x80b   : > { %v3721_v50 = vsel %vm3717_vm15, %v11082_v0, 48  ;;  %v2704_v58 = vpop.xlane.xlu1 %2703 }
 0x80c   : > { %v11773_v19 = vsel %vm1225_vm0, %v3721_v50, 2147483647 }
 0x80d   : > { %v3715_v40 = vpop.xlane.xlu0 %3714  ;;  %v3741_v23 = vshra.s32 %v11773_v19, 16  ;;  %v3740_v14 = vand.u32 65535, %v11773_v19 }
 0x80e   : > { %vm3719_vm1 = vcmp.eq.f32.partialorder %v11741_v10, %v3715_v40 }
 0x80f   : > { %v3723_v9 = vsel %vm3719_vm1, %v11082_v0, 48  ;;  %v3706_v56 = vpop.xlane.xlu1 %3705  ;;  %v11778_v34 = vcvt.s32.f32 %v3741_v23  ;;  %vm2733_vm1 = vcmp.eq.f32.partialorder %v2713_v27, 0.0 }
 0x810   : > { %v11781_v53 = vsel %vm1225_vm0, %v3723_v9, 2147483647  ;;  %vm3716_vm2 = vcmp.eq.f32.partialorder %v11748_v49, %v3706_v56 }
 0x811   : > { %v3720_v39 = vsel %vm3716_vm2, %v11082_v0, 48  ;;  %3744 = vmin.xlane.f32.xlu0 %v11778_v34  ;;  %v3771_v50 = vshra.s32 %v11781_v53, 16 }
 0x812   : > { %v11788_v62 = vsel %vm1225_vm0, %v3720_v39, 2147483647 }
 0x813   : > { %v3712_v40 = vpop.xlane.xlu1 %3711  ;;  %v11790_v15 = vcvt.s32.f32 %v3771_v50  ;;  %v3726_v23 = vshra.s32 %v11788_v62, 16  ;;  %v2712_v50 = vadd.f32 1e-20, %v2704_v58  ;;  %v2720_v58 = vand.u32 2147483648, %v2711_v4 }
 0x814   : > { %vm3718_vm3 = vcmp.eq.f32.partialorder %v11758_v51, %v3712_v40  ;;  %v2714_v40 = vadd.f32 1e-20, %v2710_v21 }
 0x815   : > { %v3722_v9 = vsel %vm3718_vm3, %v11082_v0, 48  ;;  %3774 = vmin.xlane.f32.xlu0 %v11790_v15  ;;  %v11796_v56 = vcvt.s32.f32 %v3726_v23  ;;  %10583 = vrsqrt.f32 %v2712_v50  ;;  %vm2724_vm4 = vcmp.eq.f32.partialorder %v2712_v50, inf }
 0x816   : > { %v11799_v57 = vsel %vm1225_vm0, %v3722_v9, 2147483647  ;;  %10585 = vrsqrt.f32 %v2711_v4  ;;  %v2727_v44 = vand.u32 2147483648, %v2712_v50  ;;  %vm2726_vm9 = vcmp.eq.f32.partialorder %v2712_v50, 0.0 }
 0x817   : > { %3729 = vmin.xlane.f32.xlu1 %v11796_v56  ;;  %v3756_v39 = vshra.s32 %v11799_v57, 16  ;;  %10587 = vrsqrt.f32 %v2714_v40  ;;  %vm2738_vm13 = vcmp.eq.f32.partialorder %v2714_v40, inf  ;;  %v2741_v10 = vand.u32 2147483648, %v2714_v40 }
 0x818   : > { %10589 = vrsqrt.f32 %v2713_v27  ;;  %vm2740_vm15 = vcmp.eq.f32.partialorder %v2714_v40, 0.0 }
 0x819   : > { %v11803_v59 = vcvt.s32.f32 %v3756_v39 }
 0x81b   : > { %3759 = vmin.xlane.f32.xlu1 %v11803_v59 }
 0x81f   : > { %v10584_v23 = vpop.eup %10583 }
 0x820   : > { %v10586_v37 = vpop.eup %10585  ;;  %v2723_v9 = vmul.f32 %v10584_v23, %v2712_v50 }
 0x821   : > { %v2716_v5 = vmul.f32 %v10586_v37, %v2711_v4  ;;  %v10588_v63 = vpop.eup %10587 }
 0x822   : > { %v2725_v13 = vsel %vm2724_vm4, %v2712_v50, %v2723_v9  ;;  %v10590_v39 = vpop.eup %10589  ;;  %v2737_v21 = vmul.f32 %v10588_v63, %v2714_v40  ;;  %v2734_v50 = vand.u32 2147483648, %v2713_v27 }
 0x823   : > { %v2718_v51 = vsel %vm2717_vm7, %v2711_v4, %v2716_v5  ;;  %v11806_v30 = vsel %vm2726_vm9, %v2727_v44, %v2725_v13  ;;  %v2730_v49 = vmul.f32 %v10590_v39, %v2713_v27 }
 0x824   : > { %v11808_v20 = vsel %vm2719_vm10, %v2720_v58, %v2718_v51  ;;  %v2946_v23 = vmul.f32 %v11369_v12, %v11806_v30  ;;  %v2739_v9 = vsel %vm2738_vm13, %v2714_v40, %v2737_v21 }
 0x825   : > { %v2945_v37 = vmul.f32 %v11369_v12, %v11808_v20  ;;  %v2732_v5 = vsel %vm2731_vm14, %v2713_v27, %v2730_v49  ;;  %v11815_v4 = vsel %vm2740_vm15, %v2741_v10, %v2739_v9  ;;  %v3742_v27 = vcvt.s32.f32 %v3740_v14 }
 0x826   : > { %v10343_v44 = vadd.f32 %v2946_v23, %v11374_v22  ;;  %v11818_v51 = vsel %vm2733_vm1, %v2734_v50, %v2732_v5  ;;  %v2948_v49 = vmul.f32 %v11369_v12, %v11815_v4 }
 0x827   : > { %v10345_v63 = vadd.f32 %v2945_v37, %v11379_v25  ;;  %v2947_v40 = vmul.f32 %v11369_v12, %v11818_v51  ;;  %v3770_v37 = vand.u32 65535, %v11781_v53 }
 0x828   : > { %v10347_v5 = vadd.f32 %v2948_v49, %v11411_v46  ;;  %v3755_v49 = vand.u32 65535, %v11799_v57 }
 0x829   : > { %v10349_v50 = vadd.f32 %v2947_v40, %v11416_v55 }
 0x899   : > { %v9579_v13 = vpop.f32.mrb[12].mxu0 }
 0x89a   : > { %v10344_v39 = vadd.f32 %v10343_v44, %v9579_v13  ;;  %v3035_v58 = vpop.f32.mrb[13].mxu0  ;;  %v3725_v44 = vand.u32 65535, %v11788_v62 }
 0x89b   : > { %v10346_v21 = vadd.f32 %v10345_v63, %v3035_v58 }
 0x89c   : > { %v3059_v10 = vmax.f32 %v10344_v39, 0.0  ;;  %v3772_v39 = vcvt.s32.f32 %v3770_v37  ;;  %v3727_v62 = vcvt.s32.f32 %v3725_v44 }
 0x89d   : > { %v3058_v23 = vmax.f32 %v10346_v21, 0.0 }
 0x89e   : > { %v11825_v9 = vpop.xlane.xlu0 %3744 }
 0x89f   : > { %9587 = vmatprep.mubr.msk.f32.mxu1 %vm1821_vm12, %v3058_v23  ;;  %vm3746_vm2 = vcmp.eq.f32.partialorder %v11778_v34, %v11825_v9 }
 0x8a0   : > { %v9582_v19 = vpop.f32.mrb[14].mxu0  ;;  %9588 = vmatmul.mubr.msk.f32.vlgmr.msra.gmra.mrb[24].mxu1 %vm1821_vm12, %v3059_v10  ;;  %v3747_v12 = vsel %vm3746_vm2, %v3742_v27, inf }
 0x8a1   : > { %v10348_v13 = vadd.f32 %v10347_v5, %v9582_v19  ;;  %v3045_v63 = vpop.f32.mrb[15].mxu0  ;;  %3748 = vmin.xlane.f32.xlu0 %v3747_v12  ;;  %9594 = vmatpush3.msk.msra.mxu1 %vm1029_vm5, %v11357_v52 }
 0x8a2   : > { %v10350_v53 = vadd.f32 %v10349_v50, %v3045_v63  ;;  %v11837_v14 = vpop.xlane.xlu0 %3774  ;;  %9601 = vmatprep.subr.msk.mxu1 %vm1029_vm5, %v11395_v16  ;;  %v3342_v50 = vmul.f32 %v11546_v17, %v11806_v30  ;;  %v3341_v63 = vmul.f32 %v11546_v17, %v11808_v20  ;;  %v3751_v20 = vcvt.f32.s32 %v11825_v9 }
 0x8a3   : > { %vm3776_vm3 = vcmp.eq.f32.partialorder %v11790_v15, %v11837_v14  ;;  %v3061_v40 = vmax.f32 %v10348_v13, 0.0  ;;  %v3757_v15 = vcvt.s32.f32 %v3755_v49  ;;  %v3344_v49 = vmul.f32 %v11546_v17, %v11815_v4 }
 0x8a4   : > { %v3060_v34 = vmax.f32 %v10350_v53, 0.0  ;;  %v3730_v58 = vpop.xlane.xlu1 %3729  ;;  %v3777_v21 = vsel %vm3776_vm3, %v3772_v39, inf }
 0x8a5   : > { %3778 = vmin.xlane.f32.xlu0 %v3777_v21  ;;  %vm3731_vm4 = vcmp.eq.f32.partialorder %v11796_v56, %v3730_v58  ;;  %v3736_v37 = vcvt.f32.s32 %v3730_v58 }
 0x8a6   : > { %9590 = vmatprep.mubr.msk.f32.mxu1 %vm1821_vm12, %v3060_v34  ;;  %v3732_v52 = vsel %vm3731_vm4, %v3727_v62, inf }
 0x8a7   : > { %3733 = vmin.xlane.f32.xlu1 %v3732_v52  ;;  %9591 = vmatmul.mubr.msk.f32.gmra.mrb[26].mxu1 %vm1821_vm12, %v3061_v40  ;;  %v3737_v39 = vshll.u32 %v3736_v37, 16 }
 0x8a8   : > { %v11847_v23 = vpop.xlane.xlu1 %3759  ;;  %9595 = vmatprep.mubr.msk.f32.mxu1 %vm1020_vm6, %v11658_v11 }
 0x8a9   : > { %vm3761_vm7 = vcmp.eq.f32.partialorder %v11803_v59, %v11847_v23 }
 0x8aa   : > { %v3762_v57 = vsel %vm3761_vm7, %v3757_v15, inf }
 0x8ab   : > { %3763 = vmin.xlane.f32.xlu1 %v3762_v57  ;;  %9596 = vmatmul.mubr.msk.f32.vlgmr.msra.gmra.mrb[28].mxu1 %vm1020_vm6, %v11654_v1  ;;  %v3343_v57 = vmul.f32 %v11546_v17, %v11818_v51  ;;  %v3752_v17 = vshll.u32 %v3751_v20, 16  ;;  %v3781_v51 = vcvt.f32.s32 %v11837_v14 }
 0x8ac   : > { %9602 = vmatpush3.msk.msra.mxu1 %vm1029_vm5, %v11395_v16  ;;  %9598 = vmatprep.mubr.msk.f32.mxu1 %vm1020_vm6, %v11670_v6  ;;  %v11876_v16 = vld [vmem:[%s13724_s29] sm:$0x7] }
 0x8ad   : > { %10164 = vmatprep.subr.bf16.mxu1 %v11487_v24  ;;  %v3782_v14 = vshll.u32 %v3781_v51, 16 }
 0x8af   : > { %9599 = vmatmul.mubr.msk.f32.gmra.mrb[30].mxu1 %vm1020_vm6, %v11666_v2 }
 0x8b0   : > { %9603 = vmatprep.mubr.msk.f32.mxu1 %vm1020_vm6, %v11678_v42 }
 0x8b3   : > { %9604 = vmatmul.mubr.msk.f32.vlgmr.msra.gmra.mrb[28].mxu1 %vm1020_vm6, %v11693_v8 }
 0x8b4   : > { %9606 = vmatprep.mubr.msk.f32.mxu1 %vm1020_vm6, %v11700_v60  ;;  %10166 = vmatpush3.bf16.msra.mxu1 %v11487_v24 }
 0x8b5   : > { %10168 = vmatprep.subr.bf16.mxu1 %v11583_v38 }
 0x8b7   : > { %9607 = vmatmul.mubr.msk.f32.gmra.mrb[30].mxu1 %vm1020_vm6, %v11714_v61 }
 0x8b8   : > { %10170 = vmatpush3.bf16.msra.mxu1 %v11583_v38 }
 0x8b9   : > { %9669 = vmatprep.subr.msk.mxu1 %vm1029_vm5, %v11876_v16 }
 0x92e   : > { %v3749_v34 = vpop.xlane.xlu0 %3748 }
 0x92f   : > { %v3750_v4 = vcvt.f32.s32 %v3749_v34 }
 0x932   : > { %v3779_v37 = vpop.xlane.xlu0 %3778 }
 0x973   : > { %v9589_v59 = vpop.f32.mrb[24].mxu1 }
 0x974   : > { %v11881_v1 = vadd.f32 %v9589_v59, %v11494_v26  ;;  %v3140_v11 = vpop.f32.mrb[25].mxu1 }
 0x975   : > { %v11884_v2 = vadd.f32 %v11494_v26, %v3140_v11 }
 0x976   : > { %v13610_v42 = vmax.f32 %v11881_v1, 0.0 }
 0x977   : > { %v13609_v6 = vmax.f32 %v11884_v2, 0.0 }
 0x979   : > { %9617 = vmatprep.mubr.msk.f32.mxu0 %vm2136_vm8, %v13609_v6 }
 0x97a   : > { %v9592_v8 = vpop.f32.mrb[26].mxu1  ;;  %9618 = vmatmul.mubr.msk.f32.vlgmr.msra.gmra.mrb[16].mxu0 %vm2136_vm8, %v13610_v42 }
 0x97b   : > { %v11895_v60 = vadd.f32 %v9592_v8, %v11494_v26  ;;  %v3150_v61 = vpop.f32.mrb[27].mxu1  ;;  %10158 = vmatpush3.bf16.msra.mxu0 %v11478_v47 }
 0x97c   : > { %v11899_v56 = vadd.f32 %v11494_v26, %v3150_v61  ;;  %10160 = vmatprep.subr.bf16.mxu0 %v11510_v54  ;;  %v3734_v26 = vpop.xlane.xlu1 %3733  ;;  %v3766_v61 = vcvt.f32.s32 %v11847_v23 }
 0x97d   : > { %v13608_v27 = vmax.f32 %v11895_v60, 0.0  ;;  %v3735_v44 = vcvt.f32.s32 %v3734_v26 }
 0x97e   : > { %v13607_v10 = vmax.f32 %v11899_v56, 0.0  ;;  %v3767_v23 = vshll.u32 %v3766_v61, 16 }
 0x97f   : > { %10162 = vmatpush3.bf16.msra.mxu0 %v11510_v54  ;;  %v11921_v52 = vadd.s32 %v3737_v39, %v3735_v44  ;;  %v13749_v44 = vmov 0.0  }
 0x980   : > { %9620 = vmatprep.mubr.msk.f32.mxu0 %vm2136_vm8, %v13607_v10  ;;  %10172 = vmatprep.subr.bf16.mxu0 %v11100_v29  ;;  %v3764_v59 = vpop.xlane.xlu1 %3763 }
 0x981   : > { %9621 = vmatmul.mubr.msk.f32.gmra.mrb[18].mxu0 %vm2136_vm8, %v13608_v27  ;;  %vm3784_vm9 = vcmp.eq.s32.totalorder %v11082_v0, %v11921_v52 }
 0x986   : > { %v9605_v5 = vpop.f32.mrb[28].mxu1 }
 0x987   : > { %v10351_v19 = vadd.f32 %v9605_v5, %v11541_v7  ;;  %v3318_v12 = vpop.f32.mrb[29].mxu1  ;;  %v3765_v5 = vcvt.f32.s32 %v3764_v59 }
 0x988   : > { %v10352_v13 = vadd.f32 %v3318_v12, %v11549_v48  ;;  %v3780_v12 = vcvt.f32.s32 %v3779_v37 }
 0x989   : > { %v3346_v53 = vadd.f32 %v10351_v19, %v3342_v50  ;;  %v11936_v50 = vadd.s32 %v3752_v17, %v3750_v4  ;;  %v11992_v4 = vld [vmem:[%s13725_s3] sm:$0x7] }
 0x98a   : > { %v3345_v21 = vadd.f32 %v10352_v13, %v3341_v63  ;;  %v9608_v62 = vpop.f32.mrb[30].mxu1  ;;  %v8802_v13 = vsel %vm3784_vm9, 1.0, %v13749_v44  ;;  %v11943_v63 = vadd.s32 %v3767_v23, %v3765_v5  ;;  %13750 = vst [vmem:[#allocation36_spill] sm:$0xff] %v11992_v4  ;;  %v12019_v17 = vld [vmem:[%s13565_s9] sm:$0xff] }
 0x98b   : > { %v10353_v58 = vadd.f32 %v9608_v62, %v11558_v45  ;;  %v3328_v40 = vpop.f32.mrb[31].mxu1  ;;  %v3350_v11 = vmax.f32 %v3346_v53, 0.0  ;;  %vm3785_vm10 = vcmp.eq.s32.totalorder %v11082_v0, %v11936_v50  ;;  %v11950_v53 = vadd.s32 %v3782_v14, %v3780_v12  ;;  %13751 = vst [vmem:[#allocation37_spill] sm:$0xff] %v12019_v17 }
 0x98c   : > { %v3349_v30 = vmax.f32 %v3345_v21, 0.0  ;;  %v10354_v15 = vadd.f32 %v3328_v40, %v11561_v18  ;;  %vm3786_vm13 = vcmp.eq.s32.totalorder %v11082_v0, %v11943_v63  ;;  %v8803_v39 = vsel %vm3785_vm10, 1.0, %v13749_v44  ;;  %v11972_v21 = vld [vmem:[%s13570_s14] sm:$0x7] }
 0x98d   : > { %v3348_v8 = vadd.f32 %v10353_v58, %v3344_v49  ;;  %v8804_v34 = vsel %vm3786_vm13, 1.0, %v13749_v44  ;;  %vm3787_vm14 = vcmp.eq.s32.totalorder %v11082_v0, %v11950_v53  ;;  %v13758_v53 = vld [vmem:[#allocation35_spill] sm:$0xff] }
 0x98e   : > { %v3347_v26 = vadd.f32 %v10354_v15, %v3343_v57  ;;  %9631 = vmatprep.mubr.msk.f32.mxu0 %vm2136_vm8, %v3349_v30  ;;  %v8805_v62 = vsel %vm3787_vm14, 1.0, %v13749_v44 }
 0x98f   : > { %9632 = vmatmul.mubr.msk.f32.vlgmr.msra.gmra.mrb[16].mxu0 %vm2136_vm8, %v3350_v11  ;;  %v3352_v9 = vmax.f32 %v3348_v8, 0.0 }
 0x990   : > { %v3351_v19 = vmax.f32 %v3347_v26, 0.0  ;;  %10174 = vmatpush3.bf16.msra.mxu0 %v11100_v29 }
 0x991   : > { %10176 = vmatprep.subr.bf16.mxu0 %v11105_v31 }
 0x992   : > { %9634 = vmatprep.mubr.msk.f32.mxu0 %vm2136_vm8, %v3351_v19 }
 0x993   : > { %9635 = vmatmul.mubr.msk.f32.gmra.mrb[18].mxu0 %vm2136_vm8, %v3352_v9 }
 0x994   : > { %10178 = vmatpush3.bf16.msra.mxu0 %v11105_v31  ;;  %9663 = vmatprep.mubr.msk.f32.mxu0 %vm1225_vm0, %v8802_v13 }
 0x995   : > { %10180 = vmatprep.subr.bf16.mxu0 %v11117_v35 }
 0x998   : > { %10182 = vmatpush3.bf16.msra.mxu0 %v11117_v35 }
 0x999   : > { %10184 = vmatprep.subr.bf16.mxu0 %v11332_v28 }
 0x99b   : > { %9664 = vmatmul.mubr.msk.f32.vlgmr.msra.gmra.mrb[20].mxu0 %vm1225_vm0, %v8803_v39  ;;  %v13752_v39 = vld [vmem:[#allocation32_spill] sm:$0xff] }
 0x99c   : > { %9666 = vmatprep.mubr.msk.f32.mxu0 %vm1225_vm0, %v8804_v34  ;;  %10186 = vmatpush3.bf16.msra.mxu0 %v11332_v28  ;;  %v12069_v34 = vsel %vm3785_vm10, inf, %v13752_v39 }
 0x99d   : > { %9703 = vmatprep.subr.msk.mxu0 %vm1029_vm5, %v11972_v21  ;;  %13753 = vst [vmem:[#allocation32_spill] sm:$0xff] %v12069_v34 }
 0x99f   : > { %9667 = vmatmul.mubr.msk.f32.gmra.mrb[22].mxu0 %vm1225_vm0, %v8805_v62 }
 0xa62   : > { %v9633_v58 = vpop.f32.mrb[16].mxu0 }
 0xa63   : > { %v3548_v49 = vadd.f32 %v9633_v58, %v11592_v43  ;;  %v3528_v40 = vpop.f32.mrb[17].mxu0  ;;  %v4913_v58 = vsel %vm1225_vm0, %v12069_v34, inf }
 0xa64   : > { %v3547_v30 = vadd.f32 %v11592_v43, %v3528_v40 }
 0xa65   : > { %v3552_v20 = vmax.f32 %v3548_v49, 0.0  ;;  %v13754_v49 = vld [vmem:[#allocation33_spill] sm:$0xff] }
 0xa66   : > { %v3551_v15 = vmax.f32 %v3547_v30, 0.0  ;;  %v9636_v57 = vpop.f32.mrb[18].mxu0  ;;  %v12079_v40 = vsel %vm3787_vm14, inf, %v13754_v49 }
 0xa67   : > { %v3550_v59 = vadd.f32 %v9636_v57, %v11592_v43  ;;  %v3538_v11 = vpop.f32.mrb[19].mxu0  ;;  %13755 = vst [vmem:[#allocation33_spill] sm:$0xff] %v12079_v40  ;;  %v4919_v57 = vsel %vm1225_vm0, %v12079_v40, inf }
 0xa68   : > { %v3549_v8 = vadd.f32 %v11592_v43, %v3538_v11  ;;  %9645 = vmatprep.mubr.msk.f32.mxu1 %vm2136_vm8, %v3551_v15  ;;  %v13756_v15 = vld [vmem:[#allocation34_spill] sm:$0xff] }
 0xa69   : > { %9646 = vmatmul.mubr.msk.f32.vlgmr.msra.gmra.mrb[32].mxu1 %vm2136_vm8, %v3552_v20  ;;  %v3554_v26 = vmax.f32 %v3550_v59, 0.0  ;;  %v12086_v50 = vsel %vm3784_vm9, inf, %v13756_v15  ;;  %v12096_v59 = vsel %vm3786_vm13, inf, %v13758_v53 }
 0xa6a   : > { %v3553_v61 = vmax.f32 %v3549_v8, 0.0  ;;  %9670 = vmatpush3.msk.msra.mxu1 %vm1029_vm5, %v11876_v16  ;;  %13757 = vst [vmem:[#allocation34_spill] sm:$0xff] %v12086_v50  ;;  %v4910_v20 = vsel %vm1225_vm0, %v12086_v50, inf  ;;  %13759 = vst [vmem:[#allocation35_spill] sm:$0xff] %v12096_v59  ;;  %v4916_v11 = vsel %vm1225_vm0, %v12096_v59, inf }
 0xa6b   : > { %9677 = vmatprep.subr.msk.mxu1 %vm1029_vm5, %v11992_v4 }
 0xa6c   : > { %9648 = vmatprep.mubr.msk.f32.mxu1 %vm2136_vm8, %v3553_v61 }
 0xa6d   : > { %9649 = vmatmul.mubr.msk.f32.gmra.mrb[34].mxu1 %vm2136_vm8, %v3554_v26  ;;  %v13760_v26 = vld [vmem:[#allocation17_spill] sm:$0xff] }
 0xa6e   : > { %v11998_v43 = vpop.f32.mrb[20].mxu0 }
 0xa6f   : > { %4161 = vrot.lane.b32.xlu0 %v11998_v43, %s13744_s24  ;;  %v12002_v37 = vpop.f32.mrb[21].mxu0  ;;  %v12036_v9 = vsub.f32 %v11998_v43, %v11689_v36 }
 0xa70   : > { %4159 = vrot.lane.b32.xlu1 %v12002_v37, %s13744_s24  ;;  %9671 = vmatprep.mubr.msk.f32.mxu1 %vm1020_vm6, %v12002_v37  ;;  %v12024_v51 = vsub.f32 %v12002_v37, %v11674_v33 }
 0xa71   : > { %9672 = vmatmul.mubr.msk.f32.vlgmr.msra.gmra.mrb[36].mxu1 %vm1020_vm6, %v11998_v43  ;;  %v3902_v62 = vmul.f32 %v12036_v9, %v12036_v9 }
 0xa72   : > { %v12010_v5 = vpop.f32.mrb[22].mxu0  ;;  %9678 = vmatpush3.msk.msra.mxu1 %vm1029_vm5, %v11992_v4  ;;  %v3901_v36 = vmul.f32 %v12024_v51, %v12024_v51 }
 0xa73   : > { %v12014_v19 = vpop.f32.mrb[23].mxu0  ;;  %9685 = vmatprep.subr.mxu1 %v12019_v17  ;;  %v12051_v23 = vsub.f32 %v12010_v5, %v11710_v32  ;;  %v3908_v30 = vsel %vm1020_vm6, %v3902_v62, 0.0  ;;  %v12124_v62 = vld [vmem:[%s13578_s22] ss:$0 sm:$0xff] }
 0xa74   : > { %4163 = vrot.lane.b32.xlu1 %v12014_v19, %s13744_s24  ;;  %9674 = vmatprep.mubr.msk.f32.mxu1 %vm1020_vm6, %v12014_v19  ;;  %v12040_v33 = vsub.f32 %v12014_v19, %v11696_v3  ;;  %v3905_v3 = vsel %vm1020_vm6, %v3901_v36, 0.0  ;;  %13761 = vst [vmem:[#allocation38_spill] sm:$0xff] %v12124_v62 }
 0xa75   : > { %9675 = vmatmul.mubr.msk.f32.gmra.mrb[38].mxu1 %vm1020_vm6, %v12010_v5  ;;  %v3904_v32 = vmul.f32 %v12051_v23, %v12051_v23 }
 0xa76   : > { %9679 = vmatprep.mubr.msk.f32.mxu1 %vm1020_vm6, %v12024_v51  ;;  %v3903_v12 = vmul.f32 %v12040_v33, %v12040_v33 }
 0xa77   : > { %v3914_v14 = vsel %vm1020_vm6, %v3904_v32, 0.0 }
 0xa78   : > { %4165 = vrot.lane.b32.xlu1 %v12010_v5, %s13744_s24  ;;  %v3911_v13 = vsel %vm1020_vm6, %v3903_v12, 0.0 }
 0xa79   : > { %9680 = vmatmul.mubr.msk.f32.vlgmr.msra.gmra.mrb[36].mxu1 %vm1020_vm6, %v12036_v9 }
 0xa7a   : > { %9682 = vmatprep.mubr.msk.f32.mxu1 %vm1020_vm6, %v12040_v33  ;;  %9686 = vmatpush3.msra.mxu1 %v12019_v17 }
 0xa7b   : > { %10188 = vmatprep.subr.bf16.mxu1 %v11458_v41 }
 0xa7d   : > { %9683 = vmatmul.mubr.msk.f32.gmra.mrb[38].mxu1 %vm1020_vm6, %v12051_v23 }
 0xa8e   : > { %3906 = vadd.xlane.f32.xlu0 %v3905_v3 }
 0xa92   : > { %3912 = vadd.xlane.f32.xlu0 %v3911_v13 }
 0xa96   : > { %3915 = vadd.xlane.f32.xlu0 %v3914_v14 }
 0xa9a   : > { %4914 = vmin.xlane.f32.xlu0 %v4913_v58 }
 0xa9c   : > { %3909 = vadd.xlane.f32.xlu1 %v3908_v30 }
 0xa9e   : > { %4920 = vmin.xlane.f32.xlu0 %v4919_v57 }
 0xaa0   : > { %4911 = vmin.xlane.f32.xlu1 %v4910_v20  ;;  %v13762_v20 = vld [vmem:[#allocation28_spill] sm:$0xff] }
 0xaa1   : > { %v2441_v53 = vadd.f32 %v13762_v20, %v12124_v62 }
 0xaa4   : > { %4917 = vmin.xlane.f32.xlu1 %v4916_v11 }
 0xae1   : > { %v4162_v8 = vpop.permute.xlu0 %4161 }
 0xae2   : > { %v4160_v52 = vpop.permute.xlu1 %4159 }
 0xae3   : > { %9687 = vmatprep.mubr.msk.f32.mxu1 %vm922_vm11, %v4160_v52 }
 0xae4   : > { %9688 = vmatmul.mubr.msk.f32.vlgmr.msra.gmra.mrb[36].mxu1 %vm922_vm11, %v4162_v8 }
 0xae5   : > { %10190 = vmatpush3.bf16.msra.mxu1 %v11458_v41 }
 0xae6   : > { %v4164_v61 = vpop.permute.xlu1 %4163  ;;  %10192 = vmatprep.subr.bf16.mxu1 %v13760_v26 }
 0xae7   : > { %9690 = vmatprep.mubr.msk.f32.mxu1 %vm922_vm11, %v4164_v61  ;;  %v13763_v61 = vld [vmem:[#allocation29_spill] sm:$0xff] }
 0xae9   : > { %10194 = vmatpush3.bf16.msra.mxu1 %v13760_v26 }
 0xaea   : > { %v4166_v63 = vpop.permute.xlu1 %4165  ;;  %10196 = vmatprep.subr.bf16.mxu1 %v11478_v47 }
 0xaeb   : > { %9691 = vmatmul.mubr.msk.f32.gmra.mrb[38].mxu1 %vm922_vm11, %v4166_v63  ;;  %v2436_v63 = vadd.f32 %v12124_v62, %v13763_v61 }
 0xaed   : > { %v2454_v61 = vmax.f32 %v2436_v63, 0.0 }
 0xb1b   : > { %v12108_v36 = vpop.xlane.xlu0 %3906 }
 0xb1f   : > { %v12110_v3 = vpop.xlane.xlu0 %3912 }
 0xb23   : > { %v12112_v12 = vpop.xlane.xlu0 %3915 }
 0xb27   : > { %v4915_v13 = vpop.xlane.xlu0 %4914 }
 0xb28   : > { %vm4923_vm15 = vcmp.eq.f32.partialorder %v12069_v34, %v4915_v13 }
 0xb29   : > { %v4927_v32 = vsel %vm4923_vm15, %v11082_v0, 48  ;;  %v12116_v14 = vpop.xlane.xlu1 %3909 }
 0xb2a   : > { %v12119_v39 = vsel %vm1225_vm0, %v4927_v32, 2147483647 }
 0xb2b   : > { %v4921_v58 = vpop.xlane.xlu0 %4920  ;;  %v4947_v49 = vshra.s32 %v12119_v39, 16 }
 0xb2c   : > { %vm4925_vm1 = vcmp.eq.f32.partialorder %v12079_v40, %v4921_v58 }
 0xb2d   : > { %v4929_v30 = vsel %vm4925_vm1, %v11082_v0, 48  ;;  %v4912_v15 = vpop.xlane.xlu1 %4911  ;;  %v12129_v57 = vcvt.s32.f32 %v4947_v49 }
 0xb2e   : > { %v12134_v11 = vsel %vm1225_vm0, %v4929_v30, 2147483647  ;;  %vm4922_vm2 = vcmp.eq.f32.partialorder %v12086_v50, %v4912_v15  ;;  %v2455_v30 = vmax.f32 %v2441_v53, 0.0  ;;  %v13764_v15 = vld [vmem:[#allocation30_spill] sm:$0xff] }
 0xb2f   : > { %v4926_v52 = vsel %vm4922_vm2, %v11082_v0, 48  ;;  %4950 = vmin.xlane.f32.xlu0 %v12129_v57  ;;  %v4977_v8 = vshra.s32 %v12134_v11, 16  ;;  %v2451_v20 = vadd.f32 %v13764_v15, %v12124_v62 }
 0xb30   : > { %v12143_v13 = vsel %vm1225_vm0, %v4926_v52, 2147483647  ;;  %v13765_v52 = vld [vmem:[#allocation31_spill] sm:$0xff]  ;;  %v2459_v15 = vsub.f32 -inf, %v2455_v30 }
 0xb31   : > { %v4918_v32 = vpop.xlane.xlu1 %4917  ;;  %v12145_v58 = vcvt.s32.f32 %v4977_v8  ;;  %v4932_v49 = vshra.s32 %v12143_v13, 16  ;;  %v2446_v6 = vadd.f32 %v12124_v62, %v13765_v52  ;;  %v2457_v42 = vmax.f32 %v2451_v20, 0.0 }
 0xb32   : > { %vm4924_vm3 = vcmp.eq.f32.partialorder %v12096_v59, %v4918_v32  ;;  %v2471_v32 = vsub.f32 %v2455_v30, %v2455_v30  ;;  %v2458_v59 = vsub.f32 -inf, %v2454_v61  ;;  %v2464_v63 = vmul.f32 1.442695, %v2459_v15 }
 0xb33   : > { %v4928_v10 = vsel %vm4924_vm3, %v11082_v0, 48  ;;  %4980 = vmin.xlane.f32.xlu0 %v12145_v58  ;;  %v12153_v27 = vcvt.s32.f32 %v4932_v49  ;;  %v2456_v50 = vmax.f32 %v2446_v6, 0.0  ;;  %v2470_v49 = vsub.f32 %v2454_v61, %v2454_v61 }
 0xb34   : > { %v12158_v8 = vsel %vm1225_vm0, %v4928_v10, 2147483647  ;;  %v2461_v40 = vsub.f32 -inf, %v2457_v42  ;;  %v2476_v52 = vmul.f32 1.442695, %v2471_v32  ;;  %v2473_v34 = vsub.f32 %v2457_v42, %v2457_v42 }
 0xb35   : > { %4935 = vmin.xlane.f32.xlu1 %v12153_v27  ;;  %v4962_v53 = vshra.s32 %v12158_v8, 16  ;;  %v2462_v10 = vmul.f32 1.442695, %v2458_v59  ;;  %v2460_v41 = vsub.f32 -inf, %v2456_v50  ;;  %v2474_v4 = vmul.f32 1.442695, %v2470_v49 }
 0xb36   : > { %v2472_v28 = vsub.f32 %v2456_v50, %v2456_v50  ;;  %10591 = vpow2.f32 %v2464_v63  ;;  %v2480_v6 = vmul.f32 1.442695, %v2473_v34 }
 0xb37   : > { %v12162_v26 = vcvt.s32.f32 %v4962_v53  ;;  %v2468_v53 = vmul.f32 1.442695, %v2461_v40  ;;  %10593 = vpow2.f32 %v2476_v52  ;;  %v2466_v15 = vmul.f32 1.442695, %v2460_v41 }
 0xb38   : > { %10595 = vpow2.f32 %v2462_v10  ;;  %v2478_v59 = vmul.f32 1.442695, %v2472_v28 }
 0xb39   : > { %4965 = vmin.xlane.f32.xlu1 %v12162_v26  ;;  %10597 = vpow2.f32 %v2474_v4 }
 0xb3a   : > { %10599 = vpow2.f32 %v2468_v53 }
 0xb3b   : > { %10601 = vpow2.f32 %v2480_v6 }
 0xb3c   : > { %v9647_v17 = vpop.f32.mrb[32].mxu1  ;;  %10603 = vpow2.f32 %v2466_v15 }
 0xb3d   : > { %v3639_v35 = vadd.f32 %v9647_v17, %v12124_v62  ;;  %v3633_v20 = vpop.f32.mrb[33].mxu1  ;;  %10605 = vpow2.f32 %v2478_v59 }
 0xb3e   : > { %v3634_v44 = vadd.f32 %v12124_v62, %v3633_v20 }
 0xb3f   : > { %v3653_v31 = vmax.f32 %v3639_v35, 0.0 }
 0xb40   : > { %v3652_v0 = vmax.f32 %v3634_v44, 0.0  ;;  %v9650_v32 = vpop.f32.mrb[34].mxu1  ;;  %v10592_v6 = vpop.eup %10591 }
 0xb41   : > { %v12167_v18 = vmax.f32 %v2455_v30, %v3653_v31  ;;  %v3649_v49 = vadd.f32 %v9650_v32, %v12124_v62  ;;  %v3643_v45 = vpop.f32.mrb[35].mxu1  ;;  %v10594_v15 = vpop.eup %10593 }
 0xb42   : > { %v12170_v17 = vmax.f32 %v2454_v61, %v3652_v0  ;;  %v3644_v40 = vadd.f32 %v12124_v62, %v3643_v45  ;;  %v13776_v62 = vld [vmem:[#allocation23_spill] sm:$0xff] }
 0xb43   : > { %13766 = vst [vmem:[#allocation28_spill] sm:$0xff] %v12167_v18  ;;  %v3661_v34 = vsub.f32 %v2455_v30, %v12167_v18  ;;  %v3673_v35 = vsub.f32 %v3653_v31, %v12167_v18  ;;  %v3655_v41 = vmax.f32 %v3649_v49, 0.0  ;;  %v10596_v49 = vpop.eup %10595 }
 0xb44   : > { %13767 = vst [vmem:[#allocation29_spill] sm:$0xff] %v12170_v17  ;;  %v3660_v44 = vsub.f32 %v2454_v61, %v12170_v17  ;;  %v3672_v28 = vsub.f32 %v3652_v0, %v12170_v17  ;;  %v3654_v4 = vmax.f32 %v3644_v40, 0.0 }
 0xb45   : > { %v3666_v63 = vmul.f32 1.442695, %v3661_v34  ;;  %v3678_v52 = vmul.f32 1.442695, %v3673_v35  ;;  %v12177_v10 = vmax.f32 %v2457_v42, %v3655_v41  ;;  %v10598_v35 = vpop.eup %10597 }
 0xb46   : > { %v3664_v20 = vmul.f32 1.442695, %v3660_v44  ;;  %v3676_v53 = vmul.f32 1.442695, %v3672_v28  ;;  %v12179_v45 = vmax.f32 %v2456_v50, %v3654_v4  ;;  %v10600_v44 = vpop.eup %10599  ;;  %v13770_v28 = vld [vmem:[#allocation19_spill] sm:$0xff] }
 0xb47   : > { %13768 = vst [vmem:[#allocation30_spill] sm:$0xff] %v12177_v10  ;;  %10607 = vpow2.f32 %v3666_v63  ;;  %v3663_v30 = vsub.f32 %v2457_v42, %v12177_v10  ;;  %v3675_v31 = vsub.f32 %v3655_v41, %v12177_v10  ;;  %v2483_v42 = vmul.f32 0.0, %v10592_v6  ;;  %v13774_v10 = vld [vmem:[#allocation22_spill] sm:$0xff] }
 0xb48   : > { %13769 = vst [vmem:[#allocation31_spill] sm:$0xff] %v12179_v45  ;;  %10609 = vpow2.f32 %v3678_v52  ;;  %v3662_v61 = vsub.f32 %v2456_v50, %v12179_v45  ;;  %v3674_v0 = vsub.f32 %v3654_v4, %v12179_v45  ;;  %v13771_v41 = vmax.f32 %v13770_v28, 0.0  ;;  %v10602_v52 = vpop.eup %10601  ;;  %v13772_v45 = vld [vmem:[#allocation20_spill] sm:$0xff] }
 0xb49   : > { %10611 = vpow2.f32 %v3664_v20  ;;  %v3670_v32 = vmul.f32 1.442695, %v3663_v30  ;;  %v3682_v59 = vmul.f32 1.442695, %v3675_v31  ;;  %v2482_v50 = vmul.f32 0.0, %v10596_v49  ;;  %v10604_v4 = vpop.eup %10603 }
 0xb4a   : > { %10613 = vpow2.f32 %v3676_v53  ;;  %v3668_v40 = vmul.f32 1.442695, %v3662_v61  ;;  %v3680_v34 = vmul.f32 1.442695, %v3674_v0  ;;  %v2491_v63 = vmul.f32 %v10594_v15, %v13771_v41  ;;  %v10606_v31 = vpop.eup %10605 }
 0xb4b   : > { %10615 = vpow2.f32 %v3670_v32  ;;  %v13773_v20 = vmax.f32 %v13772_v45, 0.0  ;;  %v2485_v53 = vmul.f32 0.0, %v10600_v44  ;;  %v2487_v61 = vadd.f32 %v10594_v15, %v2483_v42 }
 0xb4c   : > { %10617 = vpow2.f32 %v3682_v59  ;;  %v2495_v0 = vadd.f32 %v2491_v63, %v2483_v42  ;;  %v13775_v32 = vmax.f32 %v13774_v10, 0.0  ;;  %v2486_v18 = vadd.f32 %v10598_v35, %v2482_v50 }
 0xb4d   : > { %10619 = vpow2.f32 %v3668_v40  ;;  %v2490_v30 = vmul.f32 %v10598_v35, %v13773_v20  ;;  %v2484_v28 = vmul.f32 0.0, %v10604_v4  ;;  %v13777_v49 = vmax.f32 %v13776_v62, 0.0 }
 0xb4e   : > { %10621 = vpow2.f32 %v3680_v34  ;;  %v2493_v17 = vmul.f32 %v10602_v52, %v13775_v32  ;;  %v2489_v20 = vadd.f32 %v10602_v52, %v2485_v53  ;;  %v13778_v34 = vmax.f32 %v11881_v1, 0.0 }
 0xb4f   : > { %v2494_v59 = vadd.f32 %v2490_v30, %v2482_v50  ;;  %v2492_v40 = vmul.f32 %v10606_v31, %v13777_v49  ;;  %v2488_v4 = vadd.f32 %v10606_v31, %v2484_v28  ;;  %v13779_v62 = vmax.f32 %v11884_v2, 0.0 }
 0xb50   : > { %v2497_v42 = vadd.f32 %v2493_v17, %v2485_v53  ;;  %v13781_v2 = vmax.f32 %v11899_v56, 0.0 }
 0xb51   : > { %v10608_v6 = vpop.eup %10607 }
 0xb52   : > { %v10610_v41 = vpop.eup %10609  ;;  %v3685_v48 = vmul.f32 %v10608_v6, %v2487_v61  ;;  %v3693_v7 = vmul.f32 %v10608_v6, %v2495_v0  ;;  %v2496_v61 = vadd.f32 %v2492_v40, %v2484_v28 }
 0xb53   : > { %v10612_v45 = vpop.eup %10611  ;;  %v3697_v44 = vmul.f32 %v10610_v41, %v13778_v34  ;;  %v3919_v34 = vadd.f32 1e-20, %v12110_v3 }
 0xb54   : > { %v10614_v15 = vpop.eup %10613  ;;  %v12195_v63 = vadd.f32 %v10610_v41, %v3685_v48  ;;  %v3684_v10 = vmul.f32 %v10612_v45, %v2486_v18  ;;  %v3692_v32 = vmul.f32 %v10612_v45, %v2494_v59  ;;  %v13780_v48 = vmax.f32 %v11895_v60, 0.0 }
 0xb55   : > { %v10616_v35 = vpop.eup %10615  ;;  %v12197_v29 = vadd.f32 %v3697_v44, %v3693_v7  ;;  %v3696_v50 = vmul.f32 %v10614_v15, %v13779_v62  ;;  %v3918_v45 = vadd.f32 1e-20, %v12116_v14  ;;  %v3920_v60 = vadd.f32 1e-20, %v12112_v12 }
 0xb56   : > { %v10618_v30 = vpop.eup %10617  ;;  %v12201_v0 = vadd.f32 %v10614_v15, %v3684_v10  ;;  %v3687_v52 = vmul.f32 %v10616_v35, %v2489_v20  ;;  %v3695_v1 = vmul.f32 %v10616_v35, %v2497_v42  ;;  %v3917_v20 = vadd.f32 1e-20, %v12108_v36 }
 0xb57   : > { %v10620_v6 = vpop.eup %10619  ;;  %v12203_v49 = vadd.f32 %v3696_v50, %v3692_v32  ;;  %v3699_v18 = vmul.f32 %v10618_v30, %v13780_v48  ;;  %10623 = vrsqrt.f32 %v3918_v45  ;;  %vm3930_vm4 = vcmp.eq.f32.partialorder %v3918_v45, inf }
 0xb58   : > { %v10622_v17 = vpop.eup %10621  ;;  %v12207_v53 = vadd.f32 %v10618_v30, %v3687_v52  ;;  %v3686_v7 = vmul.f32 %v10620_v6, %v2488_v4  ;;  %v3694_v31 = vmul.f32 %v10620_v6, %v2496_v61  ;;  %10625 = vrsqrt.f32 %v3917_v20  ;;  %v12228_v30 = vld [vmem:[%s13727_s13] ss:$0 sm:$0xff] }
 0xb59   : > { %v12209_v41 = vadd.f32 %v3699_v18, %v3695_v1  ;;  %v3698_v28 = vmul.f32 %v10622_v17, %v13781_v2  ;;  %10627 = vrsqrt.f32 %v3920_v60  ;;  %vm3923_vm7 = vcmp.eq.f32.partialorder %v3917_v20, inf }
 0xb5a   : > { %v12213_v59 = vadd.f32 %v10622_v17, %v3686_v7  ;;  %10629 = vrsqrt.f32 %v3919_v34  ;;  %v3933_v14 = vand.u32 2147483648, %v3918_v45  ;;  %vm3932_vm9 = vcmp.eq.f32.partialorder %v3918_v45, 0.0 }
 0xb5b   : > { %v12215_v40 = vadd.f32 %v3698_v28, %v3694_v31  ;;  %v3926_v36 = vand.u32 2147483648, %v3917_v20  ;;  %vm3925_vm10 = vcmp.eq.f32.partialorder %v3917_v20, 0.0  ;;  %vm3944_vm13 = vcmp.eq.f32.partialorder %v3920_v60, inf }
 0xb5c   : > { %vm3937_vm14 = vcmp.eq.f32.partialorder %v3919_v34, inf  ;;  %v3947_v6 = vand.u32 2147483648, %v3920_v60  ;;  %vm3946_vm15 = vcmp.eq.f32.partialorder %v3920_v60, 0.0  ;;  %v3940_v18 = vand.u32 2147483648, %v3919_v34 }
 0xb5d   : > { %vm3939_vm1 = vcmp.eq.f32.partialorder %v3919_v34, 0.0 }
 0xb61   : > { %v10624_v44 = vpop.eup %10623 }
 0xb62   : > { %v10626_v15 = vpop.eup %10625  ;;  %v3929_v56 = vmul.f32 %v10624_v44, %v3918_v45  ;;  %v4946_v44 = vand.u32 65535, %v12119_v39 }
 0xb63   : > { %v3922_v42 = vmul.f32 %v10626_v15, %v3917_v20  ;;  %v10628_v10 = vpop.eup %10627 }
 0xb64   : > { %v3931_v32 = vsel %vm3930_vm4, %v3918_v45, %v3929_v56  ;;  %v10630_v35 = vpop.eup %10629  ;;  %v3943_v12 = vmul.f32 %v10628_v10, %v3920_v60 }
 0xb65   : > { %v3924_v4 = vsel %vm3923_vm7, %v3917_v20, %v3922_v42  ;;  %v12221_v62 = vsel %vm3932_vm9, %v3933_v14, %v3931_v32  ;;  %v3936_v50 = vmul.f32 %v10630_v35, %v3919_v34  ;;  %v4976_v35 = vand.u32 65535, %v12134_v11 }
 0xb66   : > { %v12223_v3 = vsel %vm3925_vm10, %v3926_v36, %v3924_v4  ;;  %v4152_v61 = vmul.f32 %v12228_v30, %v12221_v62  ;;  %v3945_v1 = vsel %vm3944_vm13, %v3920_v60, %v3943_v12  ;;  %v4931_v12 = vand.u32 65535, %v12143_v13 }
 0xb67   : > { %v4151_v52 = vmul.f32 %v12228_v30, %v12223_v3  ;;  %v3938_v48 = vsel %vm3937_vm14, %v3919_v34, %v3936_v50  ;;  %v12235_v7 = vsel %vm3946_vm15, %v3947_v6, %v3945_v1  ;;  %v4948_v34 = vcvt.s32.f32 %v4946_v44 }
 0xb68   : > { %v10355_v17 = vadd.f32 %v4152_v61, %v11374_v22  ;;  %v12238_v28 = vsel %vm3939_vm1, %v3940_v18, %v3938_v48  ;;  %v4154_v56 = vmul.f32 %v12228_v30, %v12235_v7  ;;  %v4978_v1 = vcvt.s32.f32 %v4976_v35  ;;  %v12341_v35 = vld [vmem:[%s13572_s16] ss:$0 sm:$0xff] }
 0xb69   : > { %v10357_v2 = vadd.f32 %v4151_v52, %v11379_v25  ;;  %v4153_v60 = vmul.f32 %v12228_v30, %v12238_v28  ;;  %v4933_v18 = vcvt.s32.f32 %v4931_v12  ;;  %13784 = vst [vmem:[#allocation19_spill] sm:$0xff] %v12341_v35 }
 0xb6a   : > { %v10359_v14 = vadd.f32 %v4154_v56, %v11411_v46 }
 0xb6b   : > { %v10361_v4 = vadd.f32 %v4153_v60, %v11416_v55 }
 0xbb7   : > { %v9689_v31 = vpop.f32.mrb[36].mxu1 }
 0xbb8   : > { %v10356_v45 = vadd.f32 %v10355_v17, %v9689_v31  ;;  %v4241_v20 = vpop.f32.mrb[37].mxu1  ;;  %v4961_v17 = vand.u32 65535, %v12158_v8 }
 0xbb9   : > { %v10358_v15 = vadd.f32 %v10357_v2, %v4241_v20 }
 0xbba   : > { %v4265_v10 = vmax.f32 %v10356_v45, 0.0 }
 0xbbb   : > { %v4264_v42 = vmax.f32 %v10358_v15, 0.0  ;;  %v13782_v15 = vld [vmem:[#allocation12_spill] sm:$0xff] }
 0xbbc   : > { %v12245_v32 = vpop.xlane.xlu0 %4950 }
 0xbbd   : > { %9697 = vmatprep.mubr.msk.f32.mxu0 %vm1821_vm12, %v4264_v42  ;;  %vm4952_vm2 = vcmp.eq.f32.partialorder %v12129_v57, %v12245_v32  ;;  %v12262_v57 = vld [vmem:[%s13571_s15] sm:$0x7] }
 0xbbe   : > { %v9692_v39 = vpop.f32.mrb[38].mxu1  ;;  %9698 = vmatmul.mubr.msk.f32.vlgmr.msra.gmra.mrb[24].mxu0 %vm1821_vm12, %v4265_v10  ;;  %v4953_v36 = vsel %vm4952_vm2, %v4948_v34, inf  ;;  %v13783_v10 = vld [vmem:[#allocation24_spill] sm:$0xff] }
 0xbbf   : > { %v10360_v50 = vadd.f32 %v10359_v14, %v9692_v39  ;;  %v4251_v61 = vpop.f32.mrb[39].mxu1  ;;  %4954 = vmin.xlane.f32.xlu0 %v4953_v36  ;;  %9704 = vmatpush3.msk.msra.mxu0 %vm1029_vm5, %v11972_v21  ;;  %v4548_v14 = vmul.f32 %v12341_v35, %v12221_v62  ;;  %v13785_v36 = vld [vmem:[#allocation25_spill] sm:$0xff] }
 0xbc0   : > { %v10362_v11 = vadd.f32 %v10361_v4, %v4251_v61  ;;  %v12257_v52 = vpop.xlane.xlu0 %4980  ;;  %9711 = vmatprep.subr.msk.mxu0 %vm1029_vm5, %v12262_v57 }
 0xbc1   : > { %vm4982_vm3 = vcmp.eq.f32.partialorder %v12145_v58, %v12257_v52  ;;  %v4267_v31 = vmax.f32 %v10360_v50, 0.0  ;;  %v4963_v58 = vcvt.s32.f32 %v4961_v17  ;;  %v4547_v50 = vmul.f32 %v12341_v35, %v12223_v3 }
 0xbc2   : > { %v4266_v13 = vmax.f32 %v10362_v11, 0.0  ;;  %v4936_v6 = vpop.xlane.xlu1 %4935  ;;  %v4983_v48 = vsel %vm4982_vm3, %v4978_v1, inf  ;;  %v4550_v17 = vmul.f32 %v12341_v35, %v12235_v7  ;;  %v4957_v3 = vcvt.f32.s32 %v12245_v32 }
 0xbc3   : > { %4984 = vmin.xlane.f32.xlu0 %v4983_v48  ;;  %vm4937_vm4 = vcmp.eq.f32.partialorder %v12153_v27, %v4936_v6  ;;  %v4942_v60 = vcvt.f32.s32 %v4936_v6  ;;  %v13786_v48 = vld [vmem:[#allocation26_spill] sm:$0xff] }
 0xbc4   : > { %9700 = vmatprep.mubr.msk.f32.mxu0 %vm1821_vm12, %v4266_v13  ;;  %v4938_v2 = vsel %vm4937_vm4, %v4933_v18, inf  ;;  %v4958_v32 = vshll.u32 %v4957_v3, 16  ;;  %v12409_v3 = vld [vmem:[%s13576_s20] ss:$0 sm:$0xff] }
 0xbc5   : > { %4939 = vmin.xlane.f32.xlu1 %v4938_v2  ;;  %9701 = vmatmul.mubr.msk.f32.gmra.mrb[26].mxu0 %vm1821_vm12, %v4267_v31  ;;  %v4943_v11 = vshll.u32 %v4942_v60, 16  ;;  %13793 = vst [vmem:[#allocation20_spill] sm:$0xff] %v12409_v3 }
 0xbc6   : > { %v12272_v45 = vpop.xlane.xlu1 %4965  ;;  %9705 = vmatprep.mubr.msk.f32.mxu0 %vm1020_vm6, %v12002_v37 }
 0xbc7   : > { %vm4967_vm7 = vcmp.eq.f32.partialorder %v12162_v26, %v12272_v45 }
 0xbc8   : > { %v4968_v8 = vsel %vm4967_vm7, %v4963_v58, inf  ;;  %v13787_v58 = vld [vmem:[#allocation27_spill] sm:$0xff] }
 0xbc9   : > { %4969 = vmin.xlane.f32.xlu1 %v4968_v8  ;;  %9706 = vmatmul.mubr.msk.f32.vlgmr.msra.gmra.mrb[28].mxu0 %vm1020_vm6, %v11998_v43  ;;  %v12303_v43 = vld [vmem:[%s13568_s12] ss:$0 sm:$0xff] }
 0xbca   : > { %9712 = vmatpush3.msk.msra.mxu0 %vm1029_vm5, %v12262_v57  ;;  %9708 = vmatprep.mubr.msk.f32.mxu0 %vm1020_vm6, %v12014_v19 }
 0xbcb   : > { %10204 = vmatprep.subr.bf16.mxu0 %v11487_v24 }
 0xbcd   : > { %9709 = vmatmul.mubr.msk.f32.gmra.mrb[30].mxu0 %vm1020_vm6, %v12010_v5 }
 0xbce   : > { %9713 = vmatprep.mubr.msk.f32.mxu0 %vm1020_vm6, %v12024_v51 }
 0xbd1   : > { %9714 = vmatmul.mubr.msk.f32.vlgmr.msra.gmra.mrb[28].mxu0 %vm1020_vm6, %v12036_v9 }
 0xbd2   : > { %9716 = vmatprep.mubr.msk.f32.mxu0 %vm1020_vm6, %v12040_v33  ;;  %10206 = vmatpush3.bf16.msra.mxu0 %v11487_v24 }
 0xbd3   : > { %10208 = vmatprep.subr.bf16.mxu0 %v11583_v38 }
 0xbd5   : > { %9717 = vmatmul.mubr.msk.f32.gmra.mrb[30].mxu0 %vm1020_vm6, %v12051_v23 }
 0xbd6   : > { %10210 = vmatpush3.bf16.msra.mxu0 %v11583_v38 }
 0xbd7   : > { %9779 = vmatprep.subr.msk.mxu0 %vm1029_vm5, %v11876_v16 }
 0xc4c   : > { %v4955_v1 = vpop.xlane.xlu0 %4954 }
 0xc4d   : > { %v4956_v7 = vcvt.f32.s32 %v4955_v1 }
 0xc52   : > { %v4940_v56 = vpop.xlane.xlu1 %4939 }
 0xc53   : > { %v4941_v4 = vcvt.f32.s32 %v4940_v56  ;;  %v4972_v56 = vcvt.f32.s32 %v12272_v45 }
 0xc55   : > { %v12351_v2 = vadd.s32 %v4943_v11, %v4941_v4  ;;  %v4973_v45 = vshll.u32 %v4972_v56, 16  ;;  %v13790_v11 = vmov 0.0  }
 0xc91   : > { %v9699_v27 = vpop.f32.mrb[24].mxu0 }
 0xc92   : > { %v12306_v37 = vadd.f32 %v12303_v43, %v9699_v27  ;;  %v4346_v5 = vpop.f32.mrb[25].mxu0  ;;  %v4549_v27 = vmul.f32 %v12341_v35, %v12238_v28  ;;  %v13788_v28 = vld [vmem:[#allocation11_spill] sm:$0xff] }
 0xc93   : > { %v12309_v19 = vadd.f32 %v12303_v43, %v4346_v5  ;;  %v4970_v5 = vpop.xlane.xlu1 %4969  ;;  %vm4990_vm9 = vcmp.eq.s32.totalorder %v13788_v28, %v12351_v2 }
 0xc94   : > { %v13654_v9 = vmax.f32 %v12306_v37, 0.0  ;;  %v8850_v1 = vsel %vm4990_vm9, 1.0, %v13790_v11 }
 0xc95   : > { %v13653_v51 = vmax.f32 %v12309_v19, 0.0 }
 0xc97   : > { %9727 = vmatprep.mubr.msk.f32.mxu1 %vm2136_vm8, %v13653_v51 }
 0xc98   : > { %v9702_v16 = vpop.f32.mrb[26].mxu0  ;;  %9728 = vmatmul.mubr.msk.f32.vlgmr.msra.gmra.mrb[40].mxu1 %vm2136_vm8, %v13654_v9 }
 0xc99   : > { %v12320_v33 = vadd.f32 %v12303_v43, %v9702_v16  ;;  %v4356_v23 = vpop.f32.mrb[27].mxu0  ;;  %10198 = vmatpush3.bf16.msra.mxu1 %v11478_v47 }
 0xc9a   : > { %v12324_v26 = vadd.f32 %v12303_v43, %v4356_v23  ;;  %10200 = vmatprep.subr.bf16.mxu1 %v11510_v54 }
 0xc9b   : > { %v13652_v44 = vmax.f32 %v12320_v33, 0.0 }
 0xc9c   : > { %v13651_v20 = vmax.f32 %v12324_v26, 0.0 }
 0xc9d   : > { %10202 = vmatpush3.bf16.msra.mxu1 %v11510_v54 }
 0xc9e   : > { %9730 = vmatprep.mubr.msk.f32.mxu1 %vm2136_vm8, %v13651_v20  ;;  %10212 = vmatprep.subr.bf16.mxu1 %v13782_v15 }
 0xc9f   : > { %9731 = vmatmul.mubr.msk.f32.gmra.mrb[42].mxu1 %vm2136_vm8, %v13652_v44 }
 0xca4   : > { %v9715_v42 = vpop.f32.mrb[28].mxu0 }
 0xca5   : > { %v10363_v34 = vadd.f32 %v9715_v42, %v13783_v10  ;;  %v4524_v39 = vpop.f32.mrb[29].mxu0  ;;  %v4985_v42 = vpop.xlane.xlu0 %4984  ;;  %v13813_v10 = vld [vmem:[#allocation30_spill] sm:$0xff] }
 0xca6   : > { %v10364_v12 = vadd.f32 %v4524_v39, %v13785_v36  ;;  %v4987_v39 = vcvt.f32.s32 %v12257_v52 }
 0xca7   : > { %v4552_v61 = vadd.f32 %v10363_v34, %v4548_v14  ;;  %v4971_v34 = vcvt.f32.s32 %v4970_v5 }
 0xca8   : > { %v4551_v13 = vadd.f32 %v10364_v12, %v4547_v50  ;;  %v9718_v6 = vpop.f32.mrb[30].mxu0  ;;  %v13789_v12 = vld [vmem:[#allocation13_spill] sm:$0xff]  ;;  %v12366_v50 = vadd.s32 %v4958_v32, %v4956_v7  ;;  %v4988_v52 = vshll.u32 %v4987_v39, 16  ;;  %v12420_v32 = vld [vmem:[%s13724_s29] sm:$0x7] }
 0xca9   : > { %v10365_v18 = vadd.f32 %v9718_v6, %v13786_v48  ;;  %v4534_v31 = vpop.f32.mrb[31].mxu0  ;;  %v4556_v16 = vmax.f32 %v4552_v61, 0.0  ;;  %v4986_v61 = vcvt.f32.s32 %v4985_v42  ;;  %v13791_v6 = vld [vmem:[#allocation14_spill] sm:$0xff] }
 0xcaa   : > { %v4555_v62 = vmax.f32 %v4551_v13, 0.0  ;;  %v10366_v8 = vadd.f32 %v4534_v31, %v13787_v58  ;;  %v12373_v13 = vadd.s32 %v4973_v45, %v4971_v34  ;;  %vm4991_vm10 = vcmp.eq.s32.totalorder %v13788_v28, %v12366_v50 }
 0xcab   : > { %v4554_v23 = vadd.f32 %v10365_v18, %v4550_v17  ;;  %v12380_v18 = vadd.s32 %v4988_v52, %v4986_v61  ;;  %v13792_v17 = vld [vmem:[#allocation15_spill] sm:$0xff]  ;;  %v8851_v31 = vsel %vm4991_vm10, 1.0, %v13790_v11 }
 0xcac   : > { %v4553_v60 = vadd.f32 %v10366_v8, %v4549_v27  ;;  %9741 = vmatprep.mubr.msk.f32.mxu1 %vm2136_vm8, %v4555_v62  ;;  %vm4992_vm13 = vcmp.eq.s32.totalorder %v13788_v28, %v12373_v13 }
 0xcad   : > { %9742 = vmatmul.mubr.msk.f32.vlgmr.msra.gmra.mrb[40].mxu1 %vm2136_vm8, %v4556_v16  ;;  %v4558_v4 = vmax.f32 %v4554_v23, 0.0  ;;  %v8852_v62 = vsel %vm4992_vm13, 1.0, %v13790_v11  ;;  %vm4993_vm14 = vcmp.eq.s32.totalorder %v13788_v28, %v12380_v18  ;;  %v13807_v18 = vld [vmem:[#allocation35_spill] sm:$0xff] }
 0xcae   : > { %v4557_v14 = vmax.f32 %v4553_v60, 0.0  ;;  %10214 = vmatpush3.bf16.msra.mxu1 %v13782_v15  ;;  %v8853_v8 = vsel %vm4993_vm14, 1.0, %v13790_v11 }
 0xcaf   : > { %10216 = vmatprep.subr.bf16.mxu1 %v13789_v12 }
 0xcb0   : > { %9744 = vmatprep.mubr.msk.f32.mxu1 %vm2136_vm8, %v4557_v14 }
 0xcb1   : > { %9745 = vmatmul.mubr.msk.f32.gmra.mrb[42].mxu1 %vm2136_vm8, %v4558_v4  ;;  %v13794_v4 = vld [vmem:[#allocation36_spill] sm:$0xff] }
 0xcb2   : > { %10218 = vmatpush3.bf16.msra.mxu1 %v13789_v12  ;;  %9773 = vmatprep.mubr.msk.f32.mxu1 %vm1225_vm0, %v8850_v1 }
 0xcb3   : > { %10220 = vmatprep.subr.bf16.mxu1 %v13791_v6 }
 0xcb6   : > { %10222 = vmatpush3.bf16.msra.mxu1 %v13791_v6  ;;  %v13811_v6 = vld [vmem:[#allocation28_spill] sm:$0xff] }
 0xcb7   : > { %10224 = vmatprep.subr.bf16.mxu1 %v13792_v17 }
 0xcb9   : > { %9774 = vmatmul.mubr.msk.f32.vlgmr.msra.gmra.mrb[44].mxu1 %vm1225_vm0, %v8851_v31  ;;  %v13795_v31 = vld [vmem:[#allocation37_spill] sm:$0xff] }
 0xcba   : > { %9776 = vmatprep.mubr.msk.f32.mxu1 %vm1225_vm0, %v8852_v62  ;;  %10226 = vmatpush3.bf16.msra.mxu1 %v13792_v17  ;;  %v12448_v62 = vld [vmem:[%s11034_s27] sm:$0xff] }
 0xcbb   : > { %9813 = vmatprep.subr.msk.mxu1 %vm1029_vm5, %v11972_v21  ;;  %13796 = vst [vmem:[#allocation22_spill] sm:$0xff] %v12448_v62 }
 0xcbd   : > { %9777 = vmatmul.mubr.msk.f32.gmra.mrb[46].mxu1 %vm1225_vm0, %v8853_v8 }
 0xd80   : > { %v9743_v27 = vpop.f32.mrb[40].mxu1 }
 0xd81   : > { %v4754_v5 = vadd.f32 %v12409_v3, %v9743_v27  ;;  %v4734_v16 = vpop.f32.mrb[41].mxu1  ;;  %v12463_v27 = vld [vmem:[%s11034_s27 + $0x8] sm:$0xff] }
 0xd82   : > { %v4753_v23 = vadd.f32 %v12409_v3, %v4734_v16  ;;  %13797 = vst [vmem:[#allocation23_spill] sm:$0xff] %v12463_v27  ;;  %v12470_v16 = vld [vmem:[%s11034_s27 + $0x10] sm:$0xff] }
 0xd83   : > { %v4758_v60 = vmax.f32 %v4754_v5, 0.0  ;;  %13798 = vst [vmem:[#allocation36_spill] sm:$0xff] %v12470_v16 }
 0xd84   : > { %v4757_v56 = vmax.f32 %v4753_v23, 0.0  ;;  %v9746_v21 = vpop.f32.mrb[42].mxu1 }
 0xd85   : > { %v4756_v7 = vadd.f32 %v12409_v3, %v9746_v21  ;;  %v4744_v42 = vpop.f32.mrb[43].mxu1 }
 0xd86   : > { %v4755_v34 = vadd.f32 %v12409_v3, %v4744_v42  ;;  %9755 = vmatprep.mubr.msk.f32.mxu0 %vm2136_vm8, %v4757_v56  ;;  %v12484_v56 = vld [vmem:[%s11034_s27 + $0x18] sm:$0xff] }
 0xd87   : > { %9756 = vmatmul.mubr.msk.f32.vlgmr.msra.gmra.mrb[32].mxu0 %vm2136_vm8, %v4758_v60  ;;  %v4760_v39 = vmax.f32 %v4756_v7, 0.0  ;;  %13799 = vst [vmem:[#allocation37_spill] sm:$0xff] %v12484_v56  ;;  %v13800_v60 = vld [vmem:[#allocation16_spill] sm:$0xff] }
 0xd88   : > { %v4759_v14 = vmax.f32 %v4755_v34, 0.0  ;;  %9780 = vmatpush3.msk.msra.mxu0 %vm1029_vm5, %v12420_v32 }
 0xd89   : > { %9787 = vmatprep.subr.msk.mxu0 %vm1029_vm5, %v13794_v4 }
 0xd8a   : > { %9758 = vmatprep.mubr.msk.f32.mxu0 %vm2136_vm8, %v4759_v14 }
 0xd8b   : > { %9759 = vmatmul.mubr.msk.f32.gmra.mrb[34].mxu0 %vm2136_vm8, %v4760_v39 }
 0xd8c   : > { %v12428_v45 = vpop.f32.mrb[44].mxu1 }
 0xd8d   : > { %5367 = vrot.lane.b32.xlu0 %v12428_v45, %s13744_s24  ;;  %v12432_v61 = vpop.f32.mrb[45].mxu1  ;;  %v12467_v5 = vsub.f32 %v12428_v45, %v12463_v27  ;;  %v13810_v27 = vld [vmem:[#allocation38_spill] sm:$0xff] }
 0xd8e   : > { %5365 = vrot.lane.b32.xlu1 %v12432_v61, %s13744_s24  ;;  %9781 = vmatprep.mubr.msk.f32.mxu0 %vm1020_vm6, %v12432_v61  ;;  %v12452_v8 = vsub.f32 %v12432_v61, %v12448_v62 }
 0xd8f   : > { %9782 = vmatmul.mubr.msk.f32.vlgmr.msra.gmra.mrb[36].mxu0 %vm1020_vm6, %v12428_v45 }
 0xd90   : > { %v12440_v1 = vpop.f32.mrb[46].mxu1  ;;  %9788 = vmatpush3.msk.msra.mxu0 %vm1029_vm5, %v13794_v4  ;;  %v5107_v7 = vmul.f32 %v12452_v8, %v12452_v8 }
 0xd91   : > { %v12444_v52 = vpop.f32.mrb[47].mxu1  ;;  %9795 = vmatprep.subr.mxu0 %v13795_v31  ;;  %v12488_v21 = vsub.f32 %v12440_v1, %v12484_v56 }
 0xd92   : > { %5369 = vrot.lane.b32.xlu1 %v12444_v52, %s13744_s24  ;;  %9784 = vmatprep.mubr.msk.f32.mxu0 %vm1020_vm6, %v12444_v52  ;;  %v12474_v23 = vsub.f32 %v12444_v52, %v12470_v16  ;;  %v5111_v42 = vsel %vm1020_vm6, %v5107_v7, 0.0  ;;  %v5108_v7 = vmul.f32 %v12467_v5, %v12467_v5 }
 0xd93   : > { %9785 = vmatmul.mubr.msk.f32.gmra.mrb[38].mxu0 %vm1020_vm6, %v12440_v1  ;;  %v5110_v39 = vmul.f32 %v12488_v21, %v12488_v21 }
 0xd94   : > { %9789 = vmatprep.mubr.msk.f32.mxu0 %vm1020_vm6, %v12452_v8  ;;  %v5109_v34 = vmul.f32 %v12474_v23, %v12474_v23 }
 0xd95   : > { %v5120_v4 = vsel %vm1020_vm6, %v5110_v39, 0.0  ;;  %v5114_v39 = vsel %vm1020_vm6, %v5108_v7, 0.0  ;;  %v12533_v7 = vsel %vm4992_vm13, inf, %v13807_v18 }
 0xd96   : > { %5371 = vrot.lane.b32.xlu1 %v12440_v1, %s13744_s24  ;;  %v5117_v14 = vsel %vm1020_vm6, %v5109_v34, 0.0  ;;  %v13803_v34 = vld [vmem:[#allocation33_spill] sm:$0xff]  ;;  %13808 = vst [vmem:[#allocation35_spill] sm:$0xff] %v12533_v7 }
 0xd97   : > { %9790 = vmatmul.mubr.msk.f32.vlgmr.msra.gmra.mrb[36].mxu0 %vm1020_vm6, %v12467_v5 }
 0xd98   : > { %9792 = vmatprep.mubr.msk.f32.mxu0 %vm1020_vm6, %v12474_v23  ;;  %9796 = vmatpush3.msra.mxu0 %v13795_v31  ;;  %v13801_v31 = vld [vmem:[#allocation32_spill] sm:$0xff] }
 0xd99   : > { %10228 = vmatprep.subr.bf16.mxu0 %v13800_v60  ;;  %v12506_v20 = vsel %vm4991_vm10, inf, %v13801_v31 }
 0xd9a   : > { %13802 = vst [vmem:[#allocation32_spill] sm:$0xff] %v12506_v20 }
 0xd9b   : > { %9793 = vmatmul.mubr.msk.f32.gmra.mrb[38].mxu0 %vm1020_vm6, %v12488_v21 }
 0xdac   : > { %5112 = vadd.xlane.f32.xlu0 %v5111_v42  ;;  %v6119_v42 = vsel %vm1225_vm0, %v12506_v20, inf }
 0xdb0   : > { %5118 = vadd.xlane.f32.xlu0 %v5117_v14  ;;  %v12516_v14 = vsel %vm4993_vm14, inf, %v13803_v34  ;;  %v6122_v34 = vsel %vm1225_vm0, %v12533_v7, inf }
 0xdb1   : > { %13804 = vst [vmem:[#allocation33_spill] sm:$0xff] %v12516_v14  ;;  %v6125_v31 = vsel %vm1225_vm0, %v12516_v14, inf }
 0xdb4   : > { %5121 = vadd.xlane.f32.xlu0 %v5120_v4  ;;  %v13805_v4 = vld [vmem:[#allocation34_spill] sm:$0xff] }
 0xdb5   : > { %v12523_v50 = vsel %vm4990_vm9, inf, %v13805_v4 }
 0xdb6   : > { %13806 = vst [vmem:[#allocation34_spill] sm:$0xff] %v12523_v50 }
 0xdb8   : > { %6120 = vmin.xlane.f32.xlu0 %v6119_v42  ;;  %v6116_v42 = vsel %vm1225_vm0, %v12523_v50, inf }
 0xdba   : > { %5115 = vadd.xlane.f32.xlu1 %v5114_v39 }
 0xdbc   : > { %6126 = vmin.xlane.f32.xlu0 %v6125_v31  ;;  %v13809_v31 = vld [vmem:[#allocation17_spill] sm:$0xff] }
 0xdbe   : > { %6117 = vmin.xlane.f32.xlu1 %v6116_v42 }
 0xdc2   : > { %6123 = vmin.xlane.f32.xlu1 %v6122_v34 }
 0xdff   : > { %v5368_v39 = vpop.permute.xlu0 %5367 }
 0xe00   : > { %v5366_v2 = vpop.permute.xlu1 %5365 }
 0xe01   : > { %9797 = vmatprep.mubr.msk.f32.mxu0 %vm922_vm11, %v5366_v2 }
 0xe02   : > { %9798 = vmatmul.mubr.msk.f32.vlgmr.msra.gmra.mrb[36].mxu0 %vm922_vm11, %v5368_v39 }
 0xe03   : > { %10230 = vmatpush3.bf16.msra.mxu0 %v13800_v60 }
 0xe04   : > { %v5370_v4 = vpop.permute.xlu1 %5369  ;;  %10232 = vmatprep.subr.bf16.mxu0 %v13809_v31 }
 0xe05   : > { %9800 = vmatprep.mubr.msk.f32.mxu0 %vm922_vm11, %v5370_v4 }
 0xe07   : > { %10234 = vmatpush3.bf16.msra.mxu0 %v13809_v31 }
 0xe08   : > { %v5372_v13 = vpop.permute.xlu1 %5371  ;;  %10236 = vmatprep.subr.bf16.mxu0 %v11478_v47 }
 0xe09   : > { %9801 = vmatmul.mubr.msk.f32.gmra.mrb[38].mxu0 %vm922_vm11, %v5372_v13 }
 0xe39   : > { %v12545_v42 = vpop.xlane.xlu0 %5112 }
 0xe3d   : > { %v12547_v18 = vpop.xlane.xlu0 %5118 }
 0xe41   : > { %v12549_v34 = vpop.xlane.xlu0 %5121 }
 0xe45   : > { %v6121_v2 = vpop.xlane.xlu0 %6120 }
 0xe46   : > { %vm6129_vm15 = vcmp.eq.f32.partialorder %v12506_v20, %v6121_v2 }
 0xe47   : > { %v6133_v39 = vsel %vm6129_vm15, %v13788_v28, 48  ;;  %v12553_v44 = vpop.xlane.xlu1 %5115 }
 0xe48   : > { %v12556_v4 = vsel %vm1225_vm0, %v6133_v39, 2147483647 }
 0xe49   : > { %v6127_v51 = vpop.xlane.xlu0 %6126  ;;  %v6153_v9 = vshra.s32 %v12556_v4, 16 }
 0xe4a   : > { %vm6131_vm1 = vcmp.eq.f32.partialorder %v12516_v14, %v6127_v51 }
 0xe4b   : > { %v6135_v13 = vsel %vm6131_vm1, %v13788_v28, 48  ;;  %v6118_v31 = vpop.xlane.xlu1 %6117  ;;  %v12561_v60 = vcvt.s32.f32 %v6153_v9 }
 0xe4c   : > { %v12564_v56 = vsel %vm1225_vm0, %v6135_v13, 2147483647  ;;  %vm6128_vm2 = vcmp.eq.f32.partialorder %v12523_v50, %v6118_v31 }
 0xe4d   : > { %v6132_v2 = vsel %vm6128_vm2, %v13788_v28, 48  ;;  %6156 = vmin.xlane.f32.xlu0 %v12561_v60  ;;  %v6183_v39 = vshra.s32 %v12564_v56, 16 }
 0xe4e   : > { %v12571_v20 = vsel %vm1225_vm0, %v6132_v2, 2147483647 }
 0xe4f   : > { %v6138_v51 = vshra.s32 %v12571_v20, 16  ;;  %v6124_v14 = vpop.xlane.xlu1 %6123  ;;  %v12574_v16 = vcvt.s32.f32 %v6183_v39 }
 0xe50   : > { %vm6130_vm3 = vcmp.eq.f32.partialorder %v12533_v7, %v6124_v14 }
 0xe51   : > { %v6134_v9 = vsel %vm6130_vm3, %v13788_v28, 48  ;;  %6186 = vmin.xlane.f32.xlu0 %v12574_v16  ;;  %v12579_v31 = vcvt.s32.f32 %v6138_v51  ;;  %v13812_v28 = vld [vmem:[#allocation29_spill] sm:$0xff] }
 0xe52   : > { %v12582_v13 = vsel %vm1225_vm0, %v6134_v9, 2147483647 }
 0xe53   : > { %v6168_v50 = vshra.s32 %v12582_v13, 16  ;;  %6141 = vmin.xlane.f32.xlu1 %v12579_v31 }
 0xe55   : > { %v12586_v2 = vcvt.s32.f32 %v6168_v50 }
 0xe57   : > { %6171 = vmin.xlane.f32.xlu1 %v12586_v2 }
 0xe5a   : > { %v9757_v39 = vpop.f32.mrb[32].mxu0 }
 0xe5b   : > { %v4845_v14 = vadd.f32 %v9757_v39, %v13810_v27  ;;  %v4839_v7 = vpop.f32.mrb[33].mxu0 }
 0xe5c   : > { %v4840_v62 = vadd.f32 %v13810_v27, %v4839_v7 }
 0xe5d   : > { %v4859_v3 = vmax.f32 %v4845_v14, 0.0 }
 0xe5e   : > { %v4858_v51 = vmax.f32 %v4840_v62, 0.0  ;;  %v9760_v17 = vpop.f32.mrb[34].mxu0 }
 0xe5f   : > { %v12592_v9 = vmax.f32 %v13811_v6, %v4859_v3  ;;  %v4855_v11 = vadd.f32 %v9760_v17, %v13810_v27  ;;  %v4849_v12 = vpop.f32.mrb[35].mxu0 }
 0xe60   : > { %v12596_v50 = vmax.f32 %v13812_v28, %v4858_v51  ;;  %v4850_v58 = vadd.f32 %v13810_v27, %v4849_v12  ;;  %v13814_v12 = vld [vmem:[#allocation31_spill] sm:$0xff] }
 0xe61   : > { %v4867_v39 = vsub.f32 %v13811_v6, %v12592_v9  ;;  %v4879_v48 = vsub.f32 %v4859_v3, %v12592_v9  ;;  %v4861_v7 = vmax.f32 %v4855_v11, 0.0 }
 0xe62   : > { %v4866_v62 = vsub.f32 %v13812_v28, %v12596_v50  ;;  %v4878_v14 = vsub.f32 %v4858_v51, %v12596_v50  ;;  %v4860_v36 = vmax.f32 %v4850_v58, 0.0 }
 0xe63   : > { %v4872_v35 = vmul.f32 1.442695, %v4867_v39  ;;  %v4884_v17 = vmul.f32 1.442695, %v4879_v48  ;;  %v12606_v15 = vmax.f32 %v13813_v10, %v4861_v7 }
 0xe64   : > { %v4870_v54 = vmul.f32 1.442695, %v4866_v62  ;;  %v4882_v47 = vmul.f32 1.442695, %v4878_v14  ;;  %v12609_v27 = vmax.f32 %v13814_v12, %v4860_v36 }
 0xe65   : > { %10631 = vpow2.f32 %v4872_v35  ;;  %v4869_v11 = vsub.f32 %v13813_v10, %v12606_v15  ;;  %v4881_v6 = vsub.f32 %v4861_v7, %v12606_v15 }
 0xe66   : > { %10633 = vpow2.f32 %v4884_v17  ;;  %v4868_v58 = vsub.f32 %v13814_v12, %v12609_v27  ;;  %v4880_v48 = vsub.f32 %v4860_v36, %v12609_v27  ;;  %v13815_v17 = vmax.f32 %v12306_v37, 0.0 }
 0xe67   : > { %10635 = vpow2.f32 %v4870_v54  ;;  %v4876_v28 = vmul.f32 1.442695, %v4869_v11  ;;  %v4888_v3 = vmul.f32 1.442695, %v4881_v6 }
 0xe68   : > { %10637 = vpow2.f32 %v4882_v47  ;;  %v4874_v51 = vmul.f32 1.442695, %v4868_v58  ;;  %v4886_v39 = vmul.f32 1.442695, %v4880_v48  ;;  %v13816_v48 = vmax.f32 %v12309_v19, 0.0 }
 0xe69   : > { %10639 = vpow2.f32 %v4876_v28 }
 0xe6a   : > { %10641 = vpow2.f32 %v4888_v3 }
 0xe6b   : > { %10643 = vpow2.f32 %v4874_v51 }
 0xe6c   : > { %10645 = vpow2.f32 %v4886_v39 }
 0xe6f   : > { %v10632_v35 = vpop.eup %10631 }
 0xe70   : > { %v10634_v10 = vpop.eup %10633  ;;  %v4891_v7 = vmul.f32 %v10632_v35, %v12195_v63  ;;  %v4899_v62 = vmul.f32 %v10632_v35, %v12197_v29 }
 0xe71   : > { %v10636_v14 = vpop.eup %10635  ;;  %v4903_v36 = vmul.f32 %v10634_v10, %v13815_v17 }
 0xe72   : > { %v10638_v54 = vpop.eup %10637  ;;  %v12621_v12 = vadd.f32 %v10634_v10, %v4891_v7  ;;  %v4890_v47 = vmul.f32 %v10636_v14, %v12201_v0  ;;  %v4898_v11 = vmul.f32 %v10636_v14, %v12203_v49  ;;  %v13817_v0 = vmax.f32 %v12320_v33, 0.0 }
 0xe73   : > { %v10640_v6 = vpop.eup %10639  ;;  %v12625_v58 = vadd.f32 %v4903_v36, %v4899_v62  ;;  %v4902_v28 = vmul.f32 %v10638_v54, %v13816_v48  ;;  %v13818_v14 = vmax.f32 %v12324_v26, 0.0  ;;  %v5124_v36 = vadd.f32 1e-20, %v12553_v44 }
 0xe74   : > { %v10642_v63 = vpop.eup %10641  ;;  %v12629_v3 = vadd.f32 %v10638_v54, %v4890_v47  ;;  %v4893_v29 = vmul.f32 %v10640_v6, %v12207_v53  ;;  %v4901_v37 = vmul.f32 %v10640_v6, %v12209_v41  ;;  %v5123_v33 = vadd.f32 1e-20, %v12545_v42 }
 0xe75   : > { %v10644_v51 = vpop.eup %10643  ;;  %v12633_v39 = vadd.f32 %v4902_v28, %v4898_v11  ;;  %v4905_v35 = vmul.f32 %v10642_v63, %v13817_v0  ;;  %10647 = vrsqrt.f32 %v5124_v36  ;;  %v5126_v54 = vadd.f32 1e-20, %v12549_v34 }
 0xe76   : > { %v10646_v49 = vpop.eup %10645  ;;  %v12637_v10 = vadd.f32 %v10642_v63, %v4893_v29  ;;  %v4892_v7 = vmul.f32 %v10644_v51, %v12213_v59  ;;  %v4900_v19 = vmul.f32 %v10644_v51, %v12215_v40  ;;  %10649 = vrsqrt.f32 %v5123_v33 }
 0xe77   : > { %v12641_v62 = vadd.f32 %v4905_v35, %v4901_v37  ;;  %v4904_v53 = vmul.f32 %v10646_v49, %v13818_v14  ;;  %v5125_v59 = vadd.f32 1e-20, %v12547_v18  ;;  %10651 = vrsqrt.f32 %v5126_v54 }
 0xe78   : > { %v12645_v17 = vadd.f32 %v10646_v49, %v4892_v7  ;;  %vm5136_vm4 = vcmp.eq.f32.partialorder %v5124_v36, inf  ;;  %vm5129_vm7 = vcmp.eq.f32.partialorder %v5123_v33, inf  ;;  %v5139_v44 = vand.u32 2147483648, %v5124_v36 }
 0xe79   : > { %v12647_v41 = vadd.f32 %v4904_v53, %v4900_v19  ;;  %10653 = vrsqrt.f32 %v5125_v59  ;;  %vm5138_vm9 = vcmp.eq.f32.partialorder %v5124_v36, 0.0  ;;  %v5132_v42 = vand.u32 2147483648, %v5123_v33 }
 0xe7a   : > { %vm5131_vm10 = vcmp.eq.f32.partialorder %v5123_v33, 0.0  ;;  %vm5150_vm13 = vcmp.eq.f32.partialorder %v5126_v54, inf  ;;  %vm5143_vm14 = vcmp.eq.f32.partialorder %v5125_v59, inf  ;;  %v5153_v49 = vand.u32 2147483648, %v5126_v54 }
 0xe7b   : > { %vm5152_vm15 = vcmp.eq.f32.partialorder %v5126_v54, 0.0  ;;  %v5146_v19 = vand.u32 2147483648, %v5125_v59  ;;  %vm5145_vm1 = vcmp.eq.f32.partialorder %v5125_v59, 0.0 }
 0xe7f   : > { %v10648_v40 = vpop.eup %10647 }
 0xe80   : > { %v10650_v47 = vpop.eup %10649  ;;  %v5135_v26 = vmul.f32 %v10648_v40, %v5124_v36 }
 0xe81   : > { %v5128_v11 = vmul.f32 %v10650_v47, %v5123_v33  ;;  %v10652_v6 = vpop.eup %10651  ;;  %v6152_v47 = vand.u32 65535, %v12556_v4 }
 0xe82   : > { %v5137_v48 = vsel %vm5136_vm4, %v5124_v36, %v5135_v26  ;;  %v5149_v34 = vmul.f32 %v10652_v6, %v5126_v54 }
 0xe83   : > { %v10654_v28 = vpop.eup %10653  ;;  %v5130_v63 = vsel %vm5129_vm7, %v5123_v33, %v5128_v11  ;;  %v12653_v29 = vsel %vm5138_vm9, %v5139_v44, %v5137_v48  ;;  %v6182_v44 = vand.u32 65535, %v12564_v56 }
 0xe84   : > { %v12655_v18 = vsel %vm5131_vm10, %v5132_v42, %v5130_v63  ;;  %v5142_v37 = vmul.f32 %v10654_v28, %v5125_v59  ;;  %v5358_v51 = vmul.f32 %v12228_v30, %v12653_v29  ;;  %v5151_v35 = vsel %vm5150_vm13, %v5126_v54, %v5149_v34 }
 0xe85   : > { %v5357_v0 = vmul.f32 %v12228_v30, %v12655_v18  ;;  %v12662_v53 = vsel %vm5152_vm15, %v5153_v49, %v5151_v35  ;;  %v6154_v42 = vcvt.s32.f32 %v6152_v47  ;;  %v6137_v34 = vand.u32 65535, %v12571_v20  ;;  %v12685_v35 = vld [vmem:[%s13570_s14] sm:$0x7] }
 0xe86   : > { %v5144_v7 = vsel %vm5143_vm14, %v5125_v59, %v5142_v37  ;;  %v10367_v14 = vadd.f32 %v5358_v51, %v11374_v22  ;;  %v5360_v48 = vmul.f32 %v12228_v30, %v12662_v53  ;;  %v6184_v20 = vcvt.s32.f32 %v6182_v44 }
 0xe87   : > { %v10369_v33 = vadd.f32 %v5357_v0, %v11379_v25  ;;  %v12665_v40 = vsel %vm5145_vm1, %v5146_v19, %v5144_v7  ;;  %v6167_v7 = vand.u32 65535, %v12582_v13 }
 0xe88   : > { %v5359_v54 = vmul.f32 %v12228_v30, %v12665_v40  ;;  %v10371_v4 = vadd.f32 %v5360_v48, %v11411_v46 }
 0xe8a   : > { %v10373_v30 = vadd.f32 %v5359_v54, %v11416_v55 }
 0xed5   : > { %v9799_v36 = vpop.f32.mrb[36].mxu0 }
 0xed6   : > { %v10368_v26 = vadd.f32 %v10367_v14, %v9799_v36  ;;  %v5447_v11 = vpop.f32.mrb[37].mxu0 }
 0xed7   : > { %v10370_v6 = vadd.f32 %v10369_v33, %v5447_v11  ;;  %v6139_v33 = vcvt.s32.f32 %v6137_v34  ;;  %v13823_v34 = vld [vmem:[#allocation19_spill] sm:$0xff] }
 0xed8   : > { %v5471_v59 = vmax.f32 %v10368_v26, 0.0 }
 0xed9   : > { %v5470_v28 = vmax.f32 %v10370_v6, 0.0  ;;  %v13820_v6 = vld [vmem:[#allocation21_spill] sm:$0xff] }
 0xeda   : > { %v12673_v63 = vpop.xlane.xlu0 %6156 }
 0xedb   : > { %vm6158_vm2 = vcmp.eq.f32.partialorder %v12561_v60, %v12673_v63  ;;  %9807 = vmatprep.mubr.msk.f32.mxu1 %vm1821_vm12, %v5470_v28  ;;  %v13821_v28 = vld [vmem:[#allocation12_spill] sm:$0xff] }
 0xedc   : > { %v9802_v37 = vpop.f32.mrb[38].mxu0  ;;  %9808 = vmatmul.mubr.msk.f32.vlgmr.msra.gmra.mrb[48].mxu1 %vm1821_vm12, %v5471_v59  ;;  %v6159_v51 = vsel %vm6158_vm2, %v6154_v42, inf  ;;  %v13822_v42 = vld [vmem:[#allocation24_spill] sm:$0xff] }
 0xedd   : > { %v10372_v56 = vadd.f32 %v10371_v4, %v9802_v37  ;;  %v5457_v0 = vpop.f32.mrb[39].mxu0  ;;  %6160 = vmin.xlane.f32.xlu0 %v6159_v51  ;;  %9814 = vmatpush3.msk.msra.mxu1 %vm1029_vm5, %v12685_v35  ;;  %v5754_v37 = vmul.f32 %v13823_v34, %v12653_v29 }
 0xede   : > { %v10374_v60 = vadd.f32 %v10373_v30, %v5457_v0  ;;  %v12689_v49 = vpop.xlane.xlu0 %6186  ;;  %9821 = vmatprep.subr.msk.mxu1 %vm1029_vm5, %v12262_v57 }
 0xedf   : > { %vm6188_vm3 = vcmp.eq.f32.partialorder %v12574_v16, %v12689_v49  ;;  %v5473_v47 = vmax.f32 %v10372_v56, 0.0  ;;  %v6169_v16 = vcvt.s32.f32 %v6167_v7  ;;  %v13824_v56 = vld [vmem:[#allocation25_spill] sm:$0xff] }
 0xee0   : > { %v5472_v19 = vmax.f32 %v10374_v60, 0.0  ;;  %v6142_v14 = vpop.xlane.xlu1 %6141  ;;  %v6189_v36 = vsel %vm6188_vm3, %v6184_v20, inf  ;;  %v5753_v60 = vmul.f32 %v13823_v34, %v12655_v18  ;;  %v6163_v18 = vcvt.f32.s32 %v12673_v63 }
 0xee1   : > { %vm6143_vm4 = vcmp.eq.f32.partialorder %v12579_v31, %v6142_v14  ;;  %6190 = vmin.xlane.f32.xlu0 %v6189_v36  ;;  %v13819_v31 = vld [vmem:[#allocation18_spill] sm:$0xff]  ;;  %v6148_v44 = vcvt.f32.s32 %v6142_v14 }
 0xee2   : > { %9810 = vmatprep.mubr.msk.f32.mxu1 %vm1821_vm12, %v5472_v19  ;;  %v6144_v26 = vsel %vm6143_vm4, %v6139_v33, inf  ;;  %v6164_v63 = vshll.u32 %v6163_v18, 16 }
 0xee3   : > { %6145 = vmin.xlane.f32.xlu1 %v6144_v26  ;;  %9811 = vmatmul.mubr.msk.f32.gmra.mrb[50].mxu1 %vm1821_vm12, %v5473_v47  ;;  %v6149_v7 = vshll.u32 %v6148_v44, 16  ;;  %v13825_v47 = vld [vmem:[#allocation26_spill] sm:$0xff]  ;;  %v5756_v26 = vmul.f32 %v13823_v34, %v12662_v53 }
 0xee4   : > { %v12699_v11 = vpop.xlane.xlu1 %6171  ;;  %9815 = vmatprep.mubr.msk.f32.mxu1 %vm1020_vm6, %v12432_v61 }
 0xee5   : > { %vm6173_vm7 = vcmp.eq.f32.partialorder %v12586_v2, %v12699_v11 }
 0xee6   : > { %v6174_v13 = vsel %vm6173_vm7, %v6169_v16, inf }
 0xee7   : > { %6175 = vmin.xlane.f32.xlu1 %v6174_v13  ;;  %9816 = vmatmul.mubr.msk.f32.vlgmr.msra.gmra.mrb[52].mxu1 %vm1020_vm6, %v12428_v45 }
 0xee8   : > { %9822 = vmatpush3.msk.msra.mxu1 %vm1029_vm5, %v12262_v57  ;;  %9818 = vmatprep.mubr.msk.f32.mxu1 %vm1020_vm6, %v12444_v52 }
 0xee9   : > { %10244 = vmatprep.subr.bf16.mxu1 %v11487_v24 }
 0xeeb   : > { %9819 = vmatmul.mubr.msk.f32.gmra.mrb[54].mxu1 %vm1020_vm6, %v12440_v1 }
 0xeec   : > { %9823 = vmatprep.mubr.msk.f32.mxu1 %vm1020_vm6, %v12452_v8 }
 0xeef   : > { %9824 = vmatmul.mubr.msk.f32.vlgmr.msra.gmra.mrb[52].mxu1 %vm1020_vm6, %v12467_v5 }
 0xef0   : > { %9826 = vmatprep.mubr.msk.f32.mxu1 %vm1020_vm6, %v12474_v23  ;;  %10246 = vmatpush3.bf16.msra.mxu1 %v11487_v24 }
 0xef1   : > { %10248 = vmatprep.subr.bf16.mxu1 %v11583_v38 }
 0xef3   : > { %9827 = vmatmul.mubr.msk.f32.gmra.mrb[54].mxu1 %vm1020_vm6, %v12488_v21 }
 0xef4   : > { %10250 = vmatpush3.bf16.msra.mxu1 %v11583_v38 }
 0xef5   : > { %9889 = vmatprep.subr.msk.mxu1 %vm1029_vm5, %v12420_v32 }
 0xf6a   : > { %v6161_v19 = vpop.xlane.xlu0 %6160 }
 0xf6b   : > { %v6162_v53 = vcvt.f32.s32 %v6161_v19  ;;  %v13829_v19 = vmov 0.0  }
 0xfaf   : > { %v9809_v57 = vpop.f32.mrb[48].mxu1 }
 0xfb0   : > { %v12728_v45 = vadd.f32 %v12303_v43, %v9809_v57  ;;  %v5552_v61 = vpop.f32.mrb[49].mxu1  ;;  %v13826_v57 = vld [vmem:[#allocation27_spill] sm:$0xff] }
 0xfb1   : > { %v12731_v1 = vadd.f32 %v12303_v43, %v5552_v61 }
 0xfb2   : > { %v13682_v8 = vmax.f32 %v12728_v45, 0.0 }
 0xfb3   : > { %v13681_v52 = vmax.f32 %v12731_v1, 0.0 }
 0xfb5   : > { %9837 = vmatprep.mubr.msk.f32.mxu0 %vm2136_vm8, %v13681_v52 }
 0xfb6   : > { %v9812_v5 = vpop.f32.mrb[50].mxu1  ;;  %9838 = vmatmul.mubr.msk.f32.vlgmr.msra.gmra.mrb[40].mxu0 %vm2136_vm8, %v13682_v8 }
 0xfb7   : > { %v12742_v23 = vadd.f32 %v12303_v43, %v9812_v5  ;;  %v5562_v21 = vpop.f32.mrb[51].mxu1  ;;  %10238 = vmatpush3.bf16.msra.mxu0 %v13819_v31  ;;  %v5755_v5 = vmul.f32 %v13823_v34, %v12665_v40  ;;  %v13827_v40 = vld [vmem:[#allocation11_spill] sm:$0xff]  ;;  %v6193_v34 = vcvt.f32.s32 %v12689_v49 }
 0xfb8   : > { %v12746_v2 = vadd.f32 %v12303_v43, %v5562_v21  ;;  %10240 = vmatprep.subr.bf16.mxu0 %v13820_v6  ;;  %v6146_v43 = vpop.xlane.xlu1 %6145 }
 0xfb9   : > { %v13680_v54 = vmax.f32 %v12742_v23, 0.0  ;;  %v6147_v51 = vcvt.f32.s32 %v6146_v43  ;;  %v6194_v49 = vshll.u32 %v6193_v34, 16 }
 0xfba   : > { %v13679_v48 = vmax.f32 %v12746_v2, 0.0 }
 0xfbb   : > { %10242 = vmatpush3.bf16.msra.mxu0 %v13820_v6  ;;  %v12768_v13 = vadd.s32 %v6149_v7, %v6147_v51 }
 0xfbc   : > { %9840 = vmatprep.mubr.msk.f32.mxu0 %vm2136_vm8, %v13679_v48  ;;  %10252 = vmatprep.subr.bf16.mxu0 %v13821_v28  ;;  %v6176_v21 = vpop.xlane.xlu1 %6175 }
 0xfbd   : > { %9841 = vmatmul.mubr.msk.f32.gmra.mrb[42].mxu0 %vm2136_vm8, %v13680_v54  ;;  %vm6196_vm9 = vcmp.eq.s32.totalorder %v13827_v40, %v12768_v13 }
 0xfc2   : > { %v9825_v59 = vpop.f32.mrb[52].mxu1 }
 0xfc3   : > { %v10375_v4 = vadd.f32 %v9825_v59, %v13822_v42  ;;  %v5730_v30 = vpop.f32.mrb[53].mxu1  ;;  %v6178_v59 = vcvt.f32.s32 %v12699_v11 }
 0xfc4   : > { %v10376_v0 = vadd.f32 %v5730_v30, %v13824_v56  ;;  %v6177_v30 = vcvt.f32.s32 %v6176_v21  ;;  %v13832_v21 = vld [vmem:[#allocation20_spill] sm:$0xff] }
 0xfc5   : > { %v5758_v20 = vadd.f32 %v10375_v4, %v5754_v37  ;;  %v6191_v37 = vpop.xlane.xlu0 %6190  ;;  %v6179_v11 = vshll.u32 %v6178_v59, 16 }
 0xfc6   : > { %v5757_v36 = vadd.f32 %v10376_v0, %v5753_v60  ;;  %v9828_v33 = vpop.f32.mrb[54].mxu1  ;;  %v13828_v60 = vld [vmem:[#allocation13_spill] sm:$0xff]  ;;  %v6192_v7 = vcvt.f32.s32 %v6191_v37 }
 0xfc7   : > { %v10377_v14 = vadd.f32 %v9828_v33, %v13825_v47  ;;  %v5740_v16 = vpop.f32.mrb[55].mxu1  ;;  %v5762_v43 = vmax.f32 %v5758_v20, 0.0  ;;  %v12783_v20 = vadd.s32 %v6164_v63, %v6162_v53  ;;  %v12790_v33 = vadd.s32 %v6179_v11, %v6177_v30  ;;  %v12834_v11 = vld [vmem:[%s13725_s3] sm:$0x7] }
 0xfc8   : > { %v5761_v29 = vmax.f32 %v5757_v36, 0.0  ;;  %v10378_v61 = vadd.f32 %v5740_v16, %v13826_v57  ;;  %v8898_v36 = vsel %vm6196_vm9, 1.0, %v13829_v19  ;;  %v13831_v16 = vld [vmem:[#allocation15_spill] sm:$0xff]  ;;  %13833 = vst [vmem:[#allocation38_spill] sm:$0xff] %v12834_v11 }
 0xfc9   : > { %v5760_v44 = vadd.f32 %v10377_v14, %v5756_v26  ;;  %v13830_v14 = vld [vmem:[#allocation14_spill] sm:$0xff]  ;;  %vm6197_vm10 = vcmp.eq.s32.totalorder %v13827_v40, %v12783_v20  ;;  %v12797_v26 = vadd.s32 %v6194_v49, %v6192_v7  ;;  %vm6198_vm13 = vcmp.eq.s32.totalorder %v13827_v40, %v12790_v33 }
 0xfca   : > { %v5759_v4 = vadd.f32 %v10378_v61, %v5755_v5  ;;  %9851 = vmatprep.mubr.msk.f32.mxu0 %vm2136_vm8, %v5761_v29  ;;  %v8899_v29 = vsel %vm6197_vm10, 1.0, %v13829_v19  ;;  %v8900_v61 = vsel %vm6198_vm13, 1.0, %v13829_v19 }
 0xfcb   : > { %9852 = vmatmul.mubr.msk.f32.vlgmr.msra.gmra.mrb[40].mxu0 %vm2136_vm8, %v5762_v43  ;;  %v5764_v0 = vmax.f32 %v5760_v44, 0.0  ;;  %vm6199_vm14 = vcmp.eq.s32.totalorder %v13827_v40, %v12797_v26 }
 0xfcc   : > { %v5763_v51 = vmax.f32 %v5759_v4, 0.0  ;;  %10254 = vmatpush3.bf16.msra.mxu0 %v13821_v28  ;;  %v8901_v5 = vsel %vm6199_vm14, 1.0, %v13829_v19 }
 0xfcd   : > { %10256 = vmatprep.subr.bf16.mxu0 %v13828_v60 }
 0xfce   : > { %9854 = vmatprep.mubr.msk.f32.mxu0 %vm2136_vm8, %v5763_v51 }
 0xfcf   : > { %9855 = vmatmul.mubr.msk.f32.gmra.mrb[42].mxu0 %vm2136_vm8, %v5764_v0 }
 0xfd0   : > { %10258 = vmatpush3.bf16.msra.mxu0 %v13828_v60  ;;  %9883 = vmatprep.mubr.msk.f32.mxu0 %vm1225_vm0, %v8898_v36 }
 0xfd1   : > { %10260 = vmatprep.subr.bf16.mxu0 %v13830_v14 }
 0xfd4   : > { %10262 = vmatpush3.bf16.msra.mxu0 %v13830_v14 }
 0xfd5   : > { %10264 = vmatprep.subr.bf16.mxu0 %v13831_v16 }
 0xfd7   : > { %9884 = vmatmul.mubr.msk.f32.vlgmr.msra.gmra.mrb[44].mxu0 %vm1225_vm0, %v8899_v29  ;;  %v12861_v29 = vld [vmem:[%s13565_s9] sm:$0xff] }
 0xfd8   : > { %9886 = vmatprep.mubr.msk.f32.mxu0 %vm1225_vm0, %v8900_v61  ;;  %10266 = vmatpush3.bf16.msra.mxu0 %v13831_v16  ;;  %13834 = vst [vmem:[#allocation28_spill] sm:$0xff] %v12861_v29  ;;  %v13835_v61 = vld [vmem:[#allocation22_spill] sm:$0xff] }
 0xfd9   : > { %9923 = vmatprep.subr.msk.mxu0 %vm1029_vm5, %v12685_v35 }
 0xfdb   : > { %9887 = vmatmul.mubr.msk.f32.gmra.mrb[46].mxu0 %vm1225_vm0, %v8901_v5 }
0x109e   : > { %v9853_v18 = vpop.f32.mrb[40].mxu0 }
0x109f   : > { %v5960_v43 = vadd.f32 %v13832_v21, %v9853_v18  ;;  %v5940_v44 = vpop.f32.mrb[41].mxu0  ;;  %v13836_v18 = vld [vmem:[#allocation23_spill] sm:$0xff] }
0x10a0   : > { %v5959_v59 = vadd.f32 %v13832_v21, %v5940_v44 }
0x10a1   : > { %v5964_v37 = vmax.f32 %v5960_v43, 0.0  ;;  %v13837_v43 = vld [vmem:[#allocation36_spill] sm:$0xff] }
0x10a2   : > { %v5963_v4 = vmax.f32 %v5959_v59, 0.0  ;;  %v9856_v53 = vpop.f32.mrb[42].mxu0  ;;  %v13838_v59 = vld [vmem:[#allocation37_spill] sm:$0xff] }
0x10a3   : > { %v5962_v30 = vadd.f32 %v13832_v21, %v9856_v53  ;;  %v5950_v51 = vpop.f32.mrb[43].mxu0  ;;  %v13839_v53 = vld [vmem:[#allocation16_spill] sm:$0xff] }
0x10a4   : > { %v5961_v63 = vadd.f32 %v13832_v21, %v5950_v51  ;;  %9865 = vmatprep.mubr.msk.f32.mxu1 %vm2136_vm8, %v5963_v4 }
0x10a5   : > { %9866 = vmatmul.mubr.msk.f32.vlgmr.msra.gmra.mrb[56].mxu1 %vm2136_vm8, %v5964_v37  ;;  %v5966_v0 = vmax.f32 %v5962_v30, 0.0 }
0x10a6   : > { %v5965_v34 = vmax.f32 %v5961_v63, 0.0  ;;  %9890 = vmatpush3.msk.msra.mxu1 %vm1029_vm5, %v12420_v32 }
0x10a7   : > { %9897 = vmatprep.subr.msk.mxu1 %vm1029_vm5, %v12834_v11 }
0x10a8   : > { %9868 = vmatprep.mubr.msk.f32.mxu1 %vm2136_vm8, %v5965_v34 }
0x10a9   : > { %9869 = vmatmul.mubr.msk.f32.gmra.mrb[58].mxu1 %vm2136_vm8, %v5966_v0 }
0x10aa   : > { %v12840_v7 = vpop.f32.mrb[44].mxu0 }
0x10ab   : > { %6573 = vrot.lane.b32.xlu0 %v12840_v7, %s13744_s24  ;;  %v12844_v36 = vpop.f32.mrb[45].mxu0  ;;  %v12878_v21 = vsub.f32 %v12840_v7, %v13836_v18 }
0x10ac   : > { %6571 = vrot.lane.b32.xlu1 %v12844_v36, %s13744_s24  ;;  %9891 = vmatprep.mubr.msk.f32.mxu1 %vm1020_vm6, %v12844_v36  ;;  %v12866_v5 = vsub.f32 %v12844_v36, %v13835_v61  ;;  %v13840_v61 = vld [vmem:[#allocation32_spill] sm:$0xff] }
0x10ad   : > { %9892 = vmatmul.mubr.msk.f32.vlgmr.msra.gmra.mrb[60].mxu1 %vm1020_vm6, %v12840_v7  ;;  %v6201_v18 = vsel %vm6197_vm10, inf, %v13840_v61  ;;  %v13843_v61 = vld [vmem:[#allocation35_spill] sm:$0xff] }
0x10ae   : > { %v12852_v32 = vpop.f32.mrb[46].mxu0  ;;  %9898 = vmatpush3.msk.msra.mxu1 %vm1029_vm5, %v12834_v11  ;;  %v6313_v37 = vmul.f32 %v12866_v5, %v12866_v5  ;;  %v6202_v26 = vsel %vm6198_vm13, inf, %v13843_v61 }
0x10af   : > { %v12856_v49 = vpop.f32.mrb[47].mxu0  ;;  %9905 = vmatprep.subr.mxu1 %v12861_v29  ;;  %v12893_v4 = vsub.f32 %v12852_v32, %v13838_v59  ;;  %v7325_v59 = vsel %vm1225_vm0, %v6201_v18, inf }
0x10b0   : > { %6575 = vrot.lane.b32.xlu1 %v12856_v49, %s13744_s24  ;;  %9894 = vmatprep.mubr.msk.f32.mxu1 %vm1020_vm6, %v12856_v49  ;;  %v12882_v44 = vsub.f32 %v12856_v49, %v13837_v43  ;;  %v6317_v30 = vsel %vm1020_vm6, %v6313_v37, 0.0  ;;  %v6314_v43 = vmul.f32 %v12878_v21, %v12878_v21  ;;  %v13841_v37 = vld [vmem:[#allocation33_spill] sm:$0xff] }
0x10b1   : > { %9895 = vmatmul.mubr.msk.f32.gmra.mrb[62].mxu1 %vm1020_vm6, %v12852_v32  ;;  %v6316_v34 = vmul.f32 %v12893_v4, %v12893_v4 }
0x10b2   : > { %9899 = vmatprep.mubr.msk.f32.mxu1 %vm1020_vm6, %v12866_v5  ;;  %v6315_v51 = vmul.f32 %v12882_v44, %v12882_v44 }
0x10b3   : > { %v6326_v0 = vsel %vm1020_vm6, %v6316_v34, 0.0 }
0x10b4   : > { %6577 = vrot.lane.b32.xlu1 %v12852_v32, %s13744_s24  ;;  %v6323_v63 = vsel %vm1020_vm6, %v6315_v51, 0.0  ;;  %v6320_v51 = vsel %vm1020_vm6, %v6314_v43, 0.0 }
0x10b5   : > { %9900 = vmatmul.mubr.msk.f32.vlgmr.msra.gmra.mrb[60].mxu1 %vm1020_vm6, %v12878_v21 }
0x10b6   : > { %9902 = vmatprep.mubr.msk.f32.mxu1 %vm1020_vm6, %v12882_v44  ;;  %9906 = vmatpush3.msra.mxu1 %v12861_v29 }
0x10b7   : > { %10268 = vmatprep.subr.bf16.mxu1 %v13839_v53 }
0x10b9   : > { %9903 = vmatmul.mubr.msk.f32.gmra.mrb[62].mxu1 %vm1020_vm6, %v12893_v4 }
0x10ca   : > { %6318 = vadd.xlane.f32.xlu0 %v6317_v30  ;;  %v6203_v30 = vsel %vm6199_vm14, inf, %v13841_v37 }
0x10cb   : > { %v7331_v34 = vsel %vm1225_vm0, %v6203_v30, inf }
0x10ce   : > { %6324 = vadd.xlane.f32.xlu0 %v6323_v63  ;;  %v13842_v63 = vld [vmem:[#allocation34_spill] sm:$0xff] }
0x10cf   : > { %v6200_v20 = vsel %vm6196_vm9, inf, %v13842_v63 }
0x10d2   : > { %6327 = vadd.xlane.f32.xlu0 %v6326_v0  ;;  %v7322_v0 = vsel %vm1225_vm0, %v6200_v20, inf }
0x10d6   : > { %7326 = vmin.xlane.f32.xlu0 %v7325_v59  ;;  %v7328_v59 = vsel %vm1225_vm0, %v6202_v26, inf }
0x10d8   : > { %6321 = vadd.xlane.f32.xlu1 %v6320_v51  ;;  %v13844_v51 = vld [vmem:[#allocation17_spill] sm:$0xff] }
0x10da   : > { %7332 = vmin.xlane.f32.xlu0 %v7331_v34 }
0x10dc   : > { %7323 = vmin.xlane.f32.xlu1 %v7322_v0 }
0x10e0   : > { %7329 = vmin.xlane.f32.xlu1 %v7328_v59 }
0x111d   : > { %v6574_v37 = vpop.permute.xlu0 %6573 }
0x111e   : > { %v6572_v43 = vpop.permute.xlu1 %6571 }
0x111f   : > { %9907 = vmatprep.mubr.msk.f32.mxu1 %vm922_vm11, %v6572_v43 }
0x1120   : > { %9908 = vmatmul.mubr.msk.f32.vlgmr.msra.gmra.mrb[60].mxu1 %vm922_vm11, %v6574_v37 }
0x1121   : > { %10270 = vmatpush3.bf16.msra.mxu1 %v13839_v53 }
0x1122   : > { %v6576_v13 = vpop.permute.xlu1 %6575  ;;  %10272 = vmatprep.subr.bf16.mxu1 %v13844_v51 }
0x1123   : > { %9910 = vmatprep.mubr.msk.f32.mxu1 %vm922_vm11, %v6576_v13 }
0x1125   : > { %10274 = vmatpush3.bf16.msra.mxu1 %v13844_v51 }
0x1126   : > { %v6578_v33 = vpop.permute.xlu1 %6577  ;;  %10276 = vmatprep.subr.bf16.mxu1 %v13819_v31 }
0x1127   : > { %9911 = vmatmul.mubr.msk.f32.gmra.mrb[62].mxu1 %vm922_vm11, %v6578_v33 }
0x1157   : > { %v12938_v63 = vpop.xlane.xlu0 %6318 }
0x115b   : > { %v12940_v34 = vpop.xlane.xlu0 %6324 }
0x115f   : > { %v12942_v0 = vpop.xlane.xlu0 %6327 }
0x1163   : > { %v7327_v61 = vpop.xlane.xlu0 %7326 }
0x1164   : > { %vm7335_vm15 = vcmp.eq.f32.partialorder %v6201_v18, %v7327_v61 }
0x1165   : > { %v7339_v59 = vsel %vm7335_vm15, %v13827_v40, 48  ;;  %v12945_v43 = vpop.xlane.xlu1 %6321 }
0x1166   : > { %v12948_v37 = vsel %vm1225_vm0, %v7339_v59, 2147483647 }
0x1167   : > { %v7359_v13 = vshra.s32 %v12948_v37, 16  ;;  %v7333_v48 = vpop.xlane.xlu0 %7332 }
0x1168   : > { %vm7337_vm1 = vcmp.eq.f32.partialorder %v6203_v30, %v7333_v48 }
0x1169   : > { %v7341_v33 = vsel %vm7337_vm1, %v13827_v40, 48  ;;  %v7324_v54 = vpop.xlane.xlu1 %7323  ;;  %v12952_v52 = vcvt.s32.f32 %v7359_v13 }
0x116a   : > { %v12955_v8 = vsel %vm1225_vm0, %v7341_v33, 2147483647  ;;  %vm7334_vm2 = vcmp.eq.f32.partialorder %v6200_v20, %v7324_v54 }
0x116b   : > { %v7389_v18 = vshra.s32 %v12955_v8, 16  ;;  %v7338_v61 = vsel %vm7334_vm2, %v13827_v40, 48  ;;  %7362 = vmin.xlane.f32.xlu0 %v12952_v52 }
0x116c   : > { %v12961_v59 = vsel %vm1225_vm0, %v7338_v61, 2147483647 }
0x116d   : > { %v7344_v48 = vshra.s32 %v12961_v59, 16  ;;  %v7330_v30 = vpop.xlane.xlu1 %7329  ;;  %v12964_v51 = vcvt.s32.f32 %v7389_v18 }
0x116e   : > { %vm7336_vm3 = vcmp.eq.f32.partialorder %v6202_v26, %v7330_v30  ;;  %v12981_v26 = vld [vmem:[%s13578_s22] ss:$0 sm:$0xff] }
0x116f   : > { %v7340_v13 = vsel %vm7336_vm3, %v13827_v40, 48  ;;  %7392 = vmin.xlane.f32.xlu0 %v12964_v51  ;;  %v12968_v54 = vcvt.s32.f32 %v7344_v48 }
0x1170   : > { %v12971_v20 = vsel %vm1225_vm0, %v7340_v13, 2147483647 }
0x1171   : > { %v7374_v33 = vshra.s32 %v12971_v20, 16  ;;  %7347 = vmin.xlane.f32.xlu1 %v12968_v54 }
0x1173   : > { %v12975_v61 = vcvt.s32.f32 %v7374_v33 }
0x1175   : > { %7377 = vmin.xlane.f32.xlu1 %v12975_v61 }
0x1178   : > { %v9867_v18 = vpop.f32.mrb[56].mxu1 }
0x1179   : > { %v6051_v48 = vadd.f32 %v12981_v26, %v9867_v18  ;;  %v6045_v30 = vpop.f32.mrb[57].mxu1 }
0x117a   : > { %v6046_v13 = vadd.f32 %v12981_v26, %v6045_v30 }
0x117b   : > { %v6065_v53 = vmax.f32 %v6051_v48, 0.0 }
0x117c   : > { %v6064_v29 = vmax.f32 %v6046_v13, 0.0  ;;  %v9870_v11 = vpop.f32.mrb[58].mxu1 }
0x117d   : > { %v12986_v16 = vmax.f32 %v12592_v9, %v6065_v53  ;;  %v6061_v33 = vadd.f32 %v12981_v26, %v9870_v11  ;;  %v6055_v14 = vpop.f32.mrb[59].mxu1 }
0x117e   : > { %v12990_v19 = vmax.f32 %v12596_v50, %v6064_v29  ;;  %v6056_v60 = vadd.f32 %v12981_v26, %v6055_v14 }
0x117f   : > { %v6073_v18 = vsub.f32 %v12592_v9, %v12986_v16  ;;  %v6085_v40 = vsub.f32 %v6065_v53, %v12986_v16  ;;  %v6067_v30 = vmax.f32 %v6061_v33, 0.0 }
0x1180   : > { %v6072_v48 = vsub.f32 %v12596_v50, %v12990_v19  ;;  %v6084_v13 = vsub.f32 %v6064_v29, %v12990_v19  ;;  %v6066_v57 = vmax.f32 %v6056_v60, 0.0 }
0x1181   : > { %v6078_v47 = vmul.f32 1.442695, %v6073_v18  ;;  %v6090_v11 = vmul.f32 1.442695, %v6085_v40  ;;  %v13000_v56 = vmax.f32 %v12606_v15, %v6067_v30 }
0x1182   : > { %v6076_v42 = vmul.f32 1.442695, %v6072_v48  ;;  %v6088_v28 = vmul.f32 1.442695, %v6084_v13  ;;  %v13003_v14 = vmax.f32 %v12609_v27, %v6066_v57 }
0x1183   : > { %10655 = vpow2.f32 %v6078_v47  ;;  %v6075_v9 = vsub.f32 %v12606_v15, %v13000_v56  ;;  %v6087_v53 = vsub.f32 %v6067_v30, %v13000_v56 }
0x1184   : > { %10657 = vpow2.f32 %v6090_v11  ;;  %v6074_v50 = vsub.f32 %v12609_v27, %v13003_v14  ;;  %v6086_v40 = vsub.f32 %v6066_v57, %v13003_v14  ;;  %v13845_v27 = vmax.f32 %v12728_v45, 0.0 }
0x1185   : > { %10659 = vpow2.f32 %v6076_v42  ;;  %v6082_v60 = vmul.f32 1.442695, %v6075_v9  ;;  %v6094_v29 = vmul.f32 1.442695, %v6087_v53 }
0x1186   : > { %10661 = vpow2.f32 %v6088_v28  ;;  %v6080_v33 = vmul.f32 1.442695, %v6074_v50  ;;  %v6092_v18 = vmul.f32 1.442695, %v6086_v40  ;;  %v13846_v40 = vmax.f32 %v12731_v1, 0.0 }
0x1187   : > { %10663 = vpow2.f32 %v6082_v60 }
0x1188   : > { %10665 = vpow2.f32 %v6094_v29 }
0x1189   : > { %10667 = vpow2.f32 %v6080_v33 }
0x118a   : > { %10669 = vpow2.f32 %v6092_v18 }
0x118d   : > { %v10656_v47 = vpop.eup %10655 }
0x118e   : > { %v10658_v15 = vpop.eup %10657  ;;  %v6097_v30 = vmul.f32 %v10656_v47, %v12621_v12  ;;  %v6105_v48 = vmul.f32 %v10656_v47, %v12625_v58 }
0x118f   : > { %v10660_v13 = vpop.eup %10659  ;;  %v6109_v57 = vmul.f32 %v10658_v15, %v13845_v27 }
0x1190   : > { %v10662_v42 = vpop.eup %10661  ;;  %v13015_v11 = vadd.f32 %v10658_v15, %v6097_v30  ;;  %v6096_v28 = vmul.f32 %v10660_v13, %v12629_v3  ;;  %v6104_v9 = vmul.f32 %v10660_v13, %v12633_v39  ;;  %v13847_v3 = vmax.f32 %v12742_v23, 0.0 }
0x1191   : > { %v10664_v53 = vpop.eup %10663  ;;  %v13019_v50 = vadd.f32 %v6109_v57, %v6105_v48  ;;  %v6108_v60 = vmul.f32 %v10662_v42, %v13846_v40  ;;  %v13848_v13 = vmax.f32 %v12746_v2, 0.0  ;;  %v6330_v57 = vadd.f32 1e-20, %v12945_v43 }
0x1192   : > { %v10666_v12 = vpop.eup %10665  ;;  %v13023_v29 = vadd.f32 %v10662_v42, %v6096_v28  ;;  %v6099_v58 = vmul.f32 %v10664_v53, %v12637_v10  ;;  %v6107_v45 = vmul.f32 %v10664_v53, %v12641_v62  ;;  %v6329_v23 = vadd.f32 1e-20, %v12938_v63 }
0x1193   : > { %v10668_v33 = vpop.eup %10667  ;;  %v13027_v18 = vadd.f32 %v6108_v60, %v6104_v9  ;;  %v6111_v47 = vmul.f32 %v10666_v12, %v13847_v3  ;;  %10671 = vrsqrt.f32 %v6330_v57  ;;  %v6332_v42 = vadd.f32 1e-20, %v12942_v0 }
0x1194   : > { %v10670_v39 = vpop.eup %10669  ;;  %v13031_v15 = vadd.f32 %v10666_v12, %v6099_v58  ;;  %v6098_v30 = vmul.f32 %v10668_v33, %v12645_v17  ;;  %v6106_v1 = vmul.f32 %v10668_v33, %v12647_v41  ;;  %10673 = vrsqrt.f32 %v6329_v23  ;;  %v13054_v33 = vld [vmem:[%s13727_s13] ss:$0 sm:$0xff] }
0x1195   : > { %v13035_v48 = vadd.f32 %v6111_v47, %v6107_v45  ;;  %v6110_v10 = vmul.f32 %v10670_v39, %v13848_v13  ;;  %v6331_v17 = vadd.f32 1e-20, %v12940_v34  ;;  %10675 = vrsqrt.f32 %v6332_v42 }
0x1196   : > { %v13039_v27 = vadd.f32 %v10670_v39, %v6098_v30  ;;  %vm6342_vm4 = vcmp.eq.f32.partialorder %v6330_v57, inf  ;;  %vm6335_vm7 = vcmp.eq.f32.partialorder %v6329_v23, inf  ;;  %v6345_v43 = vand.u32 2147483648, %v6330_v57 }
0x1197   : > { %v13041_v62 = vadd.f32 %v6110_v10, %v6106_v1  ;;  %10677 = vrsqrt.f32 %v6331_v17  ;;  %vm6344_vm9 = vcmp.eq.f32.partialorder %v6330_v57, 0.0  ;;  %v6338_v63 = vand.u32 2147483648, %v6329_v23 }
0x1198   : > { %vm6337_vm10 = vcmp.eq.f32.partialorder %v6329_v23, 0.0  ;;  %vm6356_vm13 = vcmp.eq.f32.partialorder %v6332_v42, inf  ;;  %vm6349_vm14 = vcmp.eq.f32.partialorder %v6331_v17, inf  ;;  %v6359_v30 = vand.u32 2147483648, %v6332_v42 }
0x1199   : > { %vm6358_vm15 = vcmp.eq.f32.partialorder %v6332_v42, 0.0  ;;  %v6352_v13 = vand.u32 2147483648, %v6331_v17  ;;  %vm6351_vm1 = vcmp.eq.f32.partialorder %v6331_v17, 0.0 }
0x119d   : > { %v10672_v41 = vpop.eup %10671 }
0x119e   : > { %v10674_v28 = vpop.eup %10673  ;;  %v6341_v2 = vmul.f32 %v10672_v41, %v6330_v57 }
0x119f   : > { %v6334_v9 = vmul.f32 %v10674_v28, %v6329_v23  ;;  %v10676_v53 = vpop.eup %10675 }
0x11a0   : > { %v6343_v40 = vsel %vm6342_vm4, %v6330_v57, %v6341_v2  ;;  %v6355_v0 = vmul.f32 %v10676_v53, %v6332_v42  ;;  %v7358_v2 = vand.u32 65535, %v12948_v37 }
0x11a1   : > { %v10678_v60 = vpop.eup %10677  ;;  %v6336_v12 = vsel %vm6335_vm7, %v6329_v23, %v6334_v9  ;;  %v13047_v58 = vsel %vm6344_vm9, %v6345_v43, %v6343_v40 }
0x11a2   : > { %v13049_v34 = vsel %vm6337_vm10, %v6338_v63, %v6336_v12  ;;  %v6348_v45 = vmul.f32 %v10678_v60, %v6331_v17  ;;  %v6564_v3 = vmul.f32 %v13054_v33, %v13047_v58  ;;  %v6357_v39 = vsel %vm6356_vm13, %v6332_v42, %v6355_v0 }
0x11a3   : > { %v6563_v47 = vmul.f32 %v13054_v33, %v13049_v34  ;;  %v13061_v57 = vsel %vm6358_vm15, %v6359_v30, %v6357_v39  ;;  %v7388_v12 = vand.u32 65535, %v12955_v8  ;;  %v7360_v0 = vcvt.s32.f32 %v7358_v2 }
0x11a4   : > { %v6350_v1 = vsel %vm6349_vm14, %v6331_v17, %v6348_v45  ;;  %v10379_v10 = vadd.f32 %v6564_v3, %v11374_v22  ;;  %v6566_v60 = vmul.f32 %v13054_v33, %v13061_v57  ;;  %v7343_v45 = vand.u32 65535, %v12961_v59  ;;  %v13088_v59 = vld [vmem:[%s13571_s15] sm:$0x7] }
0x11a5   : > { %v10381_v41 = vadd.f32 %v6563_v47, %v11379_v25  ;;  %v13064_v28 = vsel %vm6351_vm1, %v6352_v13, %v6350_v1  ;;  %v7390_v13 = vcvt.s32.f32 %v7388_v12 }
0x11a6   : > { %v6565_v42 = vmul.f32 %v13054_v33, %v13064_v28  ;;  %v10383_v37 = vadd.f32 %v6566_v60, %v11411_v46 }
0x11a8   : > { %v10385_v47 = vadd.f32 %v6565_v42, %v11416_v55 }
0x11f3   : > { %v9909_v23 = vpop.f32.mrb[60].mxu1 }
0x11f4   : > { %v10380_v9 = vadd.f32 %v10379_v10, %v9909_v23  ;;  %v6653_v53 = vpop.f32.mrb[61].mxu1  ;;  %v7373_v10 = vand.u32 65535, %v12971_v20 }
0x11f5   : > { %v10382_v40 = vadd.f32 %v10381_v41, %v6653_v53 }
0x11f6   : > { %v6677_v17 = vmax.f32 %v10380_v9, 0.0  ;;  %v7345_v9 = vcvt.s32.f32 %v7343_v45 }
0x11f7   : > { %v6676_v43 = vmax.f32 %v10382_v40, 0.0 }
0x11f8   : > { %v13072_v63 = vpop.xlane.xlu0 %7362 }
0x11f9   : > { %vm7364_vm2 = vcmp.eq.f32.partialorder %v12952_v52, %v13072_v63  ;;  %9917 = vmatprep.mubr.msk.f32.mxu0 %vm1821_vm12, %v6676_v43 }
0x11fa   : > { %v9912_v3 = vpop.f32.mrb[62].mxu1  ;;  %9918 = vmatmul.mubr.msk.f32.vlgmr.msra.gmra.mrb[48].mxu0 %vm1821_vm12, %v6677_v17  ;;  %v7365_v39 = vsel %vm7364_vm2, %v7360_v0, inf  ;;  %v13849_v0 = vld [vmem:[#allocation12_spill] sm:$0xff] }
0x11fb   : > { %v10384_v8 = vadd.f32 %v10383_v37, %v9912_v3  ;;  %v6663_v30 = vpop.f32.mrb[63].mxu1  ;;  %7366 = vmin.xlane.f32.xlu0 %v7365_v39  ;;  %9924 = vmatpush3.msk.msra.mxu0 %vm1029_vm5, %v12685_v35 }
0x11fc   : > { %v10386_v1 = vadd.f32 %v10385_v47, %v6663_v30  ;;  %v13083_v52 = vpop.xlane.xlu0 %7392  ;;  %9931 = vmatprep.subr.msk.mxu0 %vm1029_vm5, %v13088_v59  ;;  %v13850_v47 = vld [vmem:[#allocation24_spill] sm:$0xff] }
0x11fd   : > { %vm7394_vm3 = vcmp.eq.f32.partialorder %v12964_v51, %v13083_v52  ;;  %v6679_v53 = vmax.f32 %v10384_v8, 0.0  ;;  %v7375_v51 = vcvt.s32.f32 %v7373_v10  ;;  %v13172_v8 = vld [vmem:[%s13572_s16] ss:$0 sm:$0xff]  ;;  %v13851_v10 = vld [vmem:[#allocation25_spill] sm:$0xff] }
0x11fe   : > { %v6678_v23 = vmax.f32 %v10386_v1, 0.0  ;;  %v7348_v41 = vpop.xlane.xlu1 %7347  ;;  %v7395_v2 = vsel %vm7394_vm3, %v7390_v13, inf  ;;  %v6960_v30 = vmul.f32 %v13172_v8, %v13047_v58 }
0x11ff   : > { %vm7349_vm4 = vcmp.eq.f32.partialorder %v12968_v54, %v7348_v41  ;;  %7396 = vmin.xlane.f32.xlu0 %v7395_v2  ;;  %v7354_v45 = vcvt.f32.s32 %v7348_v41  ;;  %v6959_v2 = vmul.f32 %v13172_v8, %v13049_v34  ;;  %v7369_v34 = vcvt.f32.s32 %v13072_v63 }
0x1200   : > { %9920 = vmatprep.mubr.msk.f32.mxu0 %vm1821_vm12, %v6678_v23  ;;  %v7350_v40 = vsel %vm7349_vm4, %v7345_v9, inf  ;;  %v7399_v63 = vcvt.f32.s32 %v13083_v52 }
0x1201   : > { %7351 = vmin.xlane.f32.xlu1 %v7350_v40  ;;  %9921 = vmatmul.mubr.msk.f32.gmra.mrb[50].mxu0 %vm1821_vm12, %v6679_v53  ;;  %v7355_v41 = vshll.u32 %v7354_v45, 16 }
0x1202   : > { %v13098_v60 = vpop.xlane.xlu1 %7377  ;;  %9925 = vmatprep.mubr.msk.f32.mxu0 %vm1020_vm6, %v12844_v36 }
0x1203   : > { %vm7379_vm7 = vcmp.eq.f32.partialorder %v12975_v61, %v13098_v60 }
0x1204   : > { %v7380_v20 = vsel %vm7379_vm7, %v7375_v51, inf }
0x1205   : > { %7381 = vmin.xlane.f32.xlu1 %v7380_v20  ;;  %9926 = vmatmul.mubr.msk.f32.vlgmr.msra.gmra.mrb[52].mxu0 %vm1020_vm6, %v12840_v7  ;;  %v13127_v7 = vld [vmem:[%s13724_s29] sm:$0x7]  ;;  %v13852_v20 = vld [vmem:[#allocation26_spill] sm:$0xff] }
0x1206   : > { %9932 = vmatpush3.msk.msra.mxu0 %vm1029_vm5, %v13088_v59  ;;  %9928 = vmatprep.mubr.msk.f32.mxu0 %vm1020_vm6, %v12856_v49 }
0x1207   : > { %10284 = vmatprep.subr.bf16.mxu0 %v11487_v24 }
0x1209   : > { %9929 = vmatmul.mubr.msk.f32.gmra.mrb[54].mxu0 %vm1020_vm6, %v12852_v32  ;;  %v13134_v32 = vld [vmem:[%s13568_s12] ss:$0 sm:$0xff] }
0x120a   : > { %9933 = vmatprep.mubr.msk.f32.mxu0 %vm1020_vm6, %v12866_v5 }
0x120d   : > { %9934 = vmatmul.mubr.msk.f32.vlgmr.msra.gmra.mrb[52].mxu0 %vm1020_vm6, %v12878_v21 }
0x120e   : > { %9936 = vmatprep.mubr.msk.f32.mxu0 %vm1020_vm6, %v12882_v44  ;;  %10286 = vmatpush3.bf16.msra.mxu0 %v11487_v24 }
0x120f   : > { %10288 = vmatprep.subr.bf16.mxu0 %v11583_v38 }
0x1211   : > { %9937 = vmatmul.mubr.msk.f32.gmra.mrb[54].mxu0 %vm1020_vm6, %v12893_v4 }
0x1212   : > { %10290 = vmatpush3.bf16.msra.mxu0 %v11583_v38 }
0x1213   : > { %9999 = vmatprep.subr.msk.mxu0 %vm1029_vm5, %v13127_v7 }
0x1288   : > { %v7367_v53 = vpop.xlane.xlu0 %7366 }
0x128e   : > { %v7352_v37 = vpop.xlane.xlu1 %7351 }
0x128f   : > { %v7353_v13 = vcvt.f32.s32 %v7352_v37 }
0x12cd   : > { %v9919_v36 = vpop.f32.mrb[48].mxu0 }
0x12ce   : > { %v13137_v49 = vadd.f32 %v13134_v32, %v9919_v36  ;;  %v6758_v5 = vpop.f32.mrb[49].mxu0 }
0x12cf   : > { %v13140_v21 = vadd.f32 %v13134_v32, %v6758_v5  ;;  %v6962_v5 = vmul.f32 %v13172_v8, %v13061_v57  ;;  %v7397_v57 = vpop.xlane.xlu0 %7396 }
0x12d0   : > { %v6778_v4 = vmax.f32 %v13137_v49, 0.0 }
0x12d1   : > { %v6777_v44 = vmax.f32 %v13140_v21, 0.0 }
0x12d3   : > { %9947 = vmatprep.mubr.msk.f32.mxu1 %vm2136_vm8, %v6777_v44 }
0x12d4   : > { %v9922_v54 = vpop.f32.mrb[50].mxu0  ;;  %9948 = vmatmul.mubr.msk.f32.vlgmr.msra.gmra.mrb[64].mxu1 %vm2136_vm8, %v6778_v4 }
0x12d5   : > { %v13151_v61 = vadd.f32 %v13134_v32, %v9922_v54  ;;  %v6768_v42 = vpop.f32.mrb[51].mxu0  ;;  %10278 = vmatpush3.bf16.msra.mxu1 %v13819_v31 }
0x12d6   : > { %v13155_v43 = vadd.f32 %v13134_v32, %v6768_v42  ;;  %10280 = vmatprep.subr.bf16.mxu1 %v13820_v6  ;;  %v7356_v42 = vadd.s32 %v7355_v41, %v7353_v13 }
0x12d7   : > { %v6780_v17 = vmax.f32 %v13151_v61, 0.0 }
0x12d8   : > { %v6779_v12 = vmax.f32 %v13155_v43, 0.0 }
0x12d9   : > { %10282 = vmatpush3.bf16.msra.mxu1 %v13820_v6 }
0x12da   : > { %9950 = vmatprep.mubr.msk.f32.mxu1 %vm2136_vm8, %v6779_v12  ;;  %10292 = vmatprep.subr.bf16.mxu1 %v13849_v0 }
0x12db   : > { %9951 = vmatmul.mubr.msk.f32.gmra.mrb[66].mxu1 %vm2136_vm8, %v6780_v17 }
0x12e0   : > { %v9935_v3 = vpop.f32.mrb[52].mxu0 }
0x12e1   : > { %v10387_v39 = vadd.f32 %v9935_v3, %v13850_v47  ;;  %v6936_v1 = vpop.f32.mrb[53].mxu0  ;;  %v13853_v3 = vld [vmem:[#allocation27_spill] sm:$0xff] }
0x12e2   : > { %v10388_v23 = vadd.f32 %v6936_v1, %v13851_v10  ;;  %v6961_v1 = vmul.f32 %v13172_v8, %v13064_v28  ;;  %v7370_v28 = vshll.u32 %v7369_v34, 16 }
0x12e3   : > { %v6964_v9 = vadd.f32 %v10387_v39, %v6960_v30  ;;  %v7382_v39 = vpop.xlane.xlu1 %7381 }
0x12e4   : > { %v6963_v40 = vadd.f32 %v10388_v23, %v6959_v2  ;;  %v9938_v51 = vpop.f32.mrb[54].mxu0  ;;  %v7384_v23 = vcvt.f32.s32 %v13098_v60  ;;  %v7383_v13 = vcvt.f32.s32 %v7382_v39 }
0x12e5   : > { %v10389_v36 = vadd.f32 %v9938_v51, %v13852_v20  ;;  %v6946_v54 = vpop.f32.mrb[55].mxu0  ;;  %v6968_v45 = vmax.f32 %v6964_v9, 0.0  ;;  %v7368_v51 = vcvt.f32.s32 %v7367_v53  ;;  %v7398_v53 = vcvt.f32.s32 %v7397_v57 }
0x12e6   : > { %v6967_v58 = vmax.f32 %v6963_v40, 0.0  ;;  %v10390_v37 = vadd.f32 %v6946_v54, %v13853_v3  ;;  %v13854_v40 = vld [vmem:[#allocation11_spill] sm:$0xff]  ;;  %v7385_v60 = vshll.u32 %v7384_v23, 16  ;;  %v13856_v54 = vmov 0.0  }
0x12e7   : > { %v6966_v30 = vadd.f32 %v10389_v36, %v6962_v5  ;;  %vm7402_vm9 = vcmp.eq.s32.totalorder %v13854_v40, %v7356_v42  ;;  %v13855_v36 = vld [vmem:[#allocation13_spill] sm:$0xff]  ;;  %v7371_v5 = vadd.s32 %v7370_v28, %v7368_v51  ;;  %v13857_v42 = vld [vmem:[#allocation14_spill] sm:$0xff]  ;;  %v13216_v23 = vld [vmem:[%s13576_s20] ss:$0 sm:$0xff] }
0x12e8   : > { %v6965_v2 = vadd.f32 %v10390_v37, %v6961_v1  ;;  %9961 = vmatprep.mubr.msk.f32.mxu1 %vm2136_vm8, %v6967_v58  ;;  %v8946_v58 = vsel %vm7402_vm9, 1.0, %v13856_v54  ;;  %v7386_v37 = vadd.s32 %v7385_v60, %v7383_v13  ;;  %v13858_v1 = vld [vmem:[#allocation15_spill] sm:$0xff]  ;;  %v13859_v60 = vld [vmem:[#allocation38_spill] sm:$0xff] }
0x12e9   : > { %9962 = vmatmul.mubr.msk.f32.vlgmr.msra.gmra.mrb[64].mxu1 %vm2136_vm8, %v6968_v45  ;;  %v6970_v9 = vmax.f32 %v6966_v30, 0.0  ;;  %vm7403_vm10 = vcmp.eq.s32.totalorder %v13854_v40, %v7371_v5 }
0x12ea   : > { %v6969_v41 = vmax.f32 %v6965_v2, 0.0  ;;  %10294 = vmatpush3.bf16.msra.mxu1 %v13849_v0  ;;  %v7400_v0 = vshll.u32 %v7399_v63, 16  ;;  %vm7404_vm13 = vcmp.eq.s32.totalorder %v13854_v40, %v7386_v37  ;;  %v8947_v34 = vsel %vm7403_vm10, 1.0, %v13856_v54  ;;  %v10755_v37 = vld [vmem:[%s11034_s27] sm:$0xff] }
0x12eb   : > { %10296 = vmatprep.subr.bf16.mxu1 %v13855_v36  ;;  %v8948_v39 = vsel %vm7404_vm13, 1.0, %v13856_v54 }
0x12ec   : > { %9964 = vmatprep.mubr.msk.f32.mxu1 %vm2136_vm8, %v6969_v41  ;;  %v7401_v52 = vadd.s32 %v7400_v0, %v7398_v53 }
0x12ed   : > { %9965 = vmatmul.mubr.msk.f32.gmra.mrb[66].mxu1 %vm2136_vm8, %v6970_v9 }
0x12ee   : > { %10298 = vmatpush3.bf16.msra.mxu1 %v13855_v36  ;;  %9993 = vmatprep.mubr.msk.f32.mxu1 %vm1225_vm0, %v8946_v58  ;;  %vm7405_vm14 = vcmp.eq.s32.totalorder %v13854_v40, %v7401_v52  ;;  %v13860_v58 = vld [vmem:[#allocation28_spill] sm:$0xff] }
0x12ef   : > { %10300 = vmatprep.subr.bf16.mxu1 %v13857_v42  ;;  %v8949_v45 = vsel %vm7405_vm14, 1.0, %v13856_v54 }
0x12f2   : > { %10302 = vmatpush3.bf16.msra.mxu1 %v13857_v42  ;;  %v10756_v42 = vld [vmem:[%s11034_s27 + $0x8] sm:$0xff] }
0x12f3   : > { %10304 = vmatprep.subr.bf16.mxu1 %v13858_v1 }
0x12f5   : > { %9994 = vmatmul.mubr.msk.f32.vlgmr.msra.gmra.mrb[68].mxu1 %vm1225_vm0, %v8947_v34 }
0x12f6   : > { %9996 = vmatprep.mubr.msk.f32.mxu1 %vm1225_vm0, %v8948_v39  ;;  %10306 = vmatpush3.bf16.msra.mxu1 %v13858_v1  ;;  %v10757_v1 = vld [vmem:[%s11034_s27 + $0x10] sm:$0xff]  ;;  %v10758_v39 = vld [vmem:[%s11034_s27 + $0x18] sm:$0xff]  ;;  %s10767_s27 = scalar_lea.vmem %s10766_s4, 1024 }
0x12f7   : > { %10033 = vmatprep.subr.msk.mxu1 %vm1029_vm5, %v12685_v35  ;;  %p10769_p2 = scmp.lt.s32.totalorder %s10767_s27, %s10761_s6 }
0x12f9   : > { %9997 = vmatmul.mubr.msk.f32.gmra.mrb[70].mxu1 %vm1225_vm0, %v8949_v45  ;;  %p10770_p3 = por %p10769_p2, %p10768_p1 }
0x12fb   : > { %p10771_p5 = pnand %p10770_p3, %p10764_p0 }
0x13bc   : > { %v9963_v30 = vpop.f32.mrb[64].mxu1 }
0x13bd   : > { %v7166_v2 = vadd.f32 %v13216_v23, %v9963_v30  ;;  %v7146_v51 = vpop.f32.mrb[65].mxu1  ;;  %v13861_v30 = vld [vmem:[#allocation16_spill] sm:$0xff] }
0x13be   : > { %v7165_v57 = vadd.f32 %v13216_v23, %v7146_v51 }
0x13bf   : > { %v7170_v40 = vmax.f32 %v7166_v2, 0.0 }
0x13c0   : > { %v7169_v13 = vmax.f32 %v7165_v57, 0.0  ;;  %v9966_v41 = vpop.f32.mrb[66].mxu1 }
0x13c1   : > { %v7168_v35 = vadd.f32 %v13216_v23, %v9966_v41  ;;  %v7156_v28 = vpop.f32.mrb[67].mxu1 }
0x13c2   : > { %v7167_v63 = vadd.f32 %v13216_v23, %v7156_v28  ;;  %9975 = vmatprep.mubr.msk.f32.mxu0 %vm2136_vm8, %v7169_v13 }
0x13c3   : > { %9976 = vmatmul.mubr.msk.f32.vlgmr.msra.gmra.mrb[56].mxu0 %vm2136_vm8, %v7170_v40  ;;  %v7172_v36 = vmax.f32 %v7168_v35, 0.0 }
0x13c4   : > { %v7171_v9 = vmax.f32 %v7167_v63, 0.0  ;;  %10000 = vmatpush3.msk.msra.mxu0 %vm1029_vm5, %v13127_v7 }
0x13c5   : > { %10007 = vmatprep.subr.msk.mxu0 %vm1029_vm5, %v13859_v60 }
0x13c6   : > { %9978 = vmatprep.mubr.msk.f32.mxu0 %vm2136_vm8, %v7171_v9 }
0x13c7   : > { %9979 = vmatmul.mubr.msk.f32.gmra.mrb[58].mxu0 %vm2136_vm8, %v7172_v36 }
0x13c8   : > { %v13230_v5 = vpop.f32.mrb[68].mxu1 }
0x13c9   : > { %7775 = vrot.lane.b32.xlu0 %v13230_v5, %s13744_s24  ;;  %v13234_v53 = vpop.f32.mrb[69].mxu1  ;;  %v13263_v52 = vsub.f32 %v13230_v5, %v10756_v42 }
0x13ca   : > { %7773 = vrot.lane.b32.xlu1 %v13234_v53, %s13744_s24  ;;  %10001 = vmatprep.mubr.msk.f32.mxu0 %vm1020_vm6, %v13234_v53  ;;  %v13251_v0 = vsub.f32 %v13234_v53, %v10755_v37 }
0x13cb   : > { %10002 = vmatmul.mubr.msk.f32.vlgmr.msra.gmra.mrb[60].mxu0 %vm1020_vm6, %v13230_v5  ;;  %v7516_v35 = vmul.f32 %v13263_v52, %v13263_v52 }
0x13cc   : > { %v13242_v7 = vpop.f32.mrb[70].mxu1  ;;  %10008 = vmatpush3.msk.msra.mxu0 %vm1029_vm5, %v13859_v60  ;;  %v7515_v2 = vmul.f32 %v13251_v0, %v13251_v0  ;;  %v13862_v60 = vld [vmem:[#allocation17_spill] sm:$0xff] }
0x13cd   : > { %v13246_v54 = vpop.f32.mrb[71].mxu1  ;;  %10015 = vmatprep.subr.mxu0 %v13860_v58  ;;  %v13278_v45 = vsub.f32 %v13242_v7, %v10758_v39  ;;  %v7522_v28 = vsel %vm1020_vm6, %v7516_v35, 0.0 }
0x13ce   : > { %7777 = vrot.lane.b32.xlu1 %v13246_v54, %s13744_s24  ;;  %10004 = vmatprep.mubr.msk.f32.mxu0 %vm1020_vm6, %v13246_v54  ;;  %v13267_v34 = vsub.f32 %v13246_v54, %v10757_v1  ;;  %v7519_v51 = vsel %vm1020_vm6, %v7515_v2, 0.0 }
0x13cf   : > { %10005 = vmatmul.mubr.msk.f32.gmra.mrb[62].mxu0 %vm1020_vm6, %v13242_v7  ;;  %v7518_v41 = vmul.f32 %v13278_v45, %v13278_v45 }
0x13d0   : > { %10009 = vmatprep.mubr.msk.f32.mxu0 %vm1020_vm6, %v13251_v0  ;;  %v7517_v57 = vmul.f32 %v13267_v34, %v13267_v34 }
0x13d1   : > { %v7528_v40 = vsel %vm1020_vm6, %v7518_v41, 0.0 }
0x13d2   : > { %7779 = vrot.lane.b32.xlu1 %v13242_v7, %s13744_s24  ;;  %v7525_v13 = vsel %vm1020_vm6, %v7517_v57, 0.0 }
0x13d3   : > { %10010 = vmatmul.mubr.msk.f32.vlgmr.msra.gmra.mrb[60].mxu0 %vm1020_vm6, %v13263_v52 }
0x13d4   : > { %10012 = vmatprep.mubr.msk.f32.mxu0 %vm1020_vm6, %v13267_v34  ;;  %10016 = vmatpush3.msra.mxu0 %v13860_v58 }
0x13d5   : > { %10308 = vmatprep.subr.bf16.mxu0 %v13861_v30 }
0x13d7   : > { %10013 = vmatmul.mubr.msk.f32.gmra.mrb[62].mxu0 %vm1020_vm6, %v13278_v45 }
0x13e8   : > { %7520 = vadd.xlane.f32.xlu0 %v7519_v51 }
0x13ec   : > { %7526 = vadd.xlane.f32.xlu0 %v7525_v13 }
0x13f0   : > { %7529 = vadd.xlane.f32.xlu0 %v7528_v40 }
0x13f6   : > { %7523 = vadd.xlane.f32.xlu1 %v7522_v28 }
0x143b   : > { %v7776_v9 = vpop.permute.xlu0 %7775 }
0x143c   : > { %v7774_v63 = vpop.permute.xlu1 %7773 }
0x143d   : > { %10017 = vmatprep.mubr.msk.f32.mxu0 %vm922_vm11, %v7774_v63 }
0x143e   : > { %10018 = vmatmul.mubr.msk.f32.vlgmr.msra.gmra.mrb[60].mxu0 %vm922_vm11, %v7776_v9 }
0x143f   : > { %10310 = vmatpush3.bf16.msra.mxu0 %v13861_v30 }
0x1440   : > { %v7778_v36 = vpop.permute.xlu1 %7777  ;;  %10312 = vmatprep.subr.bf16.mxu0 %v13862_v60 }
0x1441   : > { %10020 = vmatprep.mubr.msk.f32.mxu0 %vm922_vm11, %v7778_v36 }
0x1443   : > { %10314 = vmatpush3.bf16.msra.mxu0 %v13862_v60 }
0x1444   : > { %v7780_v58 = vpop.permute.xlu1 %7779  ;;  %10316 = vmatprep.subr.bf16.mxu0 %v13819_v31 }
0x1445   : > { %10021 = vmatmul.mubr.msk.f32.gmra.mrb[62].mxu0 %vm922_vm11, %v7780_v58 }
0x1496   : > { %v9977_v37 = vpop.f32.mrb[56].mxu0 }
0x1497   : > { %v7257_v42 = vadd.f32 %v12981_v26, %v9977_v37  ;;  %v7251_v1 = vpop.f32.mrb[57].mxu0 }
0x1498   : > { %v7252_v39 = vadd.f32 %v12981_v26, %v7251_v1 }
0x1499   : > { %v7271_v2 = vmax.f32 %v7257_v42, 0.0 }
0x149a   : > { %v7270_v30 = vmax.f32 %v7252_v39, 0.0  ;;  %v9980_v51 = vpop.f32.mrb[58].mxu0 }
0x149b   : > { %v13306_v57 = vmax.f32 %v12986_v16, %v7271_v2  ;;  %v7267_v13 = vadd.f32 %v12981_v26, %v9980_v51  ;;  %v7261_v41 = vpop.f32.mrb[59].mxu0 }
0x149c   : > { %v13310_v40 = vmax.f32 %v12990_v19, %v7270_v30  ;;  %v7262_v35 = vadd.f32 %v12981_v26, %v7261_v41 }
0x149d   : > { %v7279_v28 = vsub.f32 %v12986_v16, %v13306_v57  ;;  %v7291_v63 = vsub.f32 %v7271_v2, %v13306_v57  ;;  %v7273_v9 = vmax.f32 %v7267_v13, 0.0 }
0x149e   : > { %v7278_v36 = vsub.f32 %v12990_v19, %v13310_v40  ;;  %v7290_v60 = vsub.f32 %v7270_v30, %v13310_v40  ;;  %v7272_v58 = vmax.f32 %v7262_v35, 0.0 }
0x149f   : > { %v7284_v37 = vmul.f32 1.442695, %v7279_v28  ;;  %v7296_v42 = vmul.f32 1.442695, %v7291_v63  ;;  %v13320_v1 = vmax.f32 %v13000_v56, %v7273_v9 }
0x14a0   : > { %v7282_v39 = vmul.f32 1.442695, %v7278_v36  ;;  %v7294_v51 = vmul.f32 1.442695, %v7290_v60  ;;  %v13323_v26 = vmax.f32 %v13003_v14, %v7272_v58 }
0x14a1   : > { %10679 = vpow2.f32 %v7284_v37  ;;  %v7281_v16 = vsub.f32 %v13000_v56, %v13320_v1  ;;  %v7293_v2 = vsub.f32 %v7273_v9, %v13320_v1 }
0x14a2   : > { %10681 = vpow2.f32 %v7296_v42  ;;  %v7280_v19 = vsub.f32 %v13003_v14, %v13323_v26  ;;  %v7292_v30 = vsub.f32 %v7272_v58, %v13323_v26 }
0x14a3   : > { %10683 = vpow2.f32 %v7282_v39  ;;  %v7288_v13 = vmul.f32 1.442695, %v7281_v16  ;;  %v7300_v41 = vmul.f32 1.442695, %v7293_v2 }
0x14a4   : > { %10685 = vpow2.f32 %v7294_v51  ;;  %v7286_v35 = vmul.f32 1.442695, %v7280_v19  ;;  %v7298_v28 = vmul.f32 1.442695, %v7292_v30 }
0x14a5   : > { %10687 = vpow2.f32 %v7288_v13 }
0x14a6   : > { %10689 = vpow2.f32 %v7300_v41 }
0x14a7   : > { %10691 = vpow2.f32 %v7286_v35 }
0x14a8   : > { %10693 = vpow2.f32 %v7298_v28  ;;  %v7521_v28 = vpop.xlane.xlu0 %7520 }
0x14ab   : > { %v10680_v63 = vpop.eup %10679 }
0x14ac   : > { %v10682_v56 = vpop.eup %10681  ;;  %v7303_v9 = vmul.f32 %v10680_v63, %v13015_v11  ;;  %v7311_v36 = vmul.f32 %v10680_v63, %v13019_v50  ;;  %v7524_v63 = vpop.xlane.xlu1 %7523 }
0x14ad   : > { %v10684_v60 = vpop.eup %10683  ;;  %v7315_v14 = vmul.f32 %v10682_v56, %v6778_v4  ;;  %v7527_v61 = vpop.xlane.xlu0 %7526 }
0x14ae   : > { %v10686_v58 = vpop.eup %10685  ;;  %v13335_v37 = vadd.f32 %v10682_v56, %v7303_v9  ;;  %v7302_v42 = vmul.f32 %v10684_v60, %v13023_v29  ;;  %v7310_v39 = vmul.f32 %v10684_v60, %v13027_v18  ;;  %v7531_v56 = vadd.f32 1e-20, %v7521_v28 }
0x14af   : > { %v10688_v51 = vpop.eup %10687  ;;  %v13339_v16 = vadd.f32 %v7315_v14, %v7311_v36  ;;  %v7314_v2 = vmul.f32 %v10686_v58, %v6777_v44  ;;  %v7533_v36 = vadd.f32 1e-20, %v7527_v61 }
0x14b0   : > { %v10690_v11 = vpop.eup %10689  ;;  %v13343_v19 = vadd.f32 %v10686_v58, %v7302_v42  ;;  %v7305_v50 = vmul.f32 %v10688_v51, %v13031_v15  ;;  %v7313_v49 = vmul.f32 %v10688_v51, %v13035_v48  ;;  %vm7537_vm11 = vcmp.eq.f32.partialorder %v7531_v56, inf }
0x14b1   : > { %v10692_v4 = vpop.eup %10691  ;;  %v13347_v30 = vadd.f32 %v7314_v2, %v7310_v39  ;;  %v7317_v29 = vmul.f32 %v10690_v11, %v6780_v17  ;;  %v7532_v17 = vadd.f32 1e-20, %v7524_v63  ;;  %v7530_v9 = vpop.xlane.xlu0 %7529  ;;  %v7540_v2 = vand.u32 2147483648, %v7531_v56 }
0x14b2   : > { %v10694_v18 = vpop.eup %10693  ;;  %v13351_v13 = vadd.f32 %v10690_v11, %v7305_v50  ;;  %v7304_v41 = vmul.f32 %v10692_v4, %v13039_v27  ;;  %v7312_v21 = vmul.f32 %v10692_v4, %v13041_v62  ;;  %v7534_v27 = vadd.f32 1e-20, %v7530_v9 }
0x14b3   : > { %v13355_v44 = vadd.f32 %v7317_v29, %v7313_v49  ;;  %v7316_v15 = vmul.f32 %v10694_v18, %v6779_v12  ;;  %10695 = vrsqrt.f32 %v7532_v17  ;;  %vm7544_vm0 = vcmp.eq.f32.partialorder %v7532_v17, inf }
0x14b4   : > { %v13359_v35 = vadd.f32 %v10694_v18, %v7304_v41  ;;  %10697 = vrsqrt.f32 %v7531_v56  ;;  %v7547_v39 = vand.u32 2147483648, %v7532_v17  ;;  %vm7546_vm15 = vcmp.eq.f32.partialorder %v7532_v17, 0.0 }
0x14b5   : > { %v13361_v48 = vadd.f32 %v7316_v15, %v7312_v21  ;;  %10699 = vrsqrt.f32 %v7534_v27  ;;  %vm7539_vm1 = vcmp.eq.f32.partialorder %v7531_v56, 0.0  ;;  %vm7558_vm2 = vcmp.eq.f32.partialorder %v7534_v27, inf }
0x14b6   : > { %10701 = vrsqrt.f32 %v7533_v36  ;;  %vm7551_vm3 = vcmp.eq.f32.partialorder %v7533_v36, inf  ;;  %v7561_v21 = vand.u32 2147483648, %v7534_v27  ;;  %vm7560_vm4 = vcmp.eq.f32.partialorder %v7534_v27, 0.0 }
0x14b7   : > { %v7554_v28 = vand.u32 2147483648, %v7533_v36  ;;  %vm7553_vm7 = vcmp.eq.f32.partialorder %v7533_v36, 0.0 }
0x14bd   : > { %v10696_v62 = vpop.eup %10695 }
0x14be   : > { %v10698_v60 = vpop.eup %10697  ;;  %v7543_v43 = vmul.f32 %v10696_v62, %v7532_v17 }
0x14bf   : > { %v7536_v12 = vmul.f32 %v10698_v60, %v7531_v56  ;;  %v10700_v14 = vpop.eup %10699 }
0x14c0   : > { %v7545_v58 = vsel %vm7544_vm0, %v7532_v17, %v7543_v43  ;;  %v10702_v42 = vpop.eup %10701  ;;  %v7557_v50 = vmul.f32 %v10700_v14, %v7534_v27 }
0x14c1   : > { %v7538_v51 = vsel %vm7537_vm11, %v7531_v56, %v7536_v12  ;;  %v13363_v11 = vsel %vm7546_vm15, %v7547_v39, %v7545_v58  ;;  %v7550_v4 = vmul.f32 %v10702_v42, %v7533_v36 }
0x14c2   : > { %v13365_v49 = vsel %vm7539_vm1, %v7540_v2, %v7538_v51  ;;  %v7766_v29 = vmul.f32 %v13054_v33, %v13363_v11  ;;  %v7559_v41 = vsel %vm7558_vm2, %v7534_v27, %v7557_v50  ;;  %v10759_v51 = vld [vmem:[%s13570_s14] sm:$0x7] }
0x14c3   : > { %v7765_v18 = vmul.f32 %v13054_v33, %v13365_v49  ;;  %v7552_v15 = vsel %vm7551_vm3, %v7533_v36, %v7550_v4  ;;  %v13372_v61 = vsel %vm7560_vm4, %v7561_v21, %v7559_v41 }
0x14c4   : > { %v10391_v63 = vadd.f32 %v7766_v29, %v11374_v22  ;;  %v13375_v9 = vsel %vm7553_vm7, %v7554_v28, %v7552_v15  ;;  %v7768_v12 = vmul.f32 %v13054_v33, %v13372_v61  ;;  %v8164_v28 = vmul.f32 %v13172_v8, %v13372_v61 }
0x14c5   : > { %v10393_v56 = vadd.f32 %v7765_v18, %v11379_v25  ;;  %v7767_v27 = vmul.f32 %v13054_v33, %v13375_v9 }
0x14c6   : > { %v10395_v22 = vadd.f32 %v7768_v12, %v11411_v46 }
0x14c7   : > { %v10397_v25 = vadd.f32 %v7767_v27, %v11416_v55 }
0x1511   : > { %v10019_v17 = vpop.f32.mrb[60].mxu0 }
0x1512   : > { %v10392_v62 = vadd.f32 %v10391_v63, %v10019_v17  ;;  %v7855_v60 = vpop.f32.mrb[61].mxu0 }
0x1513   : > { %v10394_v43 = vadd.f32 %v10393_v56, %v7855_v60 }
0x1514   : > { %v7879_v58 = vmax.f32 %v10392_v62, 0.0 }
0x1515   : > { %v7878_v14 = vmax.f32 %v10394_v43, 0.0 }
0x1517   : > { %10027 = vmatprep.mubr.msk.f32.mxu1 %vm1821_vm12, %v7878_v14 }
0x1518   : > { %v10022_v36 = vpop.f32.mrb[62].mxu0  ;;  %10028 = vmatmul.mubr.msk.f32.vlgmr.msra.gmra.mrb[72].mxu1 %vm1821_vm12, %v7879_v58 }
0x1519   : > { %v10396_v42 = vadd.f32 %v10395_v22, %v10022_v36  ;;  %v7865_v39 = vpop.f32.mrb[63].mxu0  ;;  %10034 = vmatpush3.msk.msra.mxu1 %vm1029_vm5, %v10759_v51 }
0x151a   : > { %v10398_v33 = vadd.f32 %v10397_v25, %v7865_v39  ;;  %10041 = vmatprep.subr.msk.mxu1 %vm1029_vm5, %v13088_v59 }
0x151b   : > { %v7881_v50 = vmax.f32 %v10396_v42, 0.0  ;;  %v10760_v42 = vld [vmem:[%s13578_s22] ss:$0 sm:$0xff] }
0x151c   : > { %v7880_v2 = vmax.f32 %v10398_v33, 0.0 }
0x151e   : > { %10030 = vmatprep.mubr.msk.f32.mxu1 %vm1821_vm12, %v7880_v2 }
0x151f   : > { %10031 = vmatmul.mubr.msk.f32.gmra.mrb[74].mxu1 %vm1821_vm12, %v7881_v50 }
0x1520   : > { %10035 = vmatprep.mubr.msk.f32.mxu1 %vm1020_vm6, %v13234_v53 }
0x1523   : > { %10036 = vmatmul.mubr.msk.f32.vlgmr.msra.gmra.mrb[76].mxu1 %vm1020_vm6, %v13230_v5 }
0x1524   : > { %10042 = vmatpush3.msk.msra.mxu1 %vm1029_vm5, %v13088_v59  ;;  %10038 = vmatprep.mubr.msk.f32.mxu1 %vm1020_vm6, %v13246_v54 }
0x1525   : > { %10324 = vmatprep.subr.bf16.mxu1 %v11487_v24 }
0x1527   : > { %10039 = vmatmul.mubr.msk.f32.gmra.mrb[78].mxu1 %vm1020_vm6, %v13242_v7 }
0x1528   : > { %10043 = vmatprep.mubr.msk.f32.mxu1 %vm1020_vm6, %v13251_v0 }
0x152b   : > { %10044 = vmatmul.mubr.msk.f32.vlgmr.msra.gmra.mrb[76].mxu1 %vm1020_vm6, %v13263_v52 }
0x152c   : > { %10046 = vmatprep.mubr.msk.f32.mxu1 %vm1020_vm6, %v13267_v34  ;;  %10326 = vmatpush3.bf16.msra.mxu1 %v11487_v24 }
0x152d   : > { %10328 = vmatprep.subr.bf16.mxu1 %v11583_v38 }
0x152f   : > { %10047 = vmatmul.mubr.msk.f32.gmra.mrb[78].mxu1 %vm1020_vm6, %v13278_v45  ;;  %v8162_v45 = vmul.f32 %v13172_v8, %v13363_v11  ;;  %v8163_v11 = vmul.f32 %v13172_v8, %v13375_v9 }
0x1530   : > { %10330 = vmatpush3.bf16.msra.mxu1 %v11583_v38 }
0x15eb   : > { %v10029_v46 = vpop.f32.mrb[72].mxu1 }
0x15ec   : > { %v13416_v55 = vadd.f32 %v13134_v32, %v10029_v46  ;;  %v7960_v59 = vpop.f32.mrb[73].mxu1 }
0x15ed   : > { %v13419_v5 = vadd.f32 %v13134_v32, %v7960_v59 }
0x15ee   : > { %v7980_v7 = vmax.f32 %v13416_v55, 0.0 }
0x15ef   : > { %v7979_v53 = vmax.f32 %v13419_v5, 0.0 }
0x15f1   : > { %10057 = vmatprep.mubr.msk.f32.mxu0 %vm2136_vm8, %v7979_v53 }
0x15f2   : > { %v10032_v24 = vpop.f32.mrb[74].mxu1  ;;  %10058 = vmatmul.mubr.msk.f32.vlgmr.msra.gmra.mrb[64].mxu0 %vm2136_vm8, %v7980_v7 }
0x15f3   : > { %v13430_v38 = vadd.f32 %v13134_v32, %v10032_v24  ;;  %v7970_v54 = vpop.f32.mrb[75].mxu1  ;;  %10318 = vmatpush3.bf16.msra.mxu0 %v13819_v31 }
0x15f4   : > { %v13434_v0 = vadd.f32 %v13134_v32, %v7970_v54  ;;  %10320 = vmatprep.subr.bf16.mxu0 %v13820_v6 }
0x15f5   : > { %v7982_v34 = vmax.f32 %v13430_v38, 0.0 }
0x15f6   : > { %v7981_v52 = vmax.f32 %v13434_v0, 0.0 }
0x15f7   : > { %10322 = vmatpush3.bf16.msra.mxu0 %v13820_v6  ;;  %v8161_v6 = vmul.f32 %v13172_v8, %v13365_v49 }
0x15f8   : > { %10060 = vmatprep.mubr.msk.f32.mxu0 %vm2136_vm8, %v7981_v52 }
0x15f9   : > { %10061 = vmatmul.mubr.msk.f32.gmra.mrb[66].mxu0 %vm2136_vm8, %v7982_v34 }
0x15fe   : > { %v10045_v31 = vpop.f32.mrb[76].mxu1 }
0x15ff   : > { %v10399_v32 = vadd.f32 %v10045_v31, %v13850_v47  ;;  %v8138_v4 = vpop.f32.mrb[77].mxu1 }
0x1600   : > { %v10400_v29 = vadd.f32 %v8138_v4, %v13851_v10 }
0x1601   : > { %v8166_v18 = vadd.f32 %v10399_v32, %v8162_v45 }
0x1602   : > { %v8165_v41 = vadd.f32 %v10400_v29, %v8161_v6  ;;  %v10048_v21 = vpop.f32.mrb[78].mxu1 }
0x1603   : > { %v10401_v15 = vadd.f32 %v10048_v21, %v13852_v20  ;;  %v8148_v63 = vpop.f32.mrb[79].mxu1  ;;  %v8170_v56 = vmax.f32 %v8166_v18, 0.0 }
0x1604   : > { %v8169_v17 = vmax.f32 %v8165_v41, 0.0  ;;  %v10402_v47 = vadd.f32 %v8148_v63, %v13853_v3 }
0x1605   : > { %v8168_v10 = vadd.f32 %v10401_v15, %v8164_v28 }
0x1606   : > { %v8167_v62 = vadd.f32 %v10402_v47, %v8163_v11  ;;  %10071 = vmatprep.mubr.msk.f32.mxu0 %vm2136_vm8, %v8169_v17 }
0x1607   : > { %10072 = vmatmul.mubr.msk.f32.vlgmr.msra.gmra.mrb[64].mxu0 %vm2136_vm8, %v8170_v56  ;;  %v8172_v60 = vmax.f32 %v8168_v10, 0.0 }
0x1608   : > { %v8171_v49 = vmax.f32 %v8167_v62, 0.0 }
0x160a   : > { %10074 = vmatprep.mubr.msk.f32.mxu0 %vm2136_vm8, %v8171_v49 }
0x160b   : > { %10075 = vmatmul.mubr.msk.f32.gmra.mrb[66].mxu0 %vm2136_vm8, %v8172_v60 }
0x16da   : > { %v10073_v20 = vpop.f32.mrb[64].mxu0 }
0x16db   : > { %v8368_v61 = vadd.f32 %v13216_v23, %v10073_v20  ;;  %v8348_v3 = vpop.f32.mrb[65].mxu0 }
0x16dc   : > { %v8367_v43 = vadd.f32 %v13216_v23, %v8348_v3 }
0x16dd   : > { %v8372_v12 = vmax.f32 %v8368_v61, 0.0 }
0x16de   : > { %v8371_v8 = vmax.f32 %v8367_v43, 0.0  ;;  %v10076_v9 = vpop.f32.mrb[66].mxu0 }
0x16df   : > { %v8370_v27 = vadd.f32 %v13216_v23, %v10076_v9  ;;  %v8358_v14 = vpop.f32.mrb[67].mxu0 }
0x16e0   : > { %v8369_v58 = vadd.f32 %v13216_v23, %v8358_v14  ;;  %10085 = vmatprep.mubr.msk.f32.mxu1 %vm2136_vm8, %v8371_v8 }
0x16e1   : > { %10086 = vmatmul.mubr.msk.f32.vlgmr.msra.gmra.mrb[80].mxu1 %vm2136_vm8, %v8372_v12  ;;  %v8374_v36 = vmax.f32 %v8370_v27, 0.0 }
0x16e2   : > { %v8373_v22 = vmax.f32 %v8369_v58, 0.0 }
0x16e4   : > { %10088 = vmatprep.mubr.msk.f32.mxu1 %vm2136_vm8, %v8373_v22 }
0x16e5   : > { %10089 = vmatmul.mubr.msk.f32.gmra.mrb[82].mxu1 %vm2136_vm8, %v8374_v36 }
0x17b4   : > { %v10087_v25 = vpop.f32.mrb[80].mxu1 }
0x17b5   : > { %v8459_v39 = vadd.f32 %v10760_v42, %v10087_v25  ;;  %v8453_v51 = vpop.f32.mrb[81].mxu1 }
0x17b6   : > { %v8454_v33 = vadd.f32 %v10760_v42, %v8453_v51 }
0x17b7   : > { %v8473_v2 = vmax.f32 %v8459_v39, 0.0 }
0x17b8   : > { %v8472_v23 = vmax.f32 %v8454_v33, 0.0  ;;  %v10090_v50 = vpop.f32.mrb[82].mxu1 }
0x17b9   : > { %v8477_v46 = vmax.f32 %v13306_v57, %v8473_v2  ;;  %v8469_v59 = vadd.f32 %v10760_v42, %v10090_v50  ;;  %v8463_v24 = vpop.f32.mrb[83].mxu1 }
0x17ba   : > { %v8476_v54 = vmax.f32 %v13310_v40, %v8472_v23  ;;  %v8464_v31 = vadd.f32 %v10760_v42, %v8463_v24 }
0x17bb   : > { %v8481_v32 = vsub.f32 %v13306_v57, %v8477_v46  ;;  %v8493_v45 = vsub.f32 %v8473_v2, %v8477_v46  ;;  %v8475_v4 = vmax.f32 %v8469_v59, 0.0 }
0x17bc   : > { %v8480_v29 = vsub.f32 %v13310_v40, %v8476_v54  ;;  %v8492_v6 = vsub.f32 %v8472_v23, %v8476_v54  ;;  %v8474_v18 = vmax.f32 %v8464_v31, 0.0 }
0x17bd   : > { %v8486_v41 = vmul.f32 1.442695, %v8481_v32  ;;  %v8498_v21 = vmul.f32 1.442695, %v8493_v45  ;;  %v8479_v15 = vmax.f32 %v13320_v1, %v8475_v4 }
0x17be   : > { %v8484_v28 = vmul.f32 1.442695, %v8480_v29  ;;  %v8496_v63 = vmul.f32 1.442695, %v8492_v6  ;;  %v8478_v17 = vmax.f32 %v13323_v26, %v8474_v18 }
0x17bf   : > { %10703 = vpow2.f32 %v8486_v41  ;;  %v8483_v47 = vsub.f32 %v13320_v1, %v8479_v15  ;;  %v8495_v11 = vsub.f32 %v8475_v4, %v8479_v15 }
0x17c0   : > { %10705 = vpow2.f32 %v8498_v21  ;;  %v8482_v57 = vsub.f32 %v13323_v26, %v8478_v17  ;;  %v8494_v56 = vsub.f32 %v8474_v18, %v8478_v17 }
0x17c1   : > { %10707 = vpow2.f32 %v8484_v28  ;;  %v8490_v40 = vmul.f32 1.442695, %v8483_v47  ;;  %v8502_v10 = vmul.f32 1.442695, %v8495_v11 }
0x17c2   : > { %10709 = vpow2.f32 %v8496_v63  ;;  %v8488_v62 = vmul.f32 1.442695, %v8482_v57  ;;  %v8500_v49 = vmul.f32 1.442695, %v8494_v56 }
0x17c3   : > { %10711 = vpow2.f32 %v8490_v40 }
0x17c4   : > { %10713 = vpow2.f32 %v8502_v10 }
0x17c5   : > { %10715 = vpow2.f32 %v8488_v62 }
0x17c6   : > { %10717 = vpow2.f32 %v8500_v49 }
0x17c9   : > { %v10704_v60 = vpop.eup %10703 }
0x17ca   : > { %v10706_v20 = vpop.eup %10705  ;;  %v8505_v61 = vmul.f32 %v10704_v60, %v13335_v37  ;;  %v8513_v1 = vmul.f32 %v10704_v60, %v13339_v16 }
0x17cb   : > { %v10708_v3 = vpop.eup %10707  ;;  %v8517_v26 = vmul.f32 %v10706_v20, %v7980_v7 }
0x17cc   : > { %v10710_v43 = vpop.eup %10709  ;;  %v8509_v8 = vadd.f32 %v10706_v20, %v8505_v61  ;;  %v8504_v9 = vmul.f32 %v10708_v3, %v13343_v19  ;;  %v8512_v12 = vmul.f32 %v10708_v3, %v13347_v30 }
0x17cd   : > { %v10712_v27 = vpop.eup %10711  ;;  %v8521_v14 = vadd.f32 %v8517_v26, %v8513_v1  ;;  %v8516_v58 = vmul.f32 %v10710_v43, %v7979_v53 }
0x17ce   : > { %v10714_v22 = vpop.eup %10713  ;;  %10719 = vrcp.f32 %v8509_v8  ;;  %v8508_v37 = vadd.f32 %v10710_v43, %v8504_v9  ;;  %v8507_v16 = vmul.f32 %v10712_v27, %v13351_v13  ;;  %v8515_v55 = vmul.f32 %v10712_v27, %v13355_v44 }
0x17cf   : > { %v10716_v7 = vpop.eup %10715  ;;  %v8520_v36 = vadd.f32 %v8516_v58, %v8512_v12  ;;  %v8519_v19 = vmul.f32 %v10714_v22, %v7982_v34 }
0x17d0   : > { %v10718_v25 = vpop.eup %10717  ;;  %10721 = vrcp.f32 %v8508_v37  ;;  %v8511_v30 = vadd.f32 %v10714_v22, %v8507_v16  ;;  %v8506_v42 = vmul.f32 %v10716_v7, %v13359_v35  ;;  %v8514_v5 = vmul.f32 %v10716_v7, %v13361_v48 }
0x17d1   : > { %v8523_v53 = vadd.f32 %v8519_v19, %v8515_v55  ;;  %v8518_v39 = vmul.f32 %v10718_v25, %v7981_v52 }
0x17d2   : > { %10723 = vrcp.f32 %v8511_v30  ;;  %v8510_v13 = vadd.f32 %v10718_v25, %v8506_v42 }
0x17d3   : > { %v8522_v44 = vadd.f32 %v8518_v39, %v8514_v5 }
0x17d4   : > { %10725 = vrcp.f32 %v8510_v13 }
0x17d8   : > { %v10720_v38 = vpop.eup %10719 }
0x17d9   : > { %v8529_v34 = vmul.f32 %v10720_v38, %v8521_v14 }
0x17da   : > { %v10722_v51 = vpop.eup %10721 }
0x17db   : > { %v8528_v33 = vmul.f32 %v10722_v51, %v8520_v36  ;;  %8533 = vst.msk [vmem:[%s782_s28 + $0x8] sm:$0xff] %vm2136_vm8, %v8529_v34 }
0x17dc   : > { %v10724_v35 = vpop.eup %10723 }
0x17dd   : > { %v8531_v48 = vmul.f32 %v10724_v35, %v8523_v53  ;;  %8532 = vst.msk [vmem:[%s782_s28] sm:$0xff] %vm2136_vm8, %v8528_v33 }
0x17de   : > { %v10726_v0 = vpop.eup %10725 }
0x17df   : > { %v8530_v52 = vmul.f32 %v10726_v0, %v8522_v44  ;;  %8535 = vst.msk [vmem:[%s782_s28 + $0x18] sm:$0xff] %vm2136_vm8, %v8531_v48 }
0x17e1   : > { %8534 = vst.msk [vmem:[%s782_s28 + $0x10] sm:$0xff] %vm2136_vm8, %v8530_v52 }
0x17e2   : > { %10774 = shalt.err (!%p10771_p5)
}
0x17e3   : > { %s10775_s2 = scalar_lea.hbm %s13504_s26, 512  ;;  %s10779_s5 = scalar_lea.hbm %s13579_s23, 1024 }
0x17e4   : > { %p10776_p6 = scmp.ne.s32.totalorder %s13504_s26, %s10775_s2  ;;  %p10780_p10 = scmp.lt.u32.totalorder %s13504_s26, %s13579_s23 }
0x17e5   : > { %p10781_p11 = scmp.lt.u32.totalorder %s10779_s5, %s10775_s2  ;;  %p10783_p13 = scmp.lt.u32.totalorder %s10775_s2, %s13504_s26 }
0x17e6   : > { %p10777_p7 = pnand %p10776_p6, %p11009_p4 }
0x17e7   : > { %p10782_p12 = por %p10781_p11, %p10780_p10 }
0x17e8   : > { %p10778_p9 = pneg %p10777_p7 }
0x17e9   : > { %p10784_p0 = por %p10783_p13, %p10782_p12 }
0x17eb   : > { %p10785_p1 = pnand %p10784_p0, %p10778_p9 }
0x17ed   : > { %10788 = shalt.err (!%p10785_p1)
}
0x17ee   : > { %s10847_s6 = smov 128   ;;  %s10848_s27 = smov 8  }
0x17ef   : > { %10504 = dma.vmem_to_hbm [thread:$0]  (%p11009_p4), %s13506_s0, 512, %s13504_s26, %s13510_s25, %s10847_s6, %s10847_s6, %s10848_s27  }
0x17f0 PF: > { %s13863_s28 = sld [smem:[#allocation5_spill]]  ;;  %p10510_p2 = scmp.ge.s32.totalorder %s10839_s1, 2 }
0x17f2   : > { %p10507_p3 = pnand %p10510_p2, %p11016_p8 }
0x17f6   : > { %s8567_s3 = sand.u32 1, %s13863_s28  }
0x17f7   : > { %s8568_s2 = scalar_lea.sflag [#allocation3], %s8567_s3 }
0x17f8   : > { %10814 = dma.done.wait (!%p10507_p3), %s8568_s2, 512  }
0x17f9   : > { %10816 = vsyncadd (!%p10507_p3), %s8568_s2, 4294966784  ;;  %s36_s1 = sadd.s32 1, %s10839_s1   ;;  %s13865_s5 = sld [smem:[#allocation6_spill]] }
0x17fa   : > { %p33_p5 = scmp.ge.s32.totalorder %s36_s1, 4   ;;  %s13866_s24 = sld [smem:[#allocation10_spill]] }
0x17fb   : > { %s13867_s25 = sld [smem:[#allocation7_spill]]  ;;  %s13868_s7 = sld [smem:[#allocation8_spill]] }
0x17fc   : > { %s13869_s4 = smov %s10823_s30  ;;  %35 = sbr.rel (!%p33_p5) target bundleno = 14 (0xe), region = 156 }
0x17ff   : > { %s13870_s30 = smov %s13865_s5 }
0x1801   : > { %s13871_s5 = smov %s13868_s7 }
0x1803   :  { %8573 = vsyncpa [#allocation3], 1 }
0x1804   :  { %8575 = vsyncpa [#allocation3 + $0x1], 1 }

</bundles_post_ra>
